<compile_context>
chip_gen: v7x
topology: tpu7x:2x2x1
jax: 0.10.0
libtpu: 0.0.40
codegen_flags: <defaults>
</compile_context>

<pallas_src>
import jax
import jax.numpy as jnp
from jax.experimental import pallas as pl
from jax.experimental.pallas import tpu as pltpu

OUT_SCALE = 1e-3            # SiamFC head default out_scale

# ---- problem geometry ----
CIN = 3
CFEAT = 256
HZ = WZ = 5                 # template feature map (11x11 input, k3 s2)
HX = WX = 9                 # search feature map   (19x19 input, k3 s2)
NZ = HZ * WZ                # 25
NX = HX * WX                # 81
HO = HX - HZ + 1            # 5
WO = WX - WZ + 1            # 5

KDIM = 3 * 3 * CIN          # 27 im2col K
KPAD = 128                  # K padded to a full lane tile
ZROWS = 48                  # z region: tap (ti,tj) at row 8*ti + tj
XROWS = 128                 # x region: position p at row p (81 real, rest pad)
PROWS = ZROWS + XROWS       # 176 per-batch patch rows
HID = 128                   # CBAM MLP hidden (16) padded to a full lane tile

_SMEM = pl.BlockSpec(memory_space=pltpu.MemorySpace.SMEM)


# -----------------------------------------------------------------------------
# The fused kernel: backbone(+backbone1) conv, ECA/ECA1/CBAM attention, both
# SiamFC heads and the final 1x1 conv — one grid step per batch element.
# -----------------------------------------------------------------------------
def _net_kernel(patch_ref, w_ref, b_ref, fc1_ref, fc2_ref, op_ref, scal_ref,
                o_ref):
    f32, bf16 = jnp.float32, jnp.bfloat16

    # ---- backbone + backbone1 for z and x patches: one MXU matmul ----
    feat = jnp.dot(patch_ref[0], w_ref[...], preferred_element_type=f32)
    feat = jnp.maximum(feat + b_ref[...], 0.0)                  # (176, 512)

    # ---- aligned z / x blocks; zero the layout-padding rows (= relu(bias)) ----
    zrow = jax.lax.broadcasted_iota(jnp.int32, (ZROWS, 1), 0)
    xrow = jax.lax.broadcasted_iota(jnp.int32, (XROWS, 1), 0)
    zm = jnp.where((zrow % 8 < WZ) & (zrow < 8 * HZ), feat[0:ZROWS, :], 0.0)
    xm = jnp.where(xrow < NX, feat[ZROWS:PROWS, :], 0.0)

    # ---- channel descriptors (lanes 0..255: backbone, 256..511: backbone1) ----
    avg_z = jnp.sum(zm, axis=0, keepdims=True) * (1.0 / NZ)     # (1, 512)
    max_z = jnp.max(zm, axis=0, keepdims=True)                  # ReLU => max ok
    avg_x = jnp.sum(xm, axis=0, keepdims=True) * (1.0 / NX)
    max_x = jnp.max(xm, axis=0, keepdims=True)

    # ---- ECA / ECA1: conv1d(k=3, pad=1) over channels, both heads at once ----
    d3 = jnp.concatenate([avg_z, max_z, max_x], axis=0)         # (3, 512)
    lane = jax.lax.broadcasted_iota(jnp.int32, d3.shape, 1)
    left = jnp.where((lane == 0) | (lane == CFEAT), 0.0,
                     pltpu.roll(d3, 1, axis=1))                 # p[c-1]
    right = jnp.where((lane == CFEAT - 1) | (lane == 2 * CFEAT - 1), 0.0,
                      pltpu.roll(d3, 2 * CFEAT - 1, axis=1))    # p[c+1]
    conv_a = scal_ref[0] * left[0:1] + scal_ref[1] * d3[0:1] + scal_ref[2] * right[0:1]
    conv_m = scal_ref[3] * left[1:3] + scal_ref[4] * d3[1:3] + scal_ref[5] * right[1:3]
    sig_a = jax.nn.sigmoid(conv_a)      # (1, 512)  ECA(avg)  for z1|z2
    sig_m = jax.nn.sigmoid(conv_m)      # (2, 512)  ECA1(max) row0: z, row1: x

    # ---- template branch: tematt(z) + (attse(z) + z) ----
    z_a = zm * (sig_a + sig_m[0:1] + 1.0)                       # (48, 512)

    # ---- CBAM channel attention on x (shared MLP, hidden padded to 128) ----
    q4 = jnp.concatenate([avg_x[:, 0:CFEAT], avg_x[:, CFEAT:],
                          max_x[:, 0:CFEAT], max_x[:, CFEAT:]], axis=0)  # (4,256)
    h4 = jnp.maximum(jnp.dot(q4.astype(bf16), fc1_ref[...],
                             preferred_element_type=f32), 0.0)
    m4 = jnp.dot(h4.astype(bf16), fc2_ref[...], preferred_element_type=f32)
    ca = jax.nn.sigmoid(jnp.concatenate([m4[0:1] + m4[2:3],
                                         m4[1:2] + m4[3:4]], axis=1))    # (1,512)
    xc = xm * ca

    # ---- CBAM spatial attention: dense 7x7 operator (avg|max fused), per head ----
    s1 = jnp.concatenate([jnp.mean(xc[:, 0:CFEAT], axis=1, keepdims=True),
                          jnp.max(xc[:, 0:CFEAT], axis=1, keepdims=True)], axis=0)
    s2 = jnp.concatenate([jnp.mean(xc[:, CFEAT:], axis=1, keepdims=True),
                          jnp.max(xc[:, CFEAT:], axis=1, keepdims=True)], axis=0)
    sa1 = jax.nn.sigmoid(jnp.dot(op_ref[...], s1.astype(bf16),
                                 preferred_element_type=f32) + scal_ref[9])
    sa2 = jax.nn.sigmoid(jnp.dot(op_ref[...], s2.astype(bf16),
                                 preferred_element_type=f32) + scal_ref[9])

    # ---- search branch: detatt(x) + (attse(x) + x), per head ----
    scale_x = sig_m[1:2] + 1.0
    x_a1 = xc[:, 0:CFEAT] * sa1 + xm[:, 0:CFEAT] * scale_x[:, 0:CFEAT]   # (128,256)
    x_a2 = xc[:, CFEAT:] * sa2 + xm[:, CFEAT:] * scale_x[:, CFEAT:]

    # ---- SiamFC heads: channel contraction on the MXU (Gram: taps x positions) ----
    zb = z_a.astype(bf16)
    dn = (((1,), (1,)), ((), ()))       # contract channel (last) dims
    g1 = jax.lax.dot_general(zb[:, 0:CFEAT], x_a1.astype(bf16), dn,
                             preferred_element_type=f32)        # (48, 128)
    g2 = jax.lax.dot_general(zb[:, CFEAT:], x_a2.astype(bf16), dn,
                             preferred_element_type=f32)

    # ---- diagonal band-sum: r[m] = sum_{ti,tj} g[8*ti+tj, m + 9*ti + tj] ----
    # Stage 1: aligned 8-row groups (one per ti) rolled by -9*ti along lanes.
    # Stage 2: per-row extra roll by -tj, summed into a single 128-lane row.
    def band_sum(g):
        a = g[0:8, :]
        for ti in range(1, HZ):
            a = a + pltpu.roll(g[8 * ti:8 * ti + 8, :], XROWS - WX * ti, axis=1)
        r = a[0:1, :]
        for tj in range(1, WZ):
            r = r + pltpu.roll(a, XROWS - tj, axis=1)[tj:tj + 1, :]
        return r                                                # (1, 128)

    r1 = band_sum(g1) * OUT_SCALE
    r2 = band_sum(g2) * OUT_SCALE

    # final Conv2d(2,1,1) on cat([out1+out2, out1*out2]) (see header note)
    resp = scal_ref[6] * (r1 + r2) + scal_ref[7] * (r1 * r2) + scal_ref[8]
    o_ref[0] = jnp.broadcast_to(resp, (8, 128))                 # lane-dense store


# -----------------------------------------------------------------------------
# Host-side helpers (plain JAX glue, traced/fused by XLA)
# -----------------------------------------------------------------------------
def _im2col(x_nhwc, k=3, stride=2):
    B, H, W, C = x_nhwc.shape
    Ho = (H - k) // stride + 1
    Wo = (W - k) // stride + 1
    cols = []
    for dh in range(k):
        for dw in range(k):
            cols.append(jax.lax.slice(
                x_nhwc, (0, dh, dw, 0),
                (B, dh + stride * (Ho - 1) + 1, dw + stride * (Wo - 1) + 1, C),
                (1, stride, stride, 1)))
    patches = jnp.stack(cols, axis=3)                           # (B,Ho,Wo,k*k,C)
    return patches.reshape(B, Ho * Wo, k * k * C), Ho, Wo


def _spatial_operator(spw, k=7):
    """Dense (128,256) operator [avg_op | max_op] for the 7x7 CBAM spatial conv."""
    taps = spw[: k * k * 2].reshape(k, k, 2)
    pos = jnp.arange(NX)
    pi, pj = pos // WX, pos % WX
    dh = pi[None, :] - pi[:, None] + k // 2                     # [q, p]
    dw = pj[None, :] - pj[:, None] + k // 2
    valid = (dh >= 0) & (dh < k) & (dw >= 0) & (dw < k)
    dhc = jnp.clip(dh, 0, k - 1)
    dwc = jnp.clip(dw, 0, k - 1)
    aa = jnp.where(valid, taps[dhc, dwc, 0], 0.0)
    am = jnp.where(valid, taps[dhc, dwc, 1], 0.0)
    op = jnp.zeros((XROWS, 2 * XROWS), jnp.float32)
    op = op.at[0:NX, 0:NX].set(aa)
    op = op.at[0:NX, XROWS:XROWS + NX].set(am)
    return op


# -----------------------------------------------------------------------------
# Full Net forward
# -----------------------------------------------------------------------------
def net_forward(z_nchw, x_nchw, p):
    f32 = jnp.float32
    B = z_nchw.shape[0]
    z = jnp.transpose(z_nchw, (0, 2, 3, 1))                     # NCHW -> NHWC
    x = jnp.transpose(x_nchw, (0, 2, 3, 1))

    pz, hz, wz = _im2col(z)                                     # (B, 25, 27)
    px, hx, wx = _im2col(x)                                     # (B, 81, 27)
    assert (hz, wz, hx, wx) == (HZ, WZ, HX, WX)

    # z taps scattered to rows 8*ti + tj of a 48-row block; x at rows 0..80 of 128
    pz = pz.reshape(B, HZ, WZ, KDIM)
    pz = jnp.pad(pz, ((0, 0), (0, 0), (0, 8 - WZ), (0, 0))).reshape(B, 8 * HZ, KDIM)
    pz = jnp.pad(pz, ((0, 0), (0, ZROWS - 8 * HZ), (0, 0)))     # (B, 48, 27)
    px = jnp.pad(px, ((0, 0), (0, XROWS - NX), (0, 0)))         # (B, 128, 27)
    patches = jnp.concatenate([pz, px], axis=1)                 # (B, 176, 27)
    patches = jnp.pad(patches,
                      ((0, 0), (0, 0), (0, KPAD - KDIM))).astype(jnp.bfloat16)

    wcat = jnp.concatenate([p["bb_w"].reshape(KDIM, CFEAT),
                            p["bb1_w"].reshape(KDIM, CFEAT)], axis=1)   # (27, 512)
    wpad = jnp.pad(wcat, ((0, KPAD - KDIM), (0, 0))).astype(jnp.bfloat16)
    bcat = jnp.concatenate([p["bb_b"], p["bb1_b"]], axis=1)             # (1, 512)

    fc1p = jnp.pad(p["fc1"], ((0, 0), (0, HID - p["fc1"].shape[1]))
                   ).astype(jnp.bfloat16)                               # (256, 128)
    fc2p = jnp.pad(p["fc2"], ((0, HID - p["fc2"].shape[0]), (0, 0))
                   ).astype(jnp.bfloat16)                               # (128, 256)
    op = _spatial_operator(p["spw"]).astype(jnp.bfloat16)               # (128, 256)
    scal = jnp.concatenate([p["eca_w"], p["eca1_w"], p["cw"], p["spw"][98:99]])

    out = pl.pallas_call(
        _net_kernel,
        out_shape=jax.ShapeDtypeStruct((B, 8, 128), f32),
        grid=(B,),
        in_specs=[
            pl.BlockSpec((1, PROWS, KPAD), lambda b: (b, 0, 0)),    # im2col patches
            pl.BlockSpec((KPAD, 2 * CFEAT), lambda b: (0, 0)),      # backbone weights
            pl.BlockSpec((1, 2 * CFEAT), lambda b: (0, 0)),         # backbone biases
            pl.BlockSpec((CFEAT, HID), lambda b: (0, 0)),           # CBAM fc1 (padded)
            pl.BlockSpec((HID, CFEAT), lambda b: (0, 0)),           # CBAM fc2 (padded)
            pl.BlockSpec((XROWS, 2 * XROWS), lambda b: (0, 0)),     # spatial operator
            _SMEM,                                                  # 10 scalars
        ],
        out_specs=pl.BlockSpec((1, 8, 128), lambda b: (b, 0, 0)),
        compiler_params=pltpu.CompilerParams(dimension_semantics=("parallel",)),
    )(patches, wpad, bcat, fc1p, fc2p, op, scal)

    # lanes m = 9*i + j hold the response; crop the valid 5x5 window -> NCHW
    resp = out[:, 0, :NX].reshape(B, HX, WX)[:, :HO, :WO]
    return resp[:, None, :, :]


def init_params(key, cin=CIN, cfeat=CFEAT, red=16):
    ks = jax.random.split(key, 9)
    p = {}
    p["bb_w"] = 0.1 * jax.random.normal(ks[0], (3, 3, cin, cfeat), jnp.float32)
    p["bb_b"] = 0.01 * jax.random.normal(ks[1], (1, cfeat), jnp.float32)
    p["bb1_w"] = 0.1 * jax.random.normal(ks[2], (3, 3, cin, cfeat), jnp.float32)
    p["bb1_b"] = 0.01 * jax.random.normal(ks[3], (1, cfeat), jnp.float32)
    p["eca_w"] = 0.5 * jax.random.normal(ks[4], (3,), jnp.float32)       # ECALayer
    p["eca1_w"] = 0.5 * jax.random.normal(ks[5], (3,), jnp.float32)      # ECALayer1
    p["fc1"] = 0.1 * jax.random.normal(ks[6], (cfeat, cfeat // red), jnp.float32)
    p["fc2"] = 0.1 * jax.random.normal(ks[7], (cfeat // red, cfeat), jnp.float32)
    p["spw"] = jnp.concatenate(
        [0.1 * jax.random.normal(ks[8], (98,), jnp.float32),
         jnp.zeros((1,), jnp.float32)])                                  # 7x7x2 + bias
    p["cw"] = jnp.array([0.7, 0.3, 0.01], jnp.float32)                   # Conv2d(2,1,1)
    return p


if __name__ == "__main__":
    key = jax.random.PRNGKey(0)
    kz, kx, kp = jax.random.split(key, 3)

    B = 2
    z = jax.random.normal(kz, (B, 3, 11, 11), jnp.float32)   # exemplar (NCHW)
    x = jax.random.normal(kx, (B, 3, 19, 19), jnp.float32)   # search   (NCHW)
    params = init_params(kp)

    fwd = jax.jit(net_forward)
    out = jax.block_until_ready(fwd(z, x, params))

    assert out.shape == (B, 1, HO, WO), out.shape
    assert bool(jnp.all(jnp.isfinite(out)))
    print("KERNEL_OK")
</pallas_src>

<mosaic_0001>
module attributes {stable_mosaic.version = 11 : i64} {
  func.func @_net_kernel(%arg0: i32, %arg1: memref<1x176x128xbf16, #tpu.memory_space<vmem>>, %arg2: memref<128x512xbf16, #tpu.memory_space<vmem>>, %arg3: memref<1x512xf32, #tpu.memory_space<vmem>>, %arg4: memref<256x128xbf16, #tpu.memory_space<vmem>>, %arg5: memref<128x256xbf16, #tpu.memory_space<vmem>>, %arg6: memref<128x256xbf16, #tpu.memory_space<vmem>>, %arg7: memref<10xf32, #tpu.memory_space<smem>>, %arg8: memref<1x8x128xf32, #tpu.memory_space<vmem>>) attributes {dimension_semantics = [#tpu.dimension_semantics<parallel>], iteration_bounds = array<i64: 2>, scalar_prefetch = 0 : i64, scratch_operands = 0 : i64, tpu.core_type = #tpu.core_type<tc>, window_params = [{transform_indices = @transform_0, window_bounds = array<i64: 1, 176, 128>}, {pipeline_mode = #tpu.pipeline_mode<synchronous>, transform_indices = @transform_1, window_bounds = array<i64: 128, 512>}, {pipeline_mode = #tpu.pipeline_mode<synchronous>, transform_indices = @transform_2, window_bounds = array<i64: 1, 512>}, {pipeline_mode = #tpu.pipeline_mode<synchronous>, transform_indices = @transform_3, window_bounds = array<i64: 256, 128>}, {pipeline_mode = #tpu.pipeline_mode<synchronous>, transform_indices = @transform_4, window_bounds = array<i64: 128, 256>}, {pipeline_mode = #tpu.pipeline_mode<synchronous>, transform_indices = @transform_5, window_bounds = array<i64: 128, 256>}, {transform_indices = @transform_6, window_bounds = array<i64: 10>}, {transform_indices = @transform_7, window_bounds = array<i64: 1, 8, 128>}]} {
    %c0 = arith.constant 0 : index
    %c0_0 = arith.constant 0 : index
    %c0_1 = arith.constant 0 : index
    %0 = vector.load %arg1[%c0, %c0_0, %c0_1] : memref<1x176x128xbf16, #tpu.memory_space<vmem>>, vector<1x176x128xbf16>
    %1 = vector.shape_cast %0 : vector<1x176x128xbf16> to vector<176x128xbf16>
    %c0_2 = arith.constant 0 : index
    %c0_3 = arith.constant 0 : index
    %2 = vector.load %arg2[%c0_2, %c0_3] : memref<128x512xbf16, #tpu.memory_space<vmem>>, vector<128x512xbf16>
    %cst = arith.constant dense<0.000000e+00> : vector<176x512xf32>
    %3 = tpu.matmul %1, %2, %cst {dimension_numbers = #tpu.dot_dimension_numbers<[1], [0], [0], [1], [0, 0, 1, 1], [], []>} : vector<176x128xbf16>, vector<128x512xbf16>, vector<176x512xf32> -> vector<176x512xf32>
    %c0_4 = arith.constant 0 : index
    %c0_5 = arith.constant 0 : index
    %4 = vector.load %arg3[%c0_4, %c0_5] : memref<1x512xf32, #tpu.memory_space<vmem>>, vector<1x512xf32>
    %5 = vector.broadcast %4 : vector<1x512xf32> to vector<176x512xf32>
    %6 = arith.addf %3, %5 : vector<176x512xf32>
    %cst_6 = arith.constant 0.000000e+00 : f32
    %7 = vector.broadcast %cst_6 : f32 to vector<176x512xf32>
    %8 = arith.maximumf %6, %7 : vector<176x512xf32>
    %9 = tpu.iota {dimensions = array<i32: 0>} : vector<48x1xi32>
    %10 = tpu.iota {dimensions = array<i32: 0>} : vector<128x1xi32>
    %c8_i32 = arith.constant 8 : i32
    %c0_i32 = arith.constant 0 : i32
    %11 = arith.cmpi eq, %c8_i32, %c0_i32 : i32
    %c1_i32 = arith.constant 1 : i32
    %12 = arith.select %11, %c1_i32, %c8_i32 : i32
    %13 = vector.broadcast %12 : i32 to vector<48x1xi32>
    %14 = arith.remsi %9, %13 : vector<48x1xi32>
    %c0_i32_7 = arith.constant 0 : i32
    %15 = vector.broadcast %c0_i32_7 : i32 to vector<48x1xi32>
    %16 = arith.cmpi ne, %14, %15 : vector<48x1xi32>
    %c0_i32_8 = arith.constant 0 : i32
    %17 = vector.broadcast %c0_i32_8 : i32 to vector<48x1xi32>
    %18 = arith.cmpi slt, %14, %17 : vector<48x1xi32>
    %c0_i32_9 = arith.constant 0 : i32
    %19 = arith.cmpi slt, %12, %c0_i32_9 : i32
    %20 = vector.broadcast %19 : i1 to vector<48x1xi1>
    %21 = vector.broadcast %20 : vector<48x1xi1> to vector<48x1xi1>
    %22 = arith.xori %18, %21 : vector<48x1xi1>
    %23 = arith.andi %22, %16 : vector<48x1xi1>
    %24 = vector.broadcast %12 : i32 to vector<48x1xi32>
    %25 = arith.addi %14, %24 : vector<48x1xi32>
    %26 = arith.select %23, %25, %14 : vector<48x1xi1>, vector<48x1xi32>
    %c5_i32 = arith.constant 5 : i32
    %27 = vector.broadcast %c5_i32 : i32 to vector<48x1xi32>
    %28 = arith.cmpi slt, %26, %27 : vector<48x1xi32>
    %c40_i32 = arith.constant 40 : i32
    %29 = vector.broadcast %c40_i32 : i32 to vector<48x1xi32>
    %30 = arith.cmpi slt, %9, %29 : vector<48x1xi32>
    %31 = arith.andi %28, %30 : vector<48x1xi1>
    %32 = vector.extract_strided_slice %8 {offsets = [0, 0], sizes = [48, 512], strides = [1, 1]} : vector<176x512xf32> to vector<48x512xf32>
    %cst_10 = arith.constant 0.000000e+00 : f32
    %33 = vector.shape_cast %31 : vector<48x1xi1> to vector<48x1xi1>
    %34 = vector.broadcast %33 : vector<48x1xi1> to vector<48x512xi1>
    %35 = vector.broadcast %cst_10 : f32 to vector<48x512xf32>
    %36 = arith.select %34, %32, %35 : vector<48x512xi1>, vector<48x512xf32>
    %c81_i32 = arith.constant 81 : i32
    %37 = vector.broadcast %c81_i32 : i32 to vector<128x1xi32>
    %38 = arith.cmpi slt, %10, %37 : vector<128x1xi32>
    %39 = vector.extract_strided_slice %8 {offsets = [48, 0], sizes = [128, 512], strides = [1, 1]} : vector<176x512xf32> to vector<128x512xf32>
    %cst_11 = arith.constant 0.000000e+00 : f32
    %40 = vector.shape_cast %38 : vector<128x1xi1> to vector<128x1xi1>
    %41 = vector.broadcast %40 : vector<128x1xi1> to vector<128x512xi1>
    %42 = vector.broadcast %cst_11 : f32 to vector<128x512xf32>
    %43 = arith.select %41, %39, %42 : vector<128x512xi1>, vector<128x512xf32>
    %cst_12 = arith.constant dense<0.000000e+00> : vector<512xf32>
    %44 = vector.multi_reduction <add>, %36, %cst_12 [0] : vector<48x512xf32> to vector<512xf32>
    %45 = vector.shape_cast %44 : vector<512xf32> to vector<1x512xf32>
    %cst_13 = arith.constant 4.000000e-02 : f32
    %46 = vector.broadcast %cst_13 : f32 to vector<1x512xf32>
    %47 = arith.mulf %45, %46 : vector<1x512xf32>
    %cst_14 = arith.constant dense<0xFF800000> : vector<512xf32>
    %48 = vector.multi_reduction <maximumf>, %36, %cst_14 [0] : vector<48x512xf32> to vector<512xf32>
    %49 = vector.shape_cast %48 : vector<512xf32> to vector<1x512xf32>
    %cst_15 = arith.constant dense<0.000000e+00> : vector<512xf32>
    %50 = vector.multi_reduction <add>, %43, %cst_15 [0] : vector<128x512xf32> to vector<512xf32>
    %51 = vector.shape_cast %50 : vector<512xf32> to vector<1x512xf32>
    %cst_16 = arith.constant 0.0123456791 : f32
    %52 = vector.broadcast %cst_16 : f32 to vector<1x512xf32>
    %53 = arith.mulf %51, %52 : vector<1x512xf32>
    %cst_17 = arith.constant dense<0xFF800000> : vector<512xf32>
    %54 = vector.multi_reduction <maximumf>, %43, %cst_17 [0] : vector<128x512xf32> to vector<512xf32>
    %55 = vector.shape_cast %54 : vector<512xf32> to vector<1x512xf32>
    %56 = tpu.concatenate %47, %49, %55 in 0 : vector<1x512xf32>, vector<1x512xf32>, vector<1x512xf32> -> vector<3x512xf32>
    %57 = tpu.iota {dimensions = array<i32: 1>} : vector<3x512xi32>
    %c0_i32_18 = arith.constant 0 : i32
    %58 = vector.broadcast %c0_i32_18 : i32 to vector<3x512xi32>
    %59 = arith.cmpi eq, %57, %58 : vector<3x512xi32>
    %c256_i32 = arith.constant 256 : i32
    %60 = vector.broadcast %c256_i32 : i32 to vector<3x512xi32>
    %61 = arith.cmpi eq, %57, %60 : vector<3x512xi32>
    %62 = arith.ori %59, %61 : vector<3x512xi1>
    %c1_i32_19 = arith.constant 1 : i32
    %63 = tpu.dynamic_rotate %56 by %c1_i32_19 dim 1 : vector<3x512xf32>, i32 -> vector<3x512xf32>
    %cst_20 = arith.constant 0.000000e+00 : f32
    %64 = vector.broadcast %cst_20 : f32 to vector<3x512xf32>
    %65 = arith.select %62, %64, %63 : vector<3x512xi1>, vector<3x512xf32>
    %c255_i32 = arith.constant 255 : i32
    %66 = vector.broadcast %c255_i32 : i32 to vector<3x512xi32>
    %67 = arith.cmpi eq, %57, %66 : vector<3x512xi32>
    %c511_i32 = arith.constant 511 : i32
    %68 = vector.broadcast %c511_i32 : i32 to vector<3x512xi32>
    %69 = arith.cmpi eq, %57, %68 : vector<3x512xi32>
    %70 = arith.ori %67, %69 : vector<3x512xi1>
    %c511_i32_21 = arith.constant 511 : i32
    %71 = tpu.dynamic_rotate %56 by %c511_i32_21 dim 1 : vector<3x512xf32>, i32 -> vector<3x512xf32>
    %cst_22 = arith.constant 0.000000e+00 : f32
    %72 = vector.broadcast %cst_22 : f32 to vector<3x512xf32>
    %73 = arith.select %70, %72, %71 : vector<3x512xi1>, vector<3x512xf32>
    %c0_23 = arith.constant 0 : index
    %74 = memref.load %arg7[%c0_23] : memref<10xf32, #tpu.memory_space<smem>>
    %75 = vector.extract_strided_slice %65 {offsets = [0, 0], sizes = [1, 512], strides = [1, 1]} : vector<3x512xf32> to vector<1x512xf32>
    %76 = vector.broadcast %74 : f32 to vector<1x512xf32>
    %77 = arith.mulf %76, %75 : vector<1x512xf32>
    %c1 = arith.constant 1 : index
    %78 = memref.load %arg7[%c1] : memref<10xf32, #tpu.memory_space<smem>>
    %79 = vector.extract_strided_slice %56 {offsets = [0, 0], sizes = [1, 512], strides = [1, 1]} : vector<3x512xf32> to vector<1x512xf32>
    %80 = vector.broadcast %78 : f32 to vector<1x512xf32>
    %81 = arith.mulf %80, %79 : vector<1x512xf32>
    %82 = arith.addf %77, %81 : vector<1x512xf32>
    %c2 = arith.constant 2 : index
    %83 = memref.load %arg7[%c2] : memref<10xf32, #tpu.memory_space<smem>>
    %84 = vector.extract_strided_slice %73 {offsets = [0, 0], sizes = [1, 512], strides = [1, 1]} : vector<3x512xf32> to vector<1x512xf32>
    %85 = vector.broadcast %83 : f32 to vector<1x512xf32>
    %86 = arith.mulf %85, %84 : vector<1x512xf32>
    %87 = arith.addf %82, %86 : vector<1x512xf32>
    %c3 = arith.constant 3 : index
    %88 = memref.load %arg7[%c3] : memref<10xf32, #tpu.memory_space<smem>>
    %89 = vector.extract_strided_slice %65 {offsets = [1, 0], sizes = [2, 512], strides = [1, 1]} : vector<3x512xf32> to vector<2x512xf32>
    %90 = vector.broadcast %88 : f32 to vector<2x512xf32>
    %91 = arith.mulf %90, %89 : vector<2x512xf32>
    %c4 = arith.constant 4 : index
    %92 = memref.load %arg7[%c4] : memref<10xf32, #tpu.memory_space<smem>>
    %93 = vector.extract_strided_slice %56 {offsets = [1, 0], sizes = [2, 512], strides = [1, 1]} : vector<3x512xf32> to vector<2x512xf32>
    %94 = vector.broadcast %92 : f32 to vector<2x512xf32>
    %95 = arith.mulf %94, %93 : vector<2x512xf32>
    %96 = arith.addf %91, %95 : vector<2x512xf32>
    %c5 = arith.constant 5 : index
    %97 = memref.load %arg7[%c5] : memref<10xf32, #tpu.memory_space<smem>>
    %98 = vector.extract_strided_slice %73 {offsets = [1, 0], sizes = [2, 512], strides = [1, 1]} : vector<3x512xf32> to vector<2x512xf32>
    %99 = vector.broadcast %97 : f32 to vector<2x512xf32>
    %100 = arith.mulf %99, %98 : vector<2x512xf32>
    %101 = arith.addf %96, %100 : vector<2x512xf32>
    %102 = arith.negf %87 : vector<1x512xf32>
    %103 = math.exp %102 : vector<1x512xf32>
    %cst_24 = arith.constant 1.000000e+00 : f32
    %104 = vector.broadcast %cst_24 : f32 to vector<1x512xf32>
    %105 = arith.addf %104, %103 : vector<1x512xf32>
    %106 = arith.divf %104, %105 : vector<1x512xf32>
    %107 = arith.negf %101 : vector<2x512xf32>
    %108 = math.exp %107 : vector<2x512xf32>
    %cst_25 = arith.constant 1.000000e+00 : f32
    %109 = vector.broadcast %cst_25 : f32 to vector<2x512xf32>
    %110 = arith.addf %109, %108 : vector<2x512xf32>
    %111 = arith.divf %109, %110 : vector<2x512xf32>
    %112 = vector.extract_strided_slice %111 {offsets = [0, 0], sizes = [1, 512], strides = [1, 1]} : vector<2x512xf32> to vector<1x512xf32>
    %113 = arith.addf %106, %112 : vector<1x512xf32>
    %cst_26 = arith.constant 1.000000e+00 : f32
    %114 = vector.broadcast %cst_26 : f32 to vector<1x512xf32>
    %115 = arith.addf %113, %114 : vector<1x512xf32>
    %116 = vector.broadcast %115 : vector<1x512xf32> to vector<48x512xf32>
    %117 = arith.mulf %36, %116 : vector<48x512xf32>
    %118 = vector.extract_strided_slice %53 {offsets = [0, 0], sizes = [1, 256], strides = [1, 1]} : vector<1x512xf32> to vector<1x256xf32>
    %119 = vector.extract_strided_slice %53 {offsets = [0, 256], sizes = [1, 256], strides = [1, 1]} : vector<1x512xf32> to vector<1x256xf32>
    %120 = vector.extract_strided_slice %55 {offsets = [0, 0], sizes = [1, 256], strides = [1, 1]} : vector<1x512xf32> to vector<1x256xf32>
    %121 = vector.extract_strided_slice %55 {offsets = [0, 256], sizes = [1, 256], strides = [1, 1]} : vector<1x512xf32> to vector<1x256xf32>
    %122 = tpu.concatenate %118, %119, %120, %121 in 0 : vector<1x256xf32>, vector<1x256xf32>, vector<1x256xf32>, vector<1x256xf32> -> vector<4x256xf32>
    %123 = arith.truncf %122 : vector<4x256xf32> to vector<4x256xbf16>
    %c0_27 = arith.constant 0 : index
    %c0_28 = arith.constant 0 : index
    %124 = vector.load %arg4[%c0_27, %c0_28] : memref<256x128xbf16, #tpu.memory_space<vmem>>, vector<256x128xbf16>
    %cst_29 = arith.constant dense<0.000000e+00> : vector<4x128xf32>
    %125 = tpu.matmul %123, %124, %cst_29 {dimension_numbers = #tpu.dot_dimension_numbers<[1], [0], [0], [1], [0, 0, 1, 1], [], []>} : vector<4x256xbf16>, vector<256x128xbf16>, vector<4x128xf32> -> vector<4x128xf32>
    %cst_30 = arith.constant 0.000000e+00 : f32
    %126 = vector.broadcast %cst_30 : f32 to vector<4x128xf32>
    %127 = arith.maximumf %125, %126 : vector<4x128xf32>
    %128 = arith.truncf %127 : vector<4x128xf32> to vector<4x128xbf16>
    %c0_31 = arith.constant 0 : index
    %c0_32 = arith.constant 0 : index
    %129 = vector.load %arg5[%c0_31, %c0_32] : memref<128x256xbf16, #tpu.memory_space<vmem>>, vector<128x256xbf16>
    %cst_33 = arith.constant dense<0.000000e+00> : vector<4x256xf32>
    %130 = tpu.matmul %128, %129, %cst_33 {dimension_numbers = #tpu.dot_dimension_numbers<[1], [0], [0], [1], [0, 0, 1, 1], [], []>} : vector<4x128xbf16>, vector<128x256xbf16>, vector<4x256xf32> -> vector<4x256xf32>
    %131 = vector.extract_strided_slice %130 {offsets = [0, 0], sizes = [1, 256], strides = [1, 1]} : vector<4x256xf32> to vector<1x256xf32>
    %132 = vector.extract_strided_slice %130 {offsets = [2, 0], sizes = [1, 256], strides = [1, 1]} : vector<4x256xf32> to vector<1x256xf32>
    %133 = arith.addf %131, %132 : vector<1x256xf32>
    %134 = vector.extract_strided_slice %130 {offsets = [1, 0], sizes = [1, 256], strides = [1, 1]} : vector<4x256xf32> to vector<1x256xf32>
    %135 = vector.extract_strided_slice %130 {offsets = [3, 0], sizes = [1, 256], strides = [1, 1]} : vector<4x256xf32> to vector<1x256xf32>
    %136 = arith.addf %134, %135 : vector<1x256xf32>
    %137 = tpu.concatenate %133, %136 in 1 : vector<1x256xf32>, vector<1x256xf32> -> vector<1x512xf32>
    %138 = arith.negf %137 : vector<1x512xf32>
    %139 = math.exp %138 : vector<1x512xf32>
    %cst_34 = arith.constant 1.000000e+00 : f32
    %140 = vector.broadcast %cst_34 : f32 to vector<1x512xf32>
    %141 = arith.addf %140, %139 : vector<1x512xf32>
    %142 = arith.divf %140, %141 : vector<1x512xf32>
    %143 = vector.broadcast %142 : vector<1x512xf32> to vector<128x512xf32>
    %144 = arith.mulf %43, %143 : vector<128x512xf32>
    %145 = vector.extract_strided_slice %144 {offsets = [0, 0], sizes = [128, 256], strides = [1, 1]} : vector<128x512xf32> to vector<128x256xf32>
    %cst_35 = arith.constant dense<0.000000e+00> : vector<128xf32>
    %146 = vector.multi_reduction <add>, %145, %cst_35 [1] : vector<128x256xf32> to vector<128xf32>
    %147 = vector.shape_cast %146 : vector<128xf32> to vector<128x1xf32>
    %cst_36 = arith.constant 2.560000e+02 : f32
    %148 = vector.broadcast %cst_36 : f32 to vector<128x1xf32>
    %149 = arith.divf %147, %148 : vector<128x1xf32>
    %150 = vector.extract_strided_slice %144 {offsets = [0, 0], sizes = [128, 256], strides = [1, 1]} : vector<128x512xf32> to vector<128x256xf32>
    %cst_37 = arith.constant dense<0xFF800000> : vector<128xf32>
    %151 = vector.multi_reduction <maximumf>, %150, %cst_37 [1] : vector<128x256xf32> to vector<128xf32>
    %152 = vector.shape_cast %151 : vector<128xf32> to vector<128x1xf32>
    %153 = tpu.concatenate %149, %152 in 0 : vector<128x1xf32>, vector<128x1xf32> -> vector<256x1xf32>
    %154 = vector.extract_strided_slice %144 {offsets = [0, 256], sizes = [128, 256], strides = [1, 1]} : vector<128x512xf32> to vector<128x256xf32>
    %cst_38 = arith.constant dense<0.000000e+00> : vector<128xf32>
    %155 = vector.multi_reduction <add>, %154, %cst_38 [1] : vector<128x256xf32> to vector<128xf32>
    %156 = vector.shape_cast %155 : vector<128xf32> to vector<128x1xf32>
    %cst_39 = arith.constant 2.560000e+02 : f32
    %157 = vector.broadcast %cst_39 : f32 to vector<128x1xf32>
    %158 = arith.divf %156, %157 : vector<128x1xf32>
    %159 = vector.extract_strided_slice %144 {offsets = [0, 256], sizes = [128, 256], strides = [1, 1]} : vector<128x512xf32> to vector<128x256xf32>
    %cst_40 = arith.constant dense<0xFF800000> : vector<128xf32>
    %160 = vector.multi_reduction <maximumf>, %159, %cst_40 [1] : vector<128x256xf32> to vector<128xf32>
    %161 = vector.shape_cast %160 : vector<128xf32> to vector<128x1xf32>
    %162 = tpu.concatenate %158, %161 in 0 : vector<128x1xf32>, vector<128x1xf32> -> vector<256x1xf32>
    %c0_41 = arith.constant 0 : index
    %c0_42 = arith.constant 0 : index
    %163 = vector.load %arg6[%c0_41, %c0_42] : memref<128x256xbf16, #tpu.memory_space<vmem>>, vector<128x256xbf16>
    %164 = arith.truncf %153 : vector<256x1xf32> to vector<256x1xbf16>
    %cst_43 = arith.constant dense<0.000000e+00> : vector<128x1xf32>
    %165 = tpu.matmul %163, %164, %cst_43 {dimension_numbers = #tpu.dot_dimension_numbers<[1], [0], [0], [1], [0, 0, 1, 1], [], []>} : vector<128x256xbf16>, vector<256x1xbf16>, vector<128x1xf32> -> vector<128x1xf32>
    %c9 = arith.constant 9 : index
    %166 = memref.load %arg7[%c9] : memref<10xf32, #tpu.memory_space<smem>>
    %167 = vector.broadcast %166 : f32 to vector<128x1xf32>
    %168 = arith.addf %165, %167 : vector<128x1xf32>
    %169 = arith.negf %168 : vector<128x1xf32>
    %170 = math.exp %169 : vector<128x1xf32>
    %cst_44 = arith.constant 1.000000e+00 : f32
    %171 = vector.broadcast %cst_44 : f32 to vector<128x1xf32>
    %172 = arith.addf %171, %170 : vector<128x1xf32>
    %173 = arith.divf %171, %172 : vector<128x1xf32>
    %c0_45 = arith.constant 0 : index
    %c0_46 = arith.constant 0 : index
    %174 = vector.load %arg6[%c0_45, %c0_46] : memref<128x256xbf16, #tpu.memory_space<vmem>>, vector<128x256xbf16>
    %175 = arith.truncf %162 : vector<256x1xf32> to vector<256x1xbf16>
    %cst_47 = arith.constant dense<0.000000e+00> : vector<128x1xf32>
    %176 = tpu.matmul %174, %175, %cst_47 {dimension_numbers = #tpu.dot_dimension_numbers<[1], [0], [0], [1], [0, 0, 1, 1], [], []>} : vector<128x256xbf16>, vector<256x1xbf16>, vector<128x1xf32> -> vector<128x1xf32>
    %c9_48 = arith.constant 9 : index
    %177 = memref.load %arg7[%c9_48] : memref<10xf32, #tpu.memory_space<smem>>
    %178 = vector.broadcast %177 : f32 to vector<128x1xf32>
    %179 = arith.addf %176, %178 : vector<128x1xf32>
    %180 = arith.negf %179 : vector<128x1xf32>
    %181 = math.exp %180 : vector<128x1xf32>
    %cst_49 = arith.constant 1.000000e+00 : f32
    %182 = vector.broadcast %cst_49 : f32 to vector<128x1xf32>
    %183 = arith.addf %182, %181 : vector<128x1xf32>
    %184 = arith.divf %182, %183 : vector<128x1xf32>
    %185 = vector.extract_strided_slice %111 {offsets = [1, 0], sizes = [1, 512], strides = [1, 1]} : vector<2x512xf32> to vector<1x512xf32>
    %cst_50 = arith.constant 1.000000e+00 : f32
    %186 = vector.broadcast %cst_50 : f32 to vector<1x512xf32>
    %187 = arith.addf %185, %186 : vector<1x512xf32>
    %188 = vector.extract_strided_slice %144 {offsets = [0, 0], sizes = [128, 256], strides = [1, 1]} : vector<128x512xf32> to vector<128x256xf32>
    %189 = vector.broadcast %173 : vector<128x1xf32> to vector<128x256xf32>
    %190 = arith.mulf %188, %189 : vector<128x256xf32>
    %191 = vector.extract_strided_slice %43 {offsets = [0, 0], sizes = [128, 256], strides = [1, 1]} : vector<128x512xf32> to vector<128x256xf32>
    %192 = vector.extract_strided_slice %187 {offsets = [0, 0], sizes = [1, 256], strides = [1, 1]} : vector<1x512xf32> to vector<1x256xf32>
    %193 = vector.broadcast %192 : vector<1x256xf32> to vector<128x256xf32>
    %194 = arith.mulf %191, %193 : vector<128x256xf32>
    %195 = arith.addf %190, %194 : vector<128x256xf32>
    %196 = vector.extract_strided_slice %144 {offsets = [0, 256], sizes = [128, 256], strides = [1, 1]} : vector<128x512xf32> to vector<128x256xf32>
    %197 = vector.broadcast %184 : vector<128x1xf32> to vector<128x256xf32>
    %198 = arith.mulf %196, %197 : vector<128x256xf32>
    %199 = vector.extract_strided_slice %43 {offsets = [0, 256], sizes = [128, 256], strides = [1, 1]} : vector<128x512xf32> to vector<128x256xf32>
    %200 = vector.extract_strided_slice %187 {offsets = [0, 256], sizes = [1, 256], strides = [1, 1]} : vector<1x512xf32> to vector<1x256xf32>
    %201 = vector.broadcast %200 : vector<1x256xf32> to vector<128x256xf32>
    %202 = arith.mulf %199, %201 : vector<128x256xf32>
    %203 = arith.addf %198, %202 : vector<128x256xf32>
    %204 = arith.truncf %117 : vector<48x512xf32> to vector<48x512xbf16>
    %205 = vector.extract_strided_slice %204 {offsets = [0, 0], sizes = [48, 256], strides = [1, 1]} : vector<48x512xbf16> to vector<48x256xbf16>
    %206 = arith.truncf %195 : vector<128x256xf32> to vector<128x256xbf16>
    %cst_51 = arith.constant dense<0.000000e+00> : vector<48x128xf32>
    %207 = tpu.matmul %205, %206, %cst_51 {dimension_numbers = #tpu.dot_dimension_numbers<[1], [1], [0], [0], [0, 0, 1, 0], [], []>} : vector<48x256xbf16>, vector<128x256xbf16>, vector<48x128xf32> -> vector<48x128xf32>
    %208 = vector.extract_strided_slice %204 {offsets = [0, 256], sizes = [48, 256], strides = [1, 1]} : vector<48x512xbf16> to vector<48x256xbf16>
    %209 = arith.truncf %203 : vector<128x256xf32> to vector<128x256xbf16>
    %cst_52 = arith.constant dense<0.000000e+00> : vector<48x128xf32>
    %210 = tpu.matmul %208, %209, %cst_52 {dimension_numbers = #tpu.dot_dimension_numbers<[1], [1], [0], [0], [0, 0, 1, 0], [], []>} : vector<48x256xbf16>, vector<128x256xbf16>, vector<48x128xf32> -> vector<48x128xf32>
    %211 = vector.extract_strided_slice %207 {offsets = [0, 0], sizes = [8, 128], strides = [1, 1]} : vector<48x128xf32> to vector<8x128xf32>
    %212 = vector.extract_strided_slice %207 {offsets = [8, 0], sizes = [8, 128], strides = [1, 1]} : vector<48x128xf32> to vector<8x128xf32>
    %c119_i32 = arith.constant 119 : i32
    %213 = tpu.dynamic_rotate %212 by %c119_i32 dim 1 : vector<8x128xf32>, i32 -> vector<8x128xf32>
    %214 = arith.addf %211, %213 : vector<8x128xf32>
    %215 = vector.extract_strided_slice %207 {offsets = [16, 0], sizes = [8, 128], strides = [1, 1]} : vector<48x128xf32> to vector<8x128xf32>
    %c110_i32 = arith.constant 110 : i32
    %216 = tpu.dynamic_rotate %215 by %c110_i32 dim 1 : vector<8x128xf32>, i32 -> vector<8x128xf32>
    %217 = arith.addf %214, %216 : vector<8x128xf32>
    %218 = vector.extract_strided_slice %207 {offsets = [24, 0], sizes = [8, 128], strides = [1, 1]} : vector<48x128xf32> to vector<8x128xf32>
    %c101_i32 = arith.constant 101 : i32
    %219 = tpu.dynamic_rotate %218 by %c101_i32 dim 1 : vector<8x128xf32>, i32 -> vector<8x128xf32>
    %220 = arith.addf %217, %219 : vector<8x128xf32>
    %221 = vector.extract_strided_slice %207 {offsets = [32, 0], sizes = [8, 128], strides = [1, 1]} : vector<48x128xf32> to vector<8x128xf32>
    %c92_i32 = arith.constant 92 : i32
    %222 = tpu.dynamic_rotate %221 by %c92_i32 dim 1 : vector<8x128xf32>, i32 -> vector<8x128xf32>
    %223 = arith.addf %220, %222 : vector<8x128xf32>
    %224 = vector.extract_strided_slice %223 {offsets = [0, 0], sizes = [1, 128], strides = [1, 1]} : vector<8x128xf32> to vector<1x128xf32>
    %c127_i32 = arith.constant 127 : i32
    %225 = tpu.dynamic_rotate %223 by %c127_i32 dim 1 : vector<8x128xf32>, i32 -> vector<8x128xf32>
    %226 = vector.extract_strided_slice %225 {offsets = [1, 0], sizes = [1, 128], strides = [1, 1]} : vector<8x128xf32> to vector<1x128xf32>
    %227 = arith.addf %224, %226 : vector<1x128xf32>
    %c126_i32 = arith.constant 126 : i32
    %228 = tpu.dynamic_rotate %223 by %c126_i32 dim 1 : vector<8x128xf32>, i32 -> vector<8x128xf32>
    %229 = vector.extract_strided_slice %228 {offsets = [2, 0], sizes = [1, 128], strides = [1, 1]} : vector<8x128xf32> to vector<1x128xf32>
    %230 = arith.addf %227, %229 : vector<1x128xf32>
    %c125_i32 = arith.constant 125 : i32
    %231 = tpu.dynamic_rotate %223 by %c125_i32 dim 1 : vector<8x128xf32>, i32 -> vector<8x128xf32>
    %232 = vector.extract_strided_slice %231 {offsets = [3, 0], sizes = [1, 128], strides = [1, 1]} : vector<8x128xf32> to vector<1x128xf32>
    %233 = arith.addf %230, %232 : vector<1x128xf32>
    %c124_i32 = arith.constant 124 : i32
    %234 = tpu.dynamic_rotate %223 by %c124_i32 dim 1 : vector<8x128xf32>, i32 -> vector<8x128xf32>
    %235 = vector.extract_strided_slice %234 {offsets = [4, 0], sizes = [1, 128], strides = [1, 1]} : vector<8x128xf32> to vector<1x128xf32>
    %236 = arith.addf %233, %235 : vector<1x128xf32>
    %cst_53 = arith.constant 1.000000e-03 : f32
    %237 = vector.broadcast %cst_53 : f32 to vector<1x128xf32>
    %238 = arith.mulf %236, %237 : vector<1x128xf32>
    %239 = vector.extract_strided_slice %210 {offsets = [0, 0], sizes = [8, 128], strides = [1, 1]} : vector<48x128xf32> to vector<8x128xf32>
    %240 = vector.extract_strided_slice %210 {offsets = [8, 0], sizes = [8, 128], strides = [1, 1]} : vector<48x128xf32> to vector<8x128xf32>
    %c119_i32_54 = arith.constant 119 : i32
    %241 = tpu.dynamic_rotate %240 by %c119_i32_54 dim 1 : vector<8x128xf32>, i32 -> vector<8x128xf32>
    %242 = arith.addf %239, %241 : vector<8x128xf32>
    %243 = vector.extract_strided_slice %210 {offsets = [16, 0], sizes = [8, 128], strides = [1, 1]} : vector<48x128xf32> to vector<8x128xf32>
    %c110_i32_55 = arith.constant 110 : i32
    %244 = tpu.dynamic_rotate %243 by %c110_i32_55 dim 1 : vector<8x128xf32>, i32 -> vector<8x128xf32>
    %245 = arith.addf %242, %244 : vector<8x128xf32>
    %246 = vector.extract_strided_slice %210 {offsets = [24, 0], sizes = [8, 128], strides = [1, 1]} : vector<48x128xf32> to vector<8x128xf32>
    %c101_i32_56 = arith.constant 101 : i32
    %247 = tpu.dynamic_rotate %246 by %c101_i32_56 dim 1 : vector<8x128xf32>, i32 -> vector<8x128xf32>
    %248 = arith.addf %245, %247 : vector<8x128xf32>
    %249 = vector.extract_strided_slice %210 {offsets = [32, 0], sizes = [8, 128], strides = [1, 1]} : vector<48x128xf32> to vector<8x128xf32>
    %c92_i32_57 = arith.constant 92 : i32
    %250 = tpu.dynamic_rotate %249 by %c92_i32_57 dim 1 : vector<8x128xf32>, i32 -> vector<8x128xf32>
    %251 = arith.addf %248, %250 : vector<8x128xf32>
    %252 = vector.extract_strided_slice %251 {offsets = [0, 0], sizes = [1, 128], strides = [1, 1]} : vector<8x128xf32> to vector<1x128xf32>
    %c127_i32_58 = arith.constant 127 : i32
    %253 = tpu.dynamic_rotate %251 by %c127_i32_58 dim 1 : vector<8x128xf32>, i32 -> vector<8x128xf32>
    %254 = vector.extract_strided_slice %253 {offsets = [1, 0], sizes = [1, 128], strides = [1, 1]} : vector<8x128xf32> to vector<1x128xf32>
    %255 = arith.addf %252, %254 : vector<1x128xf32>
    %c126_i32_59 = arith.constant 126 : i32
    %256 = tpu.dynamic_rotate %251 by %c126_i32_59 dim 1 : vector<8x128xf32>, i32 -> vector<8x128xf32>
    %257 = vector.extract_strided_slice %256 {offsets = [2, 0], sizes = [1, 128], strides = [1, 1]} : vector<8x128xf32> to vector<1x128xf32>
    %258 = arith.addf %255, %257 : vector<1x128xf32>
    %c125_i32_60 = arith.constant 125 : i32
    %259 = tpu.dynamic_rotate %251 by %c125_i32_60 dim 1 : vector<8x128xf32>, i32 -> vector<8x128xf32>
    %260 = vector.extract_strided_slice %259 {offsets = [3, 0], sizes = [1, 128], strides = [1, 1]} : vector<8x128xf32> to vector<1x128xf32>
    %261 = arith.addf %258, %260 : vector<1x128xf32>
    %c124_i32_61 = arith.constant 124 : i32
    %262 = tpu.dynamic_rotate %251 by %c124_i32_61 dim 1 : vector<8x128xf32>, i32 -> vector<8x128xf32>
    %263 = vector.extract_strided_slice %262 {offsets = [4, 0], sizes = [1, 128], strides = [1, 1]} : vector<8x128xf32> to vector<1x128xf32>
    %264 = arith.addf %261, %263 : vector<1x128xf32>
    %cst_62 = arith.constant 1.000000e-03 : f32
    %265 = vector.broadcast %cst_62 : f32 to vector<1x128xf32>
    %266 = arith.mulf %264, %265 : vector<1x128xf32>
    %c6 = arith.constant 6 : index
    %267 = memref.load %arg7[%c6] : memref<10xf32, #tpu.memory_space<smem>>
    %268 = arith.addf %238, %266 : vector<1x128xf32>
    %269 = vector.broadcast %267 : f32 to vector<1x128xf32>
    %270 = arith.mulf %269, %268 : vector<1x128xf32>
    %c7 = arith.constant 7 : index
    %271 = memref.load %arg7[%c7] : memref<10xf32, #tpu.memory_space<smem>>
    %272 = arith.mulf %238, %266 : vector<1x128xf32>
    %273 = vector.broadcast %271 : f32 to vector<1x128xf32>
    %274 = arith.mulf %273, %272 : vector<1x128xf32>
    %275 = arith.addf %270, %274 : vector<1x128xf32>
    %c8 = arith.constant 8 : index
    %276 = memref.load %arg7[%c8] : memref<10xf32, #tpu.memory_space<smem>>
    %277 = vector.broadcast %276 : f32 to vector<1x128xf32>
    %278 = arith.addf %275, %277 : vector<1x128xf32>
    %279 = vector.shape_cast %278 : vector<1x128xf32> to vector<1x128xf32>
    %280 = vector.broadcast %279 : vector<1x128xf32> to vector<8x128xf32>
    %c0_63 = arith.constant 0 : index
    %c0_64 = arith.constant 0 : index
    %c0_65 = arith.constant 0 : index
    %281 = vector.load %arg8[%c0_63, %c0_64, %c0_65] : memref<1x8x128xf32, #tpu.memory_space<vmem>>, vector<1x8x128xf32>
    %282 = vector.shape_cast %281 : vector<1x8x128xf32> to vector<8x128xf32>
    %283 = vector.shape_cast %280 : vector<8x128xf32> to vector<1x8x128xf32>
    tpu.vector_store %arg8[%c0_63, %c0_64, %c0_65], %283 {strides = array<i32>} : memref<1x8x128xf32, #tpu.memory_space<vmem>>, vector<1x8x128xf32>,
    return
  }
  func.func @transform_0(%arg0: i32) -> (i32, i32, i32) {
    %c0_i32 = arith.constant 0 : i32
    %c0_i32_0 = arith.constant 0 : i32
    %c0_i32_1 = arith.constant 0 : i32
    return %arg0, %c0_i32, %c0_i32_0 : i32, i32, i32
  }
  func.func @transform_1(%arg0: i32) -> (i32, i32) {
    %c0_i32 = arith.constant 0 : i32
    %c0_i32_0 = arith.constant 0 : i32
    %c0_i32_1 = arith.constant 0 : i32
    return %c0_i32, %c0_i32_0 : i32, i32
  }
  func.func @transform_2(%arg0: i32) -> (i32, i32) {
    %c0_i32 = arith.constant 0 : i32
    %c0_i32_0 = arith.constant 0 : i32
    %c0_i32_1 = arith.constant 0 : i32
    return %c0_i32, %c0_i32_0 : i32, i32
  }
  func.func @transform_3(%arg0: i32) -> (i32, i32) {
    %c0_i32 = arith.constant 0 : i32
    %c0_i32_0 = arith.constant 0 : i32
    %c0_i32_1 = arith.constant 0 : i32
    return %c0_i32, %c0_i32_0 : i32, i32
  }
  func.func @transform_4(%arg0: i32) -> (i32, i32) {
    %c0_i32 = arith.constant 0 : i32
    %c0_i32_0 = arith.constant 0 : i32
    %c0_i32_1 = arith.constant 0 : i32
    return %c0_i32, %c0_i32_0 : i32, i32
  }
  func.func @transform_5(%arg0: i32) -> (i32, i32) {
    %c0_i32 = arith.constant 0 : i32
    %c0_i32_0 = arith.constant 0 : i32
    %c0_i32_1 = arith.constant 0 : i32
    return %c0_i32, %c0_i32_0 : i32, i32
  }
  func.func @transform_6(%arg0: i32) -> i32 {
    %c0_i32 = arith.constant 0 : i32
    %c0_i32_0 = arith.constant 0 : i32
    return %c0_i32 : i32
  }
  func.func @transform_7(%arg0: i32) -> (i32, i32, i32) {
    %c0_i32 = arith.constant 0 : i32
    %c0_i32_0 = arith.constant 0 : i32
    %c0_i32_1 = arith.constant 0 : i32
    return %arg0, %c0_i32, %c0_i32_0 : i32, i32, i32
  }
}

</mosaic_0001>

<bundles_post_ra>
// kernel: squeeze.1
= control target key start
LH: loop header
LB: loop body
LE: loop exit
PB: predicated region body
PF: predicated region fallthrough
CT: control target
= control target key end

     0   :  { %s74_s8 = smov 119   ;;  %vm7_vm0 = vcmask 72704   ;;  %s75_s11 = smov 92   ;;  %s130_s0 = inlined_call_operand.vmem [shape: f32[2,81], index: 0, kind: input, shape index: {}]   ;;  %s131_s1 = inlined_call_operand.vmem [shape: f32[2,9,9], index: 1, kind: output, shape index: {}]  }
   0x1   :  { %v4_v0 = vld [vmem:[%s130_s0] sm:$0x3]  ;;  %s73_s0 = smov 101   ;;  %s76_s12 = smov 110  }
   0x2   :  { %5 = vst [vmem:[#allocation0] sm:$0x3] %v4_v0  ;;  %s77_s13 = smov 74   ;;  %s78_s14 = smov 83  }
   0x3   :  { %s79_s15 = smov 56   ;;  %s80_s16 = smov 65  }
   0x9   :  { %v21_v1 = vld [vmem:[#allocation0] sm:$0x3]  }
   0xa   :  { %v9_v2 = vld [vmem:[#allocation0] sm:$0x3]   ;;  %22 = vrot.lane.b32.xlu1 %v21_v1, %s73_s0 }
   0xb   :  { %10 = vrot.lane.b32.xlu0 %v9_v2, %s74_s8  ;;  %v27_v3 = vld [vmem:[#allocation0] sm:$0x3]  }
   0xc   :  { %v15_v4 = vld [vmem:[#allocation0] sm:$0x3]  }
   0xd   :  { %v6_v5 = vld [vmem:[#allocation0] sm:$0x3]  }
   0xe   :  { %8 = vst.msk [vmem:[%s131_s1] ss:$16 sm:$0x3] %vm7_vm0, %v6_v5   ;;  %28 = vrot.lane.b32.xlu1 %v27_v3, %s75_s11  ;;  %v39_v6 = vld [vmem:[#allocation0] sm:$0x3]  }
   0xf   :  { %16 = vrot.lane.b32.xlu0 %v15_v4, %s76_s12  ;;  %v33_v7 = vld [vmem:[#allocation0] sm:$0x3]  }
  0x10   :  { %v51_v8 = vld [vmem:[#allocation0] sm:$0x3]  }
  0x11   :  { %v45_v9 = vld [vmem:[#allocation0] sm:$0x3]  }
  0x12   :  { %40 = vrot.lane.b32.xlu1 %v39_v6, %s77_s13 }
  0x13   :  { %34 = vrot.lane.b32.xlu0 %v33_v7, %s78_s14 }
  0x16   :  { %52 = vrot.lane.b32.xlu1 %v51_v8, %s79_s15 }
  0x17   :  { %46 = vrot.lane.b32.xlu0 %v45_v9, %s80_s16 }
  0x7c   :  { %v23_v10 = vpop.permute.xlu1 %22  }
  0x7d   :  { %v11_v11 = vpop.permute.xlu0 %10   ;;  %59 = vst.msk [vmem:[%s131_s1 + $0x3] ss:$16 sm:$0x3] %vm7_vm0, %v23_v10  }
  0x7e   :  { %57 = vst.msk [vmem:[%s131_s1 + $0x1] ss:$16 sm:$0x3] %vm7_vm0, %v11_v11  }
  0x80   :  { %v29_v12 = vpop.permute.xlu1 %28  }
  0x81   :  { %v17_v13 = vpop.permute.xlu0 %16   ;;  %60 = vst.msk [vmem:[%s131_s1 + $0x4] ss:$16 sm:$0x3] %vm7_vm0, %v29_v12  }
  0x82   :  { %58 = vst.msk [vmem:[%s131_s1 + $0x2] ss:$16 sm:$0x3] %vm7_vm0, %v17_v13  }
  0x84   :  { %v41_v14 = vpop.permute.xlu1 %40  }
  0x85   :  { %v35_v15 = vpop.permute.xlu0 %34   ;;  %62 = vst.msk [vmem:[%s131_s1 + $0x6] ss:$16 sm:$0x3] %vm7_vm0, %v41_v14  }
  0x86   :  { %61 = vst.msk [vmem:[%s131_s1 + $0x5] ss:$16 sm:$0x3] %vm7_vm0, %v35_v15  }
  0x88   :  { %v53_v16 = vpop.permute.xlu1 %52  }
  0x89   :  { %v47_v17 = vpop.permute.xlu0 %46   ;;  %64 = vst.msk [vmem:[%s131_s1 + $0x8] ss:$16 sm:$0x3] %vm7_vm0, %v53_v16  }
  0x8a   :  { %63 = vst.msk [vmem:[%s131_s1 + $0x7] ss:$16 sm:$0x3] %vm7_vm0, %v47_v17  }

// kernel: net_forward.1
= control target key start
LH: loop header
LB: loop body
LE: loop exit
PB: predicated region body
PF: predicated region fallthrough
CT: control target
= control target key end

     0   :  { %12 = vsyncpa [#allocation3], 0  ;;  %s4293_s24 = smov 0   ;;  %s5832_s0 = inlined_call_operand.vmem [shape: bf16[2,176,128], index: 0, kind: input, shape index: {}]   ;;  %s5833_s1 = inlined_call_operand.vmem [shape: bf16[128,512], index: 1, kind: input, shape index: {}]   ;;  %s5834_s2 = inlined_call_operand.vmem [shape: f32[1,512], index: 2, kind: input, shape index: {}]   ;;  %s5835_s3 = inlined_call_operand.vmem [shape: bf16[256,128], index: 3, kind: input, shape index: {}]   ;;  %s5836_s4 = inlined_call_operand.vmem [shape: bf16[128,256], index: 4, kind: input, shape index: {}]   ;;  %s5837_s5 = inlined_call_operand.vmem [shape: bf16[128,256], index: 5, kind: input, shape index: {}]   ;;  %s5838_s6 = inlined_call_operand.vmem [shape: f32[10], index: 6, kind: input, shape index: {}]   ;;  %s5839_s7 = inlined_call_operand.vmem [shape: f32[2,8,128], index: 7, kind: output, shape index: {}]  }
   0x1 LB: > { %s4299_s25 = sadd.s32 4294967295, %s4240_s24   ;;  %p3581_p0 = scmp.ge.s32.totalorder %s4240_s24, 1  ;;  %s4240_s24 = sphi %s4293_s24, %s18_s24  }
   0x2   : > { %p201_p1 = scmp.lt.s32.totalorder %s4240_s24, 3  ;;  %s229_s28 = sshll.u32 %s5838_s6, 4  ;;  %s230_s28 = int_to_ptr.vmem [resolvable:$true] %s229_s28 }
   0x3   : > { %p3893_p3 = scmp.eq.s32.totalorder %s4299_s25, 0  ;;  %s4215_s30 = scalar_lea.vmem %s230_s28, 16 }
   0x4   : > { %p4306_p2 = pnand %p3581_p0, %p201_p1  ;;  %p4216_p6 = scmp.ne.s32.totalorder %s230_s28, %s4215_s30 }
   0x5   : > { %p4223_p10 = scmp.lt.s32.totalorder %s230_s28, %s230_s28  ;;  %p4224_p11 = scmp.lt.s32.totalorder %s4215_s30, %s4215_s30 }
   0x6   : > { %p3889_p4 = pneg %p4306_p2 }
   0x7   : > { %p4225_p12 = por %p4224_p11, %p4223_p10 }
   0x8   : > { %p3890_p5 = pnand %p3893_p3, %p3889_p4 }
   0xa   : > { %p4217_p7 = pneg %p3890_p5 }
   0xc   : > { %p4218_p8 = pnand %p4217_p7, %p4216_p6 }
   0xe   : > { %p4219_p9 = pneg %p4218_p8 }
  0x10   : > { %p4226_p13 = pnand %p4225_p12, %p4219_p9 }
  0x12   : > { %4229 = shalt.err (!%p4226_p13)
}
  0x13   : > { %s4242_s8 = smov [#allocation2]   ;;  %250 = sbr.rel (%p4306_p2) target bundleno = 2056 (0x808), region = 48 }
  0x14   : > { %3892 = dma.vmem_to_smem (!%p3890_p5), %s230_s28, 16, %s4242_s8, [#allocation3]  }
  0x1a   : > { %4235 = dma.done.wait (%p3893_p3), [#allocation3], 16  }
  0x1b   : > { %4237 = vsyncadd (%p3893_p3), [#allocation3], 4294967280 }
  0x1c   : > { %256 = sfence }
  0x1d   : > { %v3916_v0 = vld [vmem:[%s5833_s1 + $0x4] ss:$16 sps:$4 sm:$0xff]   ;;  %v3918_v1 = vld [vmem:[%s5833_s1 + $0xc] ss:$16 sps:$4 sm:$0xff]   ;;  %v4243_v2 = vmov 0   ;;  %p282_p0 = scmp.lt.s32.totalorder %s4299_s25, 1  ;;  %v5840_v63 = vlaneseq }
  0x1e   : > { %626 = vmatprep.mubr.bf16.mxu0 %v4243_v2  ;;  %769 = vmatprep.mubr.bf16.mxu1 %v4243_v2  ;;  %v3920_v3 = vld [vmem:[%s5833_s1] ss:$16 sps:$4 sm:$0xff]   ;;  %v3921_v4 = vld [vmem:[%s5833_s1 + $0x8] ss:$16 sps:$4 sm:$0xff]   ;;  %v3922_v5 = vld [vmem:[%s5833_s1 + $0x24] ss:$16 sps:$4 sm:$0xff]  }
  0x1f   : > { %594 = vmatprep.subr.bf16.mxu0 %v3916_v0  ;;  %3914 = vset.pattern.permute.xlu0 %v4243_v2  ;;  %v3924_v6 = vld [vmem:[%s5833_s1 + $0x2c] ss:$16 sps:$4 sm:$0xff]   ;;  %v3926_v7 = vld [vmem:[%s5833_s1 + $0x20] ss:$16 sps:$4 sm:$0xff]   ;;  %v3927_v8 = vld [vmem:[%s5833_s1 + $0x28] ss:$16 sps:$4 sm:$0xff]  }
  0x20   : > { %737 = vmatprep.subr.bf16.mxu1 %v3918_v1  ;;  %3915 = vset.pattern.permute.xlu1 %v4243_v2  ;;  %v3928_v9 = vld [vmem:[%s5833_s1 + $0x44] ss:$16 sps:$4 sm:$0xff]   ;;  %v3930_v10 = vld [vmem:[%s5833_s1 + $0x4c] ss:$16 sps:$4 sm:$0xff]   ;;  %v3932_v11 = vld [vmem:[%s5833_s1 + $0x40] ss:$16 sps:$4 sm:$0xff]  }
  0x21   : > { %595 = vmatpush1.bf16.msra.mxu0 %v3920_v3  ;;  %738 = vmatpush1.bf16.msra.mxu1 %v3921_v4  ;;  %v3933_v12 = vld [vmem:[%s5833_s1 + $0x48] ss:$16 sps:$4 sm:$0xff]   ;;  %v3934_v13 = vld [vmem:[%s5833_s1 + $0x64] ss:$16 sps:$4 sm:$0xff]   ;;  %v3936_v14 = vld [vmem:[%s5833_s1 + $0x6c] ss:$16 sps:$4 sm:$0xff]  }
  0x22   : > { %596 = vmatprep.subr.bf16.mxu0 %v3922_v5  ;;  %739 = vmatprep.subr.bf16.mxu1 %v3924_v6  ;;  %v3938_v15 = vld [vmem:[%s5833_s1 + $0x60] ss:$16 sps:$4 sm:$0xff]   ;;  %v3939_v16 = vld [vmem:[%s5833_s1 + $0x68] ss:$16 sps:$4 sm:$0xff]   ;;  %v3940_v17 = vld [vmem:[%s5833_s1 + $0x84] ss:$16 sps:$4 sm:$0xff]  }
  0x23   : > { %s6212_s25 = smov (!%p282_p0, %s4299_s25), 1  ;;  %v3942_v18 = vld [vmem:[%s5833_s1 + $0x8c] ss:$16 sps:$4 sm:$0xff]   ;;  %v3944_v19 = vld [vmem:[%s5833_s1 + $0x80] ss:$16 sps:$4 sm:$0xff]   ;;  %vm1487_vm6 = vcmask 1040384  }
  0x24   : > { %v3945_v20 = vld [vmem:[%s5833_s1 + $0x88] ss:$16 sps:$4 sm:$0xff]   ;;  %v3946_v21 = vld [vmem:[%s5833_s1 + $0xa4] ss:$16 sps:$4 sm:$0xff]   ;;  %s3884_s9 = smul.u32 88, %s6212_s25  ;;  %vm1492_vm7 = vcmask 1041408  }
  0x25   : > { %597 = vmatpush1.bf16.msra.mxu0 %v3926_v7  ;;  %740 = vmatpush1.bf16.msra.mxu1 %v3927_v8  ;;  %v3948_v22 = vld [vmem:[%s5833_s1 + $0xac] ss:$16 sps:$4 sm:$0xff]   ;;  %v3950_v23 = vld [vmem:[%s5833_s1 + $0xa0] ss:$16 sps:$4 sm:$0xff]   ;;  %v3951_v24 = vld [vmem:[%s5833_s1 + $0xa8] ss:$16 sps:$4 sm:$0xff]  }
  0x26   : > { %598 = vmatprep.subr.bf16.mxu0 %v3928_v9  ;;  %741 = vmatprep.subr.bf16.mxu1 %v3930_v10  ;;  %v3952_v25 = vld [vmem:[%s5833_s1 + $0xc4] ss:$16 sps:$4 sm:$0xff]   ;;  %s4408_s20 = scalar_lea.vmem %s5832_s0, %s3884_s9  ;;  %v3954_v26 = vld [vmem:[%s5833_s1 + $0xcc] ss:$16 sps:$4 sm:$0xff]   ;;  %v3956_v27 = vld [vmem:[%s5833_s1 + $0xc0] ss:$16 sps:$4 sm:$0xff]  }
  0x27   : > { %v3957_v28 = vld [vmem:[%s5833_s1 + $0xc8] ss:$16 sps:$4 sm:$0xff]   ;;  %v3958_v29 = vld [vmem:[%s5833_s1 + $0xe4] ss:$16 sps:$4 sm:$0xff]   ;;  %v3960_v30 = vld [vmem:[%s5833_s1 + $0xec] ss:$16 sps:$4 sm:$0xff]  }
  0x28   : > { %v3962_v31 = vld [vmem:[%s5833_s1 + $0xe0] ss:$16 sps:$4 sm:$0xff]   ;;  %v3963_v32 = vld [vmem:[%s5833_s1 + $0xe8] ss:$16 sps:$4 sm:$0xff]   ;;  %v3993_v61 = vld [vmem:[%s5836_s4 + $0x4] ss:$8 sps:$4 sm:$0xff]  }
  0x29   : > { %599 = vmatpush1.bf16.msra.mxu0 %v3932_v11  ;;  %742 = vmatpush1.bf16.msra.mxu1 %v3933_v12  ;;  %v3964_v33 = vld [vmem:[%s4408_s20] sm:$0xff]   ;;  %v3965_v34 = vld [vmem:[%s4408_s20 + $0x8] sm:$0xff]   ;;  %v3966_v35 = vld [vmem:[%s4408_s20 + $0x10] sm:$0xff]   ;;  %vm1724_vm8 = vcmask 1042432   ;;  %s4244_s21 = smov 1   ;;  %s4245_s22 = smov 127  }
  0x2a   : > { %600 = vmatprep.subr.bf16.mxu0 %v3934_v13  ;;  %743 = vmatprep.subr.bf16.mxu1 %v3936_v14  ;;  %v3967_v36 = vld [vmem:[%s4408_s20 + $0x18] sm:$0xff]   ;;  %v3968_v37 = vld [vmem:[%s4408_s20 + $0x20] sm:$0xff]   ;;  %v3969_v38 = vld [vmem:[%s4408_s20 + $0x28] sm:$0xff]   ;;  %s3631_s9 = sld [smem:[#allocation2 + $0x1]]  ;;  %s3634_s10 = sld [smem:[#allocation2 + $0x4]] }
  0x2b   : > { %v3970_v39 = vld [vmem:[%s4408_s20 + $0x30] sm:$0xff]   ;;  %v3971_v40 = vld [vmem:[%s4408_s20 + $0x38] sm:$0xff]   ;;  %v3972_v41 = vld [vmem:[%s4408_s20 + $0x40] sm:$0xff]   ;;  %s1560_s13 = sld [smem:[#allocation2]]  ;;  %s3633_s14 = sld [smem:[#allocation2 + $0x3]] }
  0x2c   : > { %v3973_v42 = vld [vmem:[%s5835_s3 + $0x40] sm:$0xff]   ;;  %v3975_v44 = vld [vmem:[%s5835_s3 + $0x48] sm:$0xff]   ;;  %v3977_v46 = vld [vmem:[%s5835_s3 + $0x50] sm:$0xff]   ;;  %s3632_s15 = sld [smem:[#allocation2 + $0x2]]  ;;  %s3635_s16 = sld [smem:[#allocation2 + $0x5]] }
  0x2d   : > { %601 = vmatpush1.bf16.msra.mxu0 %v3938_v15  ;;  %744 = vmatpush1.bf16.msra.mxu1 %v3939_v16  ;;  %v3974_v43 = vld [vmem:[%s5835_s3] sm:$0xff]   ;;  %v3976_v45 = vld [vmem:[%s5835_s3 + $0x8] sm:$0xff]   ;;  %v3978_v47 = vld [vmem:[%s5835_s3 + $0x10] sm:$0xff]   ;;  %s3680_s17 = sld [smem:[#allocation2 + $0x9]]  ;;  %s4246_s18 = smov 119  }
  0x2e   : > { %602 = vmatprep.subr.bf16.mxu0 %v3940_v17  ;;  %745 = vmatprep.subr.bf16.mxu1 %v3942_v18  ;;  %v3979_v48 = vld [vmem:[%s5835_s3 + $0x58] sm:$0xff]   ;;  %v3981_v50 = vld [vmem:[%s5835_s3 + $0x60] sm:$0xff]   ;;  %v3987_v52 = vld [vmem:[%s4408_s20 + $0x48] sm:$0xff]   ;;  %s4247_s19 = smov 110   ;;  %s4249_s23 = smov 92  }
  0x2f   : > { %v3980_v49 = vld [vmem:[%s5835_s3 + $0x18] sm:$0xff]   ;;  %v3982_v51 = vld [vmem:[%s5835_s3 + $0x20] sm:$0xff]   ;;  %v3983_v53 = vld [vmem:[%s5835_s3 + $0x68] sm:$0xff]   ;;  %s4250_s26 = smov 126   ;;  %s4251_s27 = smov 125  }
  0x30   : > { %v3984_v54 = vld [vmem:[%s5835_s3 + $0x28] sm:$0xff]   ;;  %v3985_v55 = vld [vmem:[%s5835_s3 + $0x70] sm:$0xff]   ;;  %v3989_v58 = vld [vmem:[%s5835_s3 + $0x78] sm:$0xff]   ;;  %s4252_s28 = smov 124   ;;  %s3731_s29 = sld [smem:[#allocation2 + $0x8]] }
  0x31   : > { %603 = vmatpush1.bf16.msra.mxu0 %v3944_v19  ;;  %746 = vmatpush1.bf16.msra.mxu1 %v3945_v20  ;;  %v3988_v56 = vld [vmem:[%s4408_s20 + $0x50] sm:$0xff]   ;;  %v3990_v59 = vld [vmem:[%s5835_s3 + $0x38] sm:$0xff]   ;;  %v3991_v60 = vld [vmem:[%s5836_s4] ss:$8 sps:$4 sm:$0xff]   ;;  %s3730_s20 = sld [smem:[#allocation2 + $0x7]]  ;;  %s3587_s30 = sshll.u32 %s6212_s25, 3 }
  0x32   : > { %604 = vmatprep.subr.bf16.mxu0 %v3946_v21  ;;  %747 = vmatprep.subr.bf16.mxu1 %v3948_v22  ;;  %v3986_v57 = vld [vmem:[%s5835_s3 + $0x30] sm:$0xff]   ;;  %v3999_v1 = vld [vmem:[%s5836_s4 + $0x24] ss:$8 sps:$4 sm:$0xff]   ;;  %v3997_v3 = vld [vmem:[%s5836_s4 + $0x20] ss:$8 sps:$4 sm:$0xff]  }
  0x33   : > { %v3996_v62 = vld [vmem:[%s5836_s4 + $0x14] ss:$8 sps:$4 sm:$0xff]   ;;  %v3994_v0 = vld [vmem:[%s5836_s4 + $0x10] ss:$8 sps:$4 sm:$0xff]   ;;  %v346_v8 = vld [vmem:[%s5834_s2] sm:$0xf] }
  0x34   : > { %v4002_v4 = vld [vmem:[%s5836_s4 + $0x34] ss:$8 sps:$4 sm:$0xff]   ;;  %v4000_v11 = vld [vmem:[%s5836_s4 + $0x30] ss:$8 sps:$4 sm:$0xff]   ;;  %v4005_v12 = vld [vmem:[%s5836_s4 + $0x44] ss:$8 sps:$4 sm:$0xff]  }
  0x35   : > { %605 = vmatpush1.bf16.msra.mxu0 %v3950_v23  ;;  %748 = vmatpush1.bf16.msra.mxu1 %v3951_v24  ;;  %v4003_v21 = vld [vmem:[%s5836_s4 + $0x40] ss:$8 sps:$4 sm:$0xff]   ;;  %v4008_v22 = vld [vmem:[%s5836_s4 + $0x54] ss:$8 sps:$4 sm:$0xff]  }
  0x36   : > { %606 = vmatprep.subr.bf16.mxu0 %v3952_v25  ;;  %749 = vmatprep.subr.bf16.mxu1 %v3954_v26 }
  0x39   : > { %607 = vmatpush1.bf16.msra.mxu0 %v3956_v27  ;;  %750 = vmatpush1.bf16.msra.mxu1 %v3957_v28 }
  0x3a   : > { %608 = vmatprep.subr.bf16.mxu0 %v3958_v29  ;;  %751 = vmatprep.subr.bf16.mxu1 %v3960_v30 }
  0x3d   : > { %609 = vmatpush1.bf16.msra.mxu0 %v3962_v31  ;;  %752 = vmatpush1.bf16.msra.mxu1 %v3963_v32 }
  0x3e   : > { %3734 = vmatprep.subr.bf16.mxu0 %v3973_v42  ;;  %1995 = vmatprep.subr.bf16.mxu1 %v3993_v61 }
  0x40   : > { %627 = vmatmul.mubr.bf16.vlgmr.msra.gmra.mrb[0].mxu0 %v3964_v33  ;;  %770 = vmatmul.mubr.bf16.vlgmr.msra.gmra.mrb[0].mxu1 %v3964_v33 }
  0x41   : > { %636 = vmatprep.mubr.bf16.mxu0 %v4243_v2  ;;  %779 = vmatprep.mubr.bf16.mxu1 %v4243_v2 }
  0x42   : > { %3735 = vmatpush3.bf16.msra.mxu0 %v3974_v43  ;;  %1996 = vmatpush1.bf16.msra.mxu1 %v3991_v60 }
  0x43   : > { %3736 = vmatprep.subr.bf16.mxu0 %v3975_v44  ;;  %1997 = vmatprep.subr.bf16.mxu1 %v3996_v62 }
  0x46   : > { %3737 = vmatpush3.bf16.msra.mxu0 %v3976_v45  ;;  %1998 = vmatpush1.bf16.msra.mxu1 %v3994_v0 }
  0x47   : > { %3738 = vmatprep.subr.bf16.mxu0 %v3977_v46  ;;  %1999 = vmatprep.subr.bf16.mxu1 %v3999_v1 }
  0x48   : > { %637 = vmatmul.mubr.bf16.gmra.mrb[4].mxu0 %v3965_v34  ;;  %780 = vmatmul.mubr.bf16.gmra.mrb[4].mxu1 %v3965_v34 }
  0x49   : > { %646 = vmatprep.mubr.bf16.mxu0 %v4243_v2  ;;  %789 = vmatprep.mubr.bf16.mxu1 %v4243_v2 }
  0x4a   : > { %3739 = vmatpush3.bf16.msra.mxu0 %v3978_v47  ;;  %2000 = vmatpush1.bf16.msra.mxu1 %v3997_v3 }
  0x4b   : > { %3740 = vmatprep.subr.bf16.mxu0 %v3979_v48  ;;  %2001 = vmatprep.subr.bf16.mxu1 %v4002_v4 }
  0x4e   : > { %3741 = vmatpush3.bf16.msra.mxu0 %v3980_v49  ;;  %2002 = vmatpush1.bf16.msra.mxu1 %v4000_v11 }
  0x4f   : > { %3742 = vmatprep.subr.bf16.mxu0 %v3981_v50  ;;  %2003 = vmatprep.subr.bf16.mxu1 %v4005_v12 }
  0x50   : > { %647 = vmatmul.mubr.bf16.gmra.mrb[8].mxu0 %v3966_v35  ;;  %790 = vmatmul.mubr.bf16.gmra.mrb[8].mxu1 %v3966_v35 }
  0x51   : > { %656 = vmatprep.mubr.bf16.mxu0 %v4243_v2  ;;  %799 = vmatprep.mubr.bf16.mxu1 %v4243_v2 }
  0x52   : > { %3743 = vmatpush3.bf16.msra.mxu0 %v3982_v51  ;;  %2004 = vmatpush1.bf16.msra.mxu1 %v4003_v21 }
  0x53   : > { %3744 = vmatprep.subr.bf16.mxu0 %v3983_v53  ;;  %2005 = vmatprep.subr.bf16.mxu1 %v4008_v22 }
  0x56   : > { %3745 = vmatpush3.bf16.msra.mxu0 %v3984_v54 }
  0x57   : > { %3746 = vmatprep.subr.bf16.mxu0 %v3985_v55 }
  0x58   : > { %657 = vmatmul.mubr.bf16.gmra.mrb[12].mxu0 %v3967_v36  ;;  %800 = vmatmul.mubr.bf16.gmra.mrb[12].mxu1 %v3967_v36 }
  0x59   : > { %666 = vmatprep.mubr.bf16.mxu0 %v4243_v2  ;;  %809 = vmatprep.mubr.bf16.mxu1 %v4243_v2 }
  0x5a   : > { %3747 = vmatpush3.bf16.msra.mxu0 %v3986_v57 }
  0x5b   : > { %3748 = vmatprep.subr.bf16.mxu0 %v3989_v58 }
  0x5e   : > { %3749 = vmatpush3.bf16.msra.mxu0 %v3990_v59 }
  0x60   : > { %667 = vmatmul.mubr.bf16.gmra.mrb[16].mxu0 %v3968_v37  ;;  %810 = vmatmul.mubr.bf16.gmra.mrb[16].mxu1 %v3968_v37  ;;  %v4006_v37 = vld [vmem:[%s5836_s4 + $0x50] ss:$8 sps:$4 sm:$0xff]  }
  0x61   : > { %676 = vmatprep.mubr.bf16.mxu0 %v4243_v2  ;;  %819 = vmatprep.mubr.bf16.mxu1 %v4243_v2 }
  0x62   : > { %2006 = vmatpush1.bf16.msra.mxu1 %v4006_v37 }
  0x68   : > { %677 = vmatmul.mubr.bf16.gmra.mrb[20].mxu0 %v3969_v38  ;;  %820 = vmatmul.mubr.bf16.gmra.mrb[20].mxu1 %v3969_v38 }
  0x69   : > { %686 = vmatprep.mubr.bf16.mxu0 %v4243_v2  ;;  %829 = vmatprep.mubr.bf16.mxu1 %v4243_v2 }
  0x70   : > { %687 = vmatmul.mubr.bf16.gmra.mrb[24].mxu0 %v3970_v39  ;;  %830 = vmatmul.mubr.bf16.gmra.mrb[24].mxu1 %v3970_v39 }
  0x71   : > { %696 = vmatprep.mubr.bf16.mxu0 %v4243_v2  ;;  %839 = vmatprep.mubr.bf16.mxu1 %v4243_v2 }
  0x78   : > { %697 = vmatmul.mubr.bf16.gmra.mrb[28].mxu0 %v3971_v40  ;;  %840 = vmatmul.mubr.bf16.gmra.mrb[28].mxu1 %v3971_v40 }
  0x79   : > { %706 = vmatprep.mubr.bf16.mxu0 %v4243_v2  ;;  %849 = vmatprep.mubr.bf16.mxu1 %v4243_v2 }
  0x80   : > { %707 = vmatmul.mubr.bf16.gmra.mrb[32].mxu0 %v3972_v41  ;;  %850 = vmatmul.mubr.bf16.gmra.mrb[32].mxu1 %v3972_v41 }
  0x81   : > { %716 = vmatprep.mubr.bf16.mxu0 %v4243_v2  ;;  %859 = vmatprep.mubr.bf16.mxu1 %v4243_v2 }
  0x88   : > { %717 = vmatmul.mubr.bf16.gmra.mrb[36].mxu0 %v3987_v52  ;;  %860 = vmatmul.mubr.bf16.gmra.mrb[36].mxu1 %v3987_v52 }
  0x89   : > { %726 = vmatprep.mubr.bf16.mxu0 %v4243_v2  ;;  %869 = vmatprep.mubr.bf16.mxu1 %v4243_v2 }
  0x90   : > { %727 = vmatmul.mubr.bf16.gmra.mrb[40].mxu0 %v3988_v56  ;;  %870 = vmatmul.mubr.bf16.gmra.mrb[40].mxu1 %v3988_v56 }
  0x91   : > { %2027 = vmatprep.mubr.bf16.mxu1 %v4243_v2  ;;  %v4527_v2 = vshrl.u32 %v5840_v63, 7 }
  0x93   : > { %v4536_v5 = vsub.s32 0, %v4527_v2  ;;  %v4539_v6 = vsub.s32 2, %v4527_v2  ;;  %v970_v7 = vadd.s32 8, %v4527_v2  ;;  %v354_v9 = vsub.s32 1, %v4527_v2 }
  0x94   : > { %v362_v10 = vsub.s32 3, %v4527_v2  ;;  %v989_v14 = vand.u32 7, %v4527_v2  ;;  %v971_v19 = vadd.s32 16, %v4527_v2  ;;  %v972_v20 = vadd.s32 24, %v4527_v2 }
  0x95   : > { %5970 = vst [vmem:[#allocation5_spill] sm:$0xff] %v4539_v6  ;;  %v4554_v13 = vrot.slane %v346_v8, %v4536_v5  ;;  %v4558_v15 = vrot.slane %v346_v8, %v4539_v6  ;;  %v996_v16 = vand.u32 7, %v970_v7  ;;  %v4560_v17 = vrot.slane %v346_v8, %v354_v9 }
  0x96   : > { %v4562_v18 = vrot.slane %v346_v8, %v362_v10  ;;  %vm4573_vm0 = vcmp.lt.s32.totalorder %v989_v14, 5  ;;  %v1003_v35 = vand.u32 7, %v971_v19  ;;  %v1010_v36 = vand.u32 7, %v972_v20 }
  0x97   : > { %vm4578_vm1 = vcmp.lt.s32.totalorder %v996_v16, 5  ;;  %v973_v43 = vadd.s32 32, %v4527_v2 }
  0x98   : > { %vm4604_vm2 = vcmp.lt.s32.totalorder %v1003_v35, 5  ;;  %vm4616_vm3 = vcmp.lt.s32.totalorder %v1010_v36, 5 }
  0x99   : > { %v1017_v62 = vand.u32 7, %v973_v43 }
  0x9b   : > { %vm4646_vm4 = vcmp.lt.s32.totalorder %v1017_v62, 5 }
 0x113   : > { %v628_v23 = vpop.f32.mrb[0].mxu0  ;;  %v771_v24 = vpop.f32.mrb[0].mxu1 }
 0x114   : > { %v629_v25 = vadd.f32 %v628_v23, %v4554_v13  ;;  %v772_v27 = vadd.f32 %v771_v24, %v4558_v15  ;;  %v630_v28 = vpop.f32.mrb[1].mxu0  ;;  %v773_v29 = vpop.f32.mrb[1].mxu1 }
 0x115   : > { %v631_v31 = vadd.f32 %v630_v28, %v4560_v17  ;;  %v774_v32 = vadd.f32 %v773_v29, %v4562_v18  ;;  %v632_v33 = vpop.f32.mrb[2].mxu0  ;;  %v775_v34 = vpop.f32.mrb[2].mxu1 }
 0x116   : > { %v882_v38 = vmax.f32 %v772_v27, 0.0  ;;  %v633_v39 = vadd.f32 %v632_v33, %v4554_v13  ;;  %v776_v40 = vadd.f32 %v775_v34, %v4558_v15  ;;  %v634_v41 = vpop.f32.mrb[3].mxu0  ;;  %v777_v42 = vpop.f32.mrb[3].mxu1  ;;  %v880_v44 = vmax.f32 %v629_v25, 0.0 }
 0x117   : > { %v881_v45 = vmax.f32 %v631_v31, 0.0  ;;  %v635_v46 = vadd.f32 %v634_v41, %v4560_v17  ;;  %v778_v47 = vadd.f32 %v777_v42, %v4562_v18  ;;  %v883_v48 = vmax.f32 %v774_v32, 0.0 }
 0x118   : > { %v884_v49 = vmax.f32 %v633_v39, 0.0  ;;  %v886_v50 = vmax.f32 %v776_v40, 0.0  ;;  %v4594_v53 = vsel %vm4573_vm0, %v882_v38, 0.0  ;;  %v4610_v57 = vsel %vm4573_vm0, %v880_v44, 0.0 }
 0x119   : > { %v885_v51 = vmax.f32 %v635_v46, 0.0  ;;  %v887_v52 = vmax.f32 %v778_v47, 0.0  ;;  %5975 = vst [vmem:[#allocation6_spill] sm:$0xff] %v4594_v53  ;;  %5980 = vst [vmem:[#allocation9_spill] sm:$0xff] %v4610_v57  ;;  %v4614_v58 = vsel %vm4573_vm0, %v881_v45, 0.0  ;;  %v4622_v0 = vsel %vm4573_vm0, %v883_v48, 0.0 }
 0x11a   : > { %v4598_v54 = vsel %vm4578_vm1, %v884_v49, 0.0  ;;  %v4602_v55 = vsel %vm4578_vm1, %v886_v50, 0.0  ;;  %5981 = vst [vmem:[#allocation10_spill] sm:$0xff] %v4614_v58  ;;  %5984 = vst [vmem:[#allocation11_spill] sm:$0xff] %v4622_v0 }
 0x11b   : > { %5976 = vst [vmem:[#allocation7_spill] sm:$0xff] %v4598_v54  ;;  %5977 = vst [vmem:[#allocation8_spill] sm:$0xff] %v4602_v55  ;;  %v638_v59 = vpop.f32.mrb[4].mxu0  ;;  %v781_v60 = vpop.f32.mrb[4].mxu1  ;;  %v1223_v1 = vadd.f32 %v4598_v54, %v4610_v57  ;;  %v1271_v9 = vmax.f32 %v4610_v57, %v4598_v54  ;;  %v1245_v10 = vadd.f32 %v4602_v55, %v4594_v53  ;;  %v4634_v11 = vsel %vm4578_vm1, %v885_v51, 0.0 }
 0x11c   : > { %v639_v3 = vadd.f32 %v638_v59, %v4554_v13  ;;  %v782_v4 = vadd.f32 %v781_v60, %v4558_v15  ;;  %v640_v7 = vpop.f32.mrb[5].mxu0  ;;  %v783_v8 = vpop.f32.mrb[5].mxu1  ;;  %5985 = vst [vmem:[#allocation12_spill] sm:$0xff] %v4634_v11  ;;  %v4638_v12 = vsel %vm4578_vm1, %v887_v52, 0.0  ;;  %v1293_v34 = vmax.f32 %v4594_v53, %v4602_v55 }
 0x11d   : > { %5986 = vst [vmem:[#allocation13_spill] sm:$0xff] %v4638_v12  ;;  %v642_v14 = vpop.f32.mrb[6].mxu0  ;;  %v785_v16 = vpop.f32.mrb[6].mxu1  ;;  %v641_v21 = vadd.f32 %v640_v7, %v4560_v17  ;;  %v784_v22 = vadd.f32 %v783_v8, %v4562_v18  ;;  %v1234_v35 = vadd.f32 %v4634_v11, %v4614_v58  ;;  %v1282_v36 = vmax.f32 %v4614_v58, %v4634_v11 }
 0x11e   : > { %v888_v19 = vmax.f32 %v639_v3, 0.0  ;;  %v890_v20 = vmax.f32 %v782_v4, 0.0  ;;  %v644_v23 = vpop.f32.mrb[7].mxu0  ;;  %v787_v24 = vpop.f32.mrb[7].mxu1  ;;  %v643_v25 = vadd.f32 %v642_v14, %v4554_v13  ;;  %v786_v26 = vadd.f32 %v785_v16, %v4558_v15 }
 0x11f   : > { %v645_v27 = vadd.f32 %v644_v23, %v4560_v17  ;;  %v788_v28 = vadd.f32 %v787_v24, %v4562_v18  ;;  %v889_v32 = vmax.f32 %v641_v21, 0.0  ;;  %v891_v33 = vmax.f32 %v784_v22, 0.0 }
 0x120   : > { %v4652_v30 = vsel %vm4604_vm2, %v888_v19, 0.0  ;;  %v4656_v31 = vsel %vm4604_vm2, %v890_v20, 0.0  ;;  %v1256_v37 = vadd.f32 %v4638_v12, %v4622_v0  ;;  %v892_v40 = vmax.f32 %v643_v25, 0.0 }
 0x121   : > { %5989 = vst [vmem:[#allocation14_spill] sm:$0xff] %v4652_v30  ;;  %5990 = vst [vmem:[#allocation15_spill] sm:$0xff] %v4656_v31  ;;  %v4668_v38 = vsel %vm4604_vm2, %v889_v32, 0.0  ;;  %v4672_v39 = vsel %vm4604_vm2, %v891_v33, 0.0  ;;  %v894_v41 = vmax.f32 %v786_v26, 0.0  ;;  %v1304_v42 = vmax.f32 %v4622_v0, %v4638_v12 }
 0x122   : > { %5991 = vst [vmem:[#allocation16_spill] sm:$0xff] %v4668_v38  ;;  %5992 = vst [vmem:[#allocation17_spill] sm:$0xff] %v4672_v39  ;;  %v1224_v43 = vadd.f32 %v1223_v1, %v4652_v30  ;;  %v1272_v44 = vmax.f32 %v1271_v9, %v4652_v30  ;;  %v1246_v45 = vadd.f32 %v1245_v10, %v4656_v31  ;;  %v4681_v48 = vsel %vm4616_vm3, %v892_v40, 0.0 }
 0x123   : > { %v648_v46 = vpop.f32.mrb[8].mxu0  ;;  %v791_v47 = vpop.f32.mrb[8].mxu1  ;;  %5993 = vst [vmem:[#allocation18_spill] sm:$0xff] %v4681_v48  ;;  %v4685_v49 = vsel %vm4616_vm3, %v894_v41, 0.0  ;;  %v893_v50 = vmax.f32 %v645_v27, 0.0  ;;  %v895_v51 = vmax.f32 %v788_v28, 0.0  ;;  %v1294_v59 = vmax.f32 %v1293_v34, %v4656_v31 }
 0x124   : > { %5994 = vst [vmem:[#allocation19_spill] sm:$0xff] %v4685_v49  ;;  %v650_v52 = vpop.f32.mrb[9].mxu0  ;;  %v793_v56 = vpop.f32.mrb[9].mxu1  ;;  %v1235_v60 = vadd.f32 %v1234_v35, %v4668_v38  ;;  %v1283_v62 = vmax.f32 %v1282_v36, %v4668_v38  ;;  %v1257_v1 = vadd.f32 %v1256_v37, %v4672_v39  ;;  %v649_v9 = vadd.f32 %v648_v46, %v4554_v13 }
 0x125   : > { %v652_v3 = vpop.f32.mrb[10].mxu0  ;;  %v795_v4 = vpop.f32.mrb[10].mxu1  ;;  %v4693_v7 = vsel %vm4616_vm3, %v893_v50, 0.0  ;;  %v4697_v8 = vsel %vm4616_vm3, %v895_v51, 0.0  ;;  %v792_v10 = vadd.f32 %v791_v47, %v4558_v15  ;;  %v1305_v19 = vmax.f32 %v1304_v42, %v4672_v39 }
 0x126   : > { %5995 = vst [vmem:[#allocation20_spill] sm:$0xff] %v4693_v7  ;;  %5996 = vst [vmem:[#allocation21_spill] sm:$0xff] %v4697_v8  ;;  %v654_v14 = vpop.f32.mrb[11].mxu0  ;;  %v797_v16 = vpop.f32.mrb[11].mxu1  ;;  %v1225_v20 = vadd.f32 %v1224_v43, %v4681_v48  ;;  %v1273_v21 = vmax.f32 %v1272_v44, %v4681_v48  ;;  %v1247_v22 = vadd.f32 %v1246_v45, %v4685_v49  ;;  %v896_v23 = vmax.f32 %v649_v9, 0.0 }
 0x127   : > { %v898_v24 = vmax.f32 %v792_v10, 0.0  ;;  %v651_v61 = vadd.f32 %v650_v52, %v4560_v17  ;;  %v794_v25 = vadd.f32 %v793_v56, %v4562_v18  ;;  %v1295_v26 = vmax.f32 %v1294_v59, %v4685_v49 }
 0x128   : > { %v1236_v27 = vadd.f32 %v1235_v60, %v4693_v7  ;;  %v1284_v28 = vmax.f32 %v1283_v62, %v4693_v7  ;;  %v1258_v32 = vadd.f32 %v1257_v1, %v4697_v8  ;;  %v4713_v33 = vsel %vm4646_vm4, %v896_v23, 0.0 }
 0x129   : > { %5997 = vst [vmem:[#allocation22_spill] sm:$0xff] %v4713_v33  ;;  %v4717_v34 = vsel %vm4646_vm4, %v898_v24, 0.0  ;;  %v897_v35 = vmax.f32 %v651_v61, 0.0  ;;  %v899_v36 = vmax.f32 %v794_v25, 0.0  ;;  %v1226_v37 = vadd.f32 %v1225_v20, %v4713_v33 }
 0x12a   : > { %5998 = vst [vmem:[#allocation23_spill] sm:$0xff] %v4717_v34  ;;  %v1274_v40 = vmax.f32 %v1273_v21, %v4713_v33  ;;  %v1248_v41 = vadd.f32 %v1247_v22, %v4717_v34  ;;  %v1296_v42 = vmax.f32 %v1295_v26, %v4717_v34  ;;  %v1306_v45 = vmax.f32 %v1305_v19, %v4697_v8 }
 0x12b   : > { %v658_v43 = vpop.f32.mrb[12].mxu0  ;;  %v801_v44 = vpop.f32.mrb[12].mxu1  ;;  %v4726_v46 = vsel %vm4646_vm4, %v897_v35, 0.0  ;;  %v4730_v47 = vsel %vm4646_vm4, %v899_v36, 0.0  ;;  %v1228_v56 = vrot.slane %v1226_v37, 4 }
 0x12c   : > { %5999 = vst [vmem:[#allocation24_spill] sm:$0xff] %v4726_v46  ;;  %6000 = vst [vmem:[#allocation25_spill] sm:$0xff] %v4730_v47  ;;  %v802_v50 = vadd.f32 %v801_v44, %v4558_v15  ;;  %v660_v51 = vpop.f32.mrb[13].mxu0  ;;  %v803_v52 = vpop.f32.mrb[13].mxu1  ;;  %v1275_v59 = vmax.f32 %v1274_v40, 0.0  ;;  %v1250_v60 = vrot.slane %v1248_v41, 4  ;;  %v1237_v4 = vadd.f32 %v1236_v27, %v4726_v46 }
 0x12d   : > { %v1297_v62 = vmax.f32 %v1296_v42, 0.0  ;;  %v662_v1 = vpop.f32.mrb[14].mxu0  ;;  %v805_v3 = vpop.f32.mrb[14].mxu1  ;;  %v1285_v9 = vmax.f32 %v1284_v28, %v4726_v46  ;;  %v1259_v10 = vadd.f32 %v1258_v32, %v4730_v47  ;;  %v1307_v29 = vmax.f32 %v1306_v45, %v4730_v47 }
 0x12e   : > { %v664_v14 = vpop.f32.mrb[15].mxu0  ;;  %v807_v16 = vpop.f32.mrb[15].mxu1  ;;  %v1229_v19 = vadd.f32 %v1228_v56, %v1226_v37  ;;  %v1276_v20 = vrot.slane %v1275_v59, 4  ;;  %v1251_v21 = vadd.f32 %v1250_v60, %v1248_v41  ;;  %v1239_v23 = vrot.slane %v1237_v4, 4 }
 0x12f   : > { %v1298_v22 = vrot.slane %v1297_v62, 4  ;;  %v1286_v24 = vmax.f32 %v1285_v9, 0.0  ;;  %v1261_v61 = vrot.slane %v1259_v10, 4  ;;  %v1308_v25 = vmax.f32 %v1307_v29, 0.0 }
 0x130   : > { %v1230_v26 = vrot.slane %v1229_v19, 2  ;;  %v1277_v35 = vmax.f32 %v1275_v59, %v1276_v20  ;;  %v1252_v36 = vrot.slane %v1251_v21, 2  ;;  %v1240_v40 = vadd.f32 %v1239_v23, %v1237_v4 }
 0x131   : > { %v1299_v27 = vmax.f32 %v1297_v62, %v1298_v22  ;;  %v1287_v28 = vrot.slane %v1286_v24, 4  ;;  %v1262_v42 = vadd.f32 %v1261_v61, %v1259_v10  ;;  %v1309_v32 = vrot.slane %v1308_v25, 4 }
 0x132   : > { %v4737_v44 = vadd.f32 %v1230_v26, %v1229_v19  ;;  %v1278_v45 = vrot.slane %v1277_v35, 2  ;;  %v4739_v63 = vadd.f32 %v1252_v36, %v1251_v21  ;;  %v1241_v60 = vrot.slane %v1240_v40, 2 }
 0x133   : > { %v1300_v37 = vrot.slane %v1299_v27, 2  ;;  %v668_v41 = vpop.f32.mrb[16].mxu0  ;;  %v811_v56 = vpop.f32.mrb[16].mxu1  ;;  %v4741_v9 = vmax.f32 %v1286_v24, %v1287_v28  ;;  %v1263_v29 = vrot.slane %v1262_v42, 2  ;;  %v4743_v34 = vmax.f32 %v1308_v25, %v1309_v32 }
 0x134   : > { %v670_v59 = vpop.f32.mrb[17].mxu0  ;;  %v813_v62 = vpop.f32.mrb[17].mxu1  ;;  %v4745_v4 = vmax.f32 %v1277_v35, %v1278_v45  ;;  %v4749_v22 = vadd.f32 %v1241_v60, %v1240_v40  ;;  %v659_v21 = vadd.f32 %v658_v43, %v4554_v13  ;;  %v4753_v24 = vadd.s32 80, %v4527_v2 }
 0x135   : > { %v4747_v10 = vmax.f32 %v1299_v27, %v1300_v37  ;;  %v672_v19 = vpop.f32.mrb[18].mxu0  ;;  %v815_v20 = vpop.f32.mrb[18].mxu1  ;;  %v4758_v36 = vadd.f32 %v1263_v29, %v1262_v42  ;;  %v4763_v43 = vmax.f32 %v802_v50, 0.0  ;;  %v661_v32 = vadd.f32 %v660_v51, %v4560_v17 }
 0x136   : > { %v674_v23 = vpop.f32.mrb[19].mxu0  ;;  %v817_v61 = vpop.f32.mrb[19].mxu1  ;;  %v804_v2 = vadd.f32 %v803_v52, %v4562_v18  ;;  %v663_v45 = vadd.f32 %v662_v1, %v4554_v13  ;;  %v806_v37 = vadd.f32 %v805_v3, %v4558_v15  ;;  %v4770_v42 = vmax.f32 %v659_v21, 0.0 }
 0x137   : > { %6001 = vst [vmem:[#allocation26_spill] sm:$0xff] %v4763_v43  ;;  %v665_v29 = vadd.f32 %v664_v14, %v4560_v17  ;;  %v808_v27 = vadd.f32 %v807_v16, %v4562_v18  ;;  %v4774_v25 = vmax.f32 %v661_v32, 0.0  ;;  %v669_v21 = vadd.f32 %v668_v41, %v4554_v13 }
 0x138   : > { %v4776_v50 = vmax.f32 %v804_v2, 0.0  ;;  %v4778_v40 = vmax.f32 %v663_v45, 0.0  ;;  %v4780_v51 = vmax.f32 %v806_v37, 0.0  ;;  %v812_v14 = vadd.f32 %v811_v56, %v4558_v15 }
 0x139   : > { %v4782_v26 = vmax.f32 %v665_v29, 0.0  ;;  %v4784_v3 = vmax.f32 %v808_v27, 0.0  ;;  %v4804_v49 = vmax.f32 %v669_v21, 0.0  ;;  %v671_v46 = vadd.f32 %v670_v59, %v4560_v17 }
 0x13a   : > { %6002 = vst [vmem:[#allocation27_spill] sm:$0xff] %v4776_v50  ;;  %6003 = vst [vmem:[#allocation28_spill] sm:$0xff] %v4780_v51  ;;  %v1315_v32 = vadd.f32 %v4778_v40, %v4770_v42  ;;  %v1403_v2 = vmax.f32 %v4770_v42, %v4778_v40  ;;  %v1357_v45 = vadd.f32 %v4780_v51, %v4763_v43  ;;  %v4806_v31 = vmax.f32 %v812_v14, 0.0 }
 0x13b   : > { %v678_v52 = vpop.f32.mrb[20].mxu0  ;;  %v821_v1 = vpop.f32.mrb[20].mxu1  ;;  %6004 = vst [vmem:[#allocation29_spill] sm:$0xff] %v4784_v3  ;;  %v1445_v37 = vmax.f32 %v4763_v43, %v4780_v51  ;;  %v1336_v41 = vadd.f32 %v4782_v26, %v4774_v25  ;;  %v1424_v56 = vmax.f32 %v4774_v25, %v4782_v26  ;;  %v1378_v28 = vadd.f32 %v4784_v3, %v4776_v50 }
 0x13c   : > { %v680_v60 = vpop.f32.mrb[21].mxu0  ;;  %v823_v16 = vpop.f32.mrb[21].mxu1  ;;  %v1466_v35 = vmax.f32 %v4776_v50, %v4784_v3  ;;  %6005 = vst [vmem:[#allocation30_spill] sm:$0xff] %v4804_v49  ;;  %6006 = vst [vmem:[#allocation31_spill] sm:$0xff] %v4806_v31  ;;  %v814_v48 = vadd.f32 %v813_v62, %v4562_v18  ;;  %v673_v30 = vadd.f32 %v672_v19, %v4554_v13  ;;  %v4818_v38 = vmax.f32 %v671_v46, 0.0 }
 0x13d   : > { %v682_v27 = vpop.f32.mrb[22].mxu0  ;;  %v825_v29 = vpop.f32.mrb[22].mxu1  ;;  %v816_v8 = vadd.f32 %v815_v20, %v4558_v15  ;;  %v675_v39 = vadd.f32 %v674_v23, %v4560_v17  ;;  %v818_v55 = vadd.f32 %v817_v61, %v4562_v18  ;;  %v1316_v53 = vadd.f32 %v1315_v32, %v4804_v49 }
 0x13e   : > { %v684_v33 = vpop.f32.mrb[23].mxu0  ;;  %v827_v47 = vpop.f32.mrb[23].mxu1  ;;  %v1404_v7 = vmax.f32 %v1403_v2, %v4804_v49  ;;  %v1358_v21 = vadd.f32 %v1357_v45, %v4806_v31  ;;  %v1446_v14 = vmax.f32 %v1445_v37, %v4806_v31  ;;  %6007 = vst [vmem:[#allocation32_spill] sm:$0xff] %v4818_v38  ;;  %v4820_v59 = vmax.f32 %v814_v48, 0.0 }
 0x13f   : > { %v4822_v62 = vmax.f32 %v673_v30, 0.0  ;;  %v4824_v19 = vmax.f32 %v816_v8, 0.0  ;;  %v4826_v20 = vmax.f32 %v675_v39, 0.0  ;;  %v4828_v23 = vmax.f32 %v818_v55, 0.0 }
 0x140   : > { %6008 = vst [vmem:[#allocation33_spill] sm:$0xff] %v4820_v59  ;;  %v679_v61 = vadd.f32 %v678_v52, %v4554_v13  ;;  %v822_v32 = vadd.f32 %v821_v1, %v4558_v15  ;;  %v1337_v37 = vadd.f32 %v1336_v41, %v4818_v38  ;;  %v1425_v46 = vmax.f32 %v1424_v56, %v4818_v38 }
 0x141   : > { %6009 = vst [vmem:[#allocation34_spill] sm:$0xff] %v4822_v62  ;;  %6010 = vst [vmem:[#allocation35_spill] sm:$0xff] %v4824_v19  ;;  %v1379_v48 = vadd.f32 %v1378_v28, %v4820_v59  ;;  %v1467_v30 = vmax.f32 %v1466_v35, %v4820_v59  ;;  %v1317_v39 = vadd.f32 %v1316_v53, %v4822_v62  ;;  %vm1121_vm5 = vcmp.lt.s32.totalorder %v4753_v24, 81 }
 0x142   : > { %6011 = vst [vmem:[#allocation36_spill] sm:$0xff] %v4826_v20  ;;  %6012 = vst [vmem:[#allocation37_spill] sm:$0xff] %v4828_v23  ;;  %v1405_v55 = vmax.f32 %v1404_v7, %v4822_v62  ;;  %v1359_v52 = vadd.f32 %v1358_v21, %v4824_v19  ;;  %v1447_v1 = vmax.f32 %v1446_v14, %v4824_v19  ;;  %v4844_v11 = vmax.f32 %v679_v61, 0.0  ;;  %v4011_v61 = vld [vmem:[%s5836_s4 + $0x64] ss:$8 sps:$4 sm:$0xff]  }
 0x143   : > { %v688_v2 = vpop.f32.mrb[24].mxu0  ;;  %v831_v45 = vpop.f32.mrb[24].mxu1  ;;  %v1338_v41 = vadd.f32 %v1337_v37, %v4826_v20  ;;  %v1426_v56 = vmax.f32 %v1425_v46, %v4826_v20  ;;  %v1380_v28 = vadd.f32 %v1379_v48, %v4828_v23  ;;  %v1468_v35 = vmax.f32 %v1467_v30, %v4828_v23  ;;  %v4009_v30 = vld [vmem:[%s5836_s4 + $0x60] ss:$8 sps:$4 sm:$0xff]   ;;  %2007 = vmatprep.subr.bf16.mxu1 %v4011_v61 }
 0x144   : > { %v690_v8 = vpop.f32.mrb[25].mxu0  ;;  %v833_v54 = vpop.f32.mrb[25].mxu1  ;;  %6013 = vst [vmem:[#allocation38_spill] sm:$0xff] %v4844_v11  ;;  %v4846_v53 = vmax.f32 %v822_v32, 0.0  ;;  %v681_v7 = vadd.f32 %v680_v60, %v4560_v17  ;;  %v824_v21 = vadd.f32 %v823_v16, %v4562_v18  ;;  %v683_v14 = vadd.f32 %v682_v27, %v4554_v13  ;;  %2008 = vmatpush1.bf16.msra.mxu1 %v4009_v30 }
 0x145   : > { %v692_v57 = vpop.f32.mrb[26].mxu0  ;;  %v835_v6 = vpop.f32.mrb[26].mxu1  ;;  %v826_v37 = vadd.f32 %v825_v29, %v4558_v15  ;;  %v685_v46 = vadd.f32 %v684_v33, %v4560_v17  ;;  %v828_v48 = vadd.f32 %v827_v47, %v4562_v18  ;;  %v1318_v60 = vadd.f32 %v1317_v39, %v4844_v11 }
 0x146   : > { %v694_v12 = vpop.f32.mrb[27].mxu0  ;;  %v837_v0 = vpop.f32.mrb[27].mxu1  ;;  %6014 = vst [vmem:[#allocation39_spill] sm:$0xff] %v4846_v53  ;;  %v1406_v16 = vmax.f32 %v1405_v55, %v4844_v11  ;;  %v1360_v27 = vadd.f32 %v1359_v52, %v4846_v53  ;;  %v1448_v29 = vmax.f32 %v1447_v1, %v4846_v53  ;;  %v4864_v32 = vmax.f32 %v681_v7, 0.0 }
 0x147   : > { %v4866_v33 = vmax.f32 %v824_v21, 0.0  ;;  %v4868_v47 = vmax.f32 %v683_v14, 0.0  ;;  %v4870_v58 = vmax.f32 %v826_v37, 0.0  ;;  %v4872_v23 = vmax.f32 %v685_v46, 0.0 }
 0x148   : > { %6015 = vst [vmem:[#allocation40_spill] sm:$0xff] %v4864_v32  ;;  %v4874_v19 = vmax.f32 %v828_v48, 0.0  ;;  %v689_v39 = vadd.f32 %v688_v2, %v4554_v13  ;;  %v832_v55 = vadd.f32 %v831_v45, %v4558_v15  ;;  %v6021_v1 = vrot.slane %v4741_v9, 2 }
 0x149   : > { %6016 = vst [vmem:[#allocation41_spill] sm:$0xff] %v4866_v33  ;;  %6017 = vst [vmem:[#allocation42_spill] sm:$0xff] %v4868_v47  ;;  %v1339_v21 = vadd.f32 %v1338_v41, %v4864_v32  ;;  %v1427_v14 = vmax.f32 %v1426_v56, %v4864_v32  ;;  %v1381_v37 = vadd.f32 %v1380_v28, %v4866_v33 }
 0x14a   : > { %6018 = vst [vmem:[#allocation43_spill] sm:$0xff] %v4870_v58  ;;  %6019 = vst [vmem:[#allocation44_spill] sm:$0xff] %v4872_v23  ;;  %v4881_v7 = vmax.f32 %v4741_v9, %v6021_v1  ;;  %v1469_v2 = vmax.f32 %v1468_v35, %v4866_v33  ;;  %v1319_v45 = vadd.f32 %v1318_v60, %v4868_v47  ;;  %v4894_v51 = vmax.f32 %v689_v39, 0.0  ;;  %v4014_v39 = vld [vmem:[%s5836_s4 + $0x74] ss:$8 sps:$4 sm:$0xff]  }
 0x14b   : > { %6020 = vst [vmem:[#allocation45_spill] sm:$0xff] %v4874_v19  ;;  %v698_v52 = vpop.f32.mrb[28].mxu0  ;;  %v841_v59 = vpop.f32.mrb[28].mxu1  ;;  %v1407_v61 = vmax.f32 %v1406_v16, %v4868_v47  ;;  %v1361_v30 = vadd.f32 %v1360_v27, %v4870_v58  ;;  %v1449_v9 = vmax.f32 %v1448_v29, %v4870_v58  ;;  %v1340_v41 = vadd.f32 %v1339_v21, %v4872_v23 }
 0x14c   : > { %v700_v46 = vpop.f32.mrb[29].mxu0  ;;  %v843_v48 = vpop.f32.mrb[29].mxu1  ;;  %v1428_v56 = vmax.f32 %v1427_v14, %v4872_v23  ;;  %v1382_v28 = vadd.f32 %v1381_v37, %v4874_v19  ;;  %6022 = vst [vmem:[#allocation46_spill] sm:$0xff] %v4894_v51  ;;  %v4896_v35 = vmax.f32 %v832_v55, 0.0  ;;  %v691_v60 = vadd.f32 %v690_v8, %v4560_v17  ;;  %v4012_v37 = vld [vmem:[%s5836_s4 + $0x70] ss:$8 sps:$4 sm:$0xff]   ;;  %2009 = vmatprep.subr.bf16.mxu1 %v4014_v39 }
 0x14d   : > { %v702_v53 = vpop.f32.mrb[30].mxu0  ;;  %v845_v31 = vpop.f32.mrb[30].mxu1  ;;  %v834_v16 = vadd.f32 %v833_v54, %v4562_v18  ;;  %v693_v27 = vadd.f32 %v692_v57, %v4554_v13  ;;  %v836_v29 = vadd.f32 %v835_v6, %v4558_v15  ;;  %v695_v21 = vadd.f32 %v694_v12, %v4560_v17  ;;  %2010 = vmatpush1.bf16.msra.mxu1 %v4012_v37 }
 0x14e   : > { %v704_v1 = vpop.f32.mrb[31].mxu0  ;;  %v847_v3 = vpop.f32.mrb[31].mxu1  ;;  %6023 = vst [vmem:[#allocation47_spill] sm:$0xff] %v4896_v35  ;;  %v838_v14 = vadd.f32 %v837_v0, %v4562_v18  ;;  %v1320_v8 = vadd.f32 %v1319_v45, %v4894_v51  ;;  %v1408_v54 = vmax.f32 %v1407_v61, %v4894_v51  ;;  %v1362_v57 = vadd.f32 %v1361_v30, %v4896_v35 }
 0x14f   : > { %v1450_v6 = vmax.f32 %v1449_v9, %v4896_v35  ;;  %v4914_v55 = vmax.f32 %v691_v60, 0.0  ;;  %v4916_v12 = vmax.f32 %v834_v16, 0.0  ;;  %v4918_v0 = vmax.f32 %v693_v27, 0.0 }
 0x150   : > { %v4920_v58 = vmax.f32 %v836_v29, 0.0  ;;  %v1470_v33 = vmax.f32 %v1469_v2, %v4874_v19  ;;  %v4923_v50 = vmax.f32 %v695_v21, 0.0  ;;  %v699_v45 = vadd.f32 %v698_v52, %v4554_v13 }
 0x151   : > { %6024 = vst [vmem:[#allocation48_spill] sm:$0xff] %v4914_v55  ;;  %6025 = vst [vmem:[#allocation49_spill] sm:$0xff] %v4916_v12  ;;  %v842_v61 = vadd.f32 %v841_v59, %v4558_v15  ;;  %v1341_v60 = vadd.f32 %v1340_v41, %v4914_v55  ;;  %v1429_v16 = vmax.f32 %v1428_v56, %v4914_v55  ;;  %v4930_v27 = vmax.f32 %v838_v14, 0.0 }
 0x152   : > { %6026 = vst [vmem:[#allocation50_spill] sm:$0xff] %v4918_v0  ;;  %6027 = vst [vmem:[#allocation51_spill] sm:$0xff] %v4920_v58  ;;  %v1383_v21 = vadd.f32 %v1382_v28, %v4916_v12  ;;  %v1471_v52 = vmax.f32 %v1470_v33, %v4916_v12  ;;  %v1321_v59 = vadd.f32 %v1320_v8, %v4918_v0  ;;  %v4941_v51 = vmax.f32 %v699_v45, 0.0 }
 0x153   : > { %6028 = vst [vmem:[#allocation52_spill] sm:$0xff] %v4923_v50  ;;  %v708_v30 = vpop.f32.mrb[32].mxu0  ;;  %v851_v43 = vpop.f32.mrb[32].mxu1  ;;  %6029 = vst [vmem:[#allocation53_spill] sm:$0xff] %v4930_v27  ;;  %v1409_v37 = vmax.f32 %v1408_v54, %v4918_v0  ;;  %v1363_v41 = vadd.f32 %v1362_v57, %v4920_v58  ;;  %v1451_v56 = vmax.f32 %v1450_v6, %v4920_v58  ;;  %v4943_v28 = vmax.f32 %v842_v61, 0.0 }
 0x154   : > { %v710_v2 = vpop.f32.mrb[33].mxu0  ;;  %v853_v29 = vpop.f32.mrb[33].mxu1  ;;  %v1342_v14 = vadd.f32 %v1341_v60, %v4923_v50  ;;  %v1430_v35 = vmax.f32 %v1429_v16, %v4923_v50  ;;  %6030 = vst [vmem:[#allocation54_spill] sm:$0xff] %v4941_v51  ;;  %v701_v33 = vadd.f32 %v700_v46, %v4560_v17  ;;  %v844_v8 = vadd.f32 %v843_v48, %v4562_v18 }
 0x155   : > { %v712_v39 = vpop.f32.mrb[34].mxu0  ;;  %v855_v9 = vpop.f32.mrb[34].mxu1  ;;  %6031 = vst [vmem:[#allocation55_spill] sm:$0xff] %v4943_v28  ;;  %v703_v54 = vadd.f32 %v702_v53, %v4554_v13  ;;  %v846_v57 = vadd.f32 %v845_v31, %v4558_v15  ;;  %v705_v6 = vadd.f32 %v704_v1, %v4560_v17  ;;  %v1322_v60 = vadd.f32 %v1321_v59, %v4941_v51 }
 0x156   : > { %v714_v19 = vpop.f32.mrb[35].mxu0  ;;  %v857_v55 = vpop.f32.mrb[35].mxu1  ;;  %v848_v9 = vadd.f32 %v847_v3, %v4562_v18  ;;  %v1452_v45 = vmax.f32 %v1451_v56, %v4943_v28  ;;  %v4955_v61 = vmax.f32 %v701_v33, 0.0  ;;  %v4957_v46 = vmax.f32 %v844_v8, 0.0 }
 0x157   : > { %v1410_v19 = vmax.f32 %v1409_v37, %v4941_v51  ;;  %v1364_v55 = vadd.f32 %v1363_v41, %v4943_v28  ;;  %v4959_v48 = vmax.f32 %v703_v54, 0.0  ;;  %v4961_v53 = vmax.f32 %v846_v57, 0.0 }
 0x158   : > { %6032 = vst [vmem:[#allocation56_spill] sm:$0xff] %v4955_v61  ;;  %6033 = vst [vmem:[#allocation57_spill] sm:$0xff] %v4957_v46  ;;  %v1384_v31 = vadd.f32 %v1383_v21, %v4930_v27  ;;  %v1472_v3 = vmax.f32 %v1471_v52, %v4930_v27  ;;  %v709_v1 = vadd.f32 %v708_v30, %v4554_v13  ;;  %v4969_v39 = vmax.f32 %v705_v6, 0.0 }
 0x159   : > { %6034 = vst [vmem:[#allocation58_spill] sm:$0xff] %v4959_v48  ;;  %6035 = vst [vmem:[#allocation59_spill] sm:$0xff] %v4961_v53  ;;  %v852_v16 = vadd.f32 %v851_v43, %v4558_v15  ;;  %v1343_v59 = vadd.f32 %v1342_v14, %v4955_v61  ;;  %v1431_v37 = vmax.f32 %v1430_v35, %v4955_v61  ;;  %v4971_v41 = vmax.f32 %v848_v9, 0.0 }
 0x15a   : > { %6036 = vst [vmem:[#allocation60_spill] sm:$0xff] %v4969_v39  ;;  %v1385_v56 = vadd.f32 %v1384_v31, %v4957_v46  ;;  %v944_v33 = vmax.f32 %v709_v1, 0.0  ;;  %v1323_v8 = vadd.f32 %v1322_v60, %v4959_v48  ;;  %v1411_v52 = vmax.f32 %v1410_v19, %v4959_v48 }
 0x15b   : > { %6037 = vst [vmem:[#allocation61_spill] sm:$0xff] %v4971_v41  ;;  %v946_v21 = vmax.f32 %v852_v16, 0.0  ;;  %v1365_v13 = vadd.f32 %v1364_v55, %v4961_v53  ;;  %v1453_v15 = vmax.f32 %v1452_v45, %v4961_v53  ;;  %v711_v43 = vadd.f32 %v710_v2, %v4560_v17 }
 0x15c   : > { %v1473_v35 = vmax.f32 %v1472_v3, %v4957_v46  ;;  %v4982_v30 = vsel %vm1121_vm5, %v944_v33, 0.0  ;;  %v854_v54 = vadd.f32 %v853_v29, %v4562_v18  ;;  %v1344_v60 = vadd.f32 %v1343_v59, %v4969_v39 }
 0x15d   : > { %6038 = vst [vmem:[#allocation62_spill] sm:$0xff] %v4982_v30  ;;  %v4986_v14 = vsel %vm1121_vm5, %v946_v21, 0.0  ;;  %v1324_v57 = vadd.f32 %v1323_v8, %v4982_v30  ;;  %v1412_v6 = vmax.f32 %v1411_v52, %v4982_v30  ;;  %v945_v2 = vmax.f32 %v711_v43, 0.0 }
 0x15e   : > { %6039 = vst [vmem:[#allocation63_spill] sm:$0xff] %v4986_v14  ;;  %v1366_v9 = vadd.f32 %v1365_v13, %v4986_v14  ;;  %v1454_v17 = vmax.f32 %v1453_v15, %v4986_v14  ;;  %v1432_v19 = vmax.f32 %v1431_v37, %v4969_v39  ;;  %v947_v55 = vmax.f32 %v854_v54, 0.0 }
 0x15f   : > { %v1330_v45 = vrot.slane %v1324_v57, 4  ;;  %v1413_v31 = vmax.f32 %v1412_v6, 0.0  ;;  %v4997_v18 = vsel %vm1121_vm5, %v945_v2, 0.0  ;;  %v1386_v16 = vadd.f32 %v1385_v56, %v4971_v41 }
 0x160   : > { %v1372_v3 = vrot.slane %v1366_v9, 4  ;;  %v1455_v1 = vmax.f32 %v1454_v17, 0.0  ;;  %6040 = vst [vmem:[#allocation64_spill] sm:$0xff] %v4997_v18  ;;  %v5001_v29 = vsel %vm1121_vm5, %v947_v55, 0.0  ;;  %v1474_v33 = vmax.f32 %v1473_v35, %v4971_v41 }
 0x161   : > { %6041 = vst [vmem:[#allocation65_spill] sm:$0xff] %v5001_v29  ;;  %v1331_v59 = vadd.f32 %v1330_v45, %v1324_v57  ;;  %v1414_v8 = vmax.f32 %v1413_v31, 0.0  ;;  %v1345_v52 = vadd.f32 %v1344_v60, %v4997_v18  ;;  %v1433_v13 = vmax.f32 %v1432_v19, %v4997_v18 }
 0x162   : > { %v1373_v37 = vadd.f32 %v1372_v3, %v1366_v9  ;;  %v1456_v21 = vmax.f32 %v1455_v1, 0.0  ;;  %v1387_v15 = vadd.f32 %v1386_v16, %v5001_v29  ;;  %v1475_v43 = vmax.f32 %v1474_v33, %v5001_v29 }
 0x163   : > { %v1332_v54 = vrot.slane %v1331_v59, 2  ;;  %v1415_v24 = vmax.f32 %v1414_v8, 0.0  ;;  %v1351_v2 = vrot.slane %v1345_v52, 4  ;;  %v1434_v56 = vmax.f32 %v1433_v13, 0.0 }
 0x164   : > { %v1374_v6 = vrot.slane %v1373_v37, 2  ;;  %v1457_v17 = vmax.f32 %v1456_v21, 0.0  ;;  %v1393_v55 = vrot.slane %v1387_v15, 4  ;;  %v1476_v35 = vmax.f32 %v1475_v43, 0.0 }
 0x165   : > { %v1333_v57 = vadd.f32 %v1332_v54, %v1331_v59  ;;  %v1416_v45 = vmax.f32 %v1415_v24, 0.0  ;;  %v1352_v3 = vadd.f32 %v1351_v2, %v1345_v52  ;;  %v1435_v60 = vmax.f32 %v1434_v56, 0.0 }
 0x166   : > { %v1375_v9 = vadd.f32 %v1374_v6, %v1373_v37  ;;  %v1458_v31 = vmax.f32 %v1457_v17, 0.0  ;;  %v1394_v1 = vadd.f32 %v1393_v55, %v1387_v15  ;;  %v1477_v19 = vmax.f32 %v1476_v35, 0.0 }
 0x167   : > { %v1334_v14 = vrot.slane %v1333_v57, 1  ;;  %v1417_v16 = vmax.f32 %v1416_v45, 0.0  ;;  %v1353_v29 = vrot.slane %v1352_v3, 2  ;;  %v1436_v8 = vmax.f32 %v1435_v60, 0.0 }
 0x168   : > { %v1376_v41 = vrot.slane %v1375_v9, 1  ;;  %v1459_v33 = vmax.f32 %v1458_v31, 0.0  ;;  %v1395_v53 = vrot.slane %v1394_v1, 2  ;;  %v1478_v21 = vmax.f32 %v1477_v19, 0.0 }
 0x169   : > { %v1335_v46 = vadd.f32 %v1334_v14, %v1333_v57  ;;  %v1418_v13 = vrot.slane %v1417_v16, 4  ;;  %v1354_v59 = vadd.f32 %v1353_v29, %v1352_v3  ;;  %v1437_v37 = vmax.f32 %v1436_v8, 0.0 }
 0x16a   : > { %v1377_v28 = vadd.f32 %v1376_v41, %v1375_v9  ;;  %v1460_v43 = vrot.slane %v1459_v33, 4  ;;  %v1396_v54 = vadd.f32 %v1395_v53, %v1394_v1  ;;  %v1479_v52 = vmax.f32 %v1478_v21, 0.0 }
 0x16b   : > { %v1291_v15 = vrot.slane %v4881_v7, 1  ;;  %v6042_v24 = vrot.slane %v4743_v34, 2  ;;  %v1419_v17 = vmax.f32 %v1417_v16, %v1418_v13  ;;  %v1355_v56 = vrot.slane %v1354_v59, 1 }
 0x16c   : > { %v1461_v2 = vmax.f32 %v1459_v33, %v1460_v43  ;;  %v1438_v55 = vmax.f32 %v1437_v37, 0.0  ;;  %v1397_v14 = vrot.slane %v1396_v54, 1  ;;  %v1480_v35 = vmax.f32 %v1479_v52, 0.0 }
 0x16d   : > { %v1312_v6 = vmax.f32 %v4743_v34, %v6042_v24  ;;  %v1399_v41 = vmul.f32 0.012345679, %v1335_v46  ;;  %v1420_v57 = vrot.slane %v1419_v17, 2  ;;  %v6043_v53 = vrot.slane %v4749_v22, 1 }
 0x16e   : > { %v1462_v45 = vrot.slane %v1461_v2, 2  ;;  %v1401_v9 = vmul.f32 0.012345679, %v1377_v28  ;;  %v1356_v31 = vadd.f32 %v1355_v56, %v1354_v59  ;;  %v1439_v3 = vrot.slane %v1438_v55, 4 }
 0x16f   : > { %v1244_v29 = vadd.f32 %v6043_v53, %v4749_v22  ;;  %v1481_v60 = vrot.slane %v1480_v35, 4  ;;  %v1421_v1 = vmax.f32 %v1419_v17, %v1420_v57  ;;  %v1398_v34 = vadd.f32 %v1397_v14, %v1396_v54 }
 0x170   : > { %v1463_v19 = vmax.f32 %v1461_v2, %v1462_v45  ;;  %v6044_v16 = vrot.slane %v4739_v63, 1  ;;  %v1313_v8 = vrot.slane %v1312_v6, 1  ;;  %v1440_v21 = vmax.f32 %v1438_v55, %v1439_v3 }
 0x171   : > { %v1482_v46 = vmax.f32 %v1480_v35, %v1481_v60  ;;  %v1292_v13 = vmax.f32 %v4881_v7, %v1291_v15  ;;  %v1422_v43 = vrot.slane %v1421_v1, 1  ;;  %v6045_v22 = vrot.slane %v4747_v10, 1 }
 0x172   : > { %v1255_v33 = vadd.f32 %v6044_v16, %v4739_v63  ;;  %v1464_v37 = vrot.slane %v1463_v19, 1  ;;  %v1441_v59 = vrot.slane %v1440_v21, 2  ;;  %v1720_v54 = vsel %vm1487_vm6, %v1399_v41, %v1401_v9 }
 0x173   : > { %v1303_v28 = vmax.f32 %v4747_v10, %v6045_v22  ;;  %v1483_v24 = vrot.slane %v1482_v46, 2  ;;  %v1268_v17 = vmul.f32 0.04, %v1244_v29  ;;  %v1400_v2 = vmul.f32 0.012345679, %v1356_v31  ;;  %v718_v22 = vpop.f32.mrb[36].mxu0 }
 0x174   : > { %v1269_v52 = vmul.f32 0.04, %v1255_v33  ;;  %v1402_v56 = vmul.f32 0.012345679, %v1398_v34  ;;  %v1423_v63 = vmax.f32 %v1421_v1, %v1422_v43  ;;  %v1465_v14 = vmax.f32 %v1463_v19, %v1464_v37 }
 0x175   : > { %v1442_v55 = vmax.f32 %v1440_v21, %v1441_v59  ;;  %v1484_v35 = vmax.f32 %v1482_v46, %v1483_v24  ;;  %v6046_v15 = vrot.slane %v4737_v44, 1  ;;  %v6047_v10 = vrot.slane %v4745_v4, 1  ;;  %v720_v59 = vpop.f32.mrb[37].mxu0 }
 0x176   : > { %v1490_v7 = vsel %vm1487_vm6, %v1269_v52, %v1303_v28  ;;  %v6048_v53 = vrot.slane %v4758_v36, 1  ;;  %v1314_v9 = vmax.f32 %v1312_v6, %v1313_v8  ;;  %v1722_v60 = vsel %vm1492_vm7, %v1720_v54, %v1423_v63  ;;  %v861_v28 = vpop.f32.mrb[36].mxu1  ;;  %v722_v54 = vpop.f32.mrb[38].mxu0 }
 0x177   : > { %v1233_v57 = vadd.f32 %v6046_v15, %v4737_v44  ;;  %v5029_v45 = vsel %vm1492_vm7, %v1490_v7, %v1465_v14  ;;  %v1281_v41 = vmax.f32 %v4745_v4, %v6047_v10  ;;  %v1443_v31 = vrot.slane %v1442_v55, 1  ;;  %v863_v24 = vpop.f32.mrb[37].mxu1 }
 0x178   : > { %v1266_v29 = vadd.f32 %v6048_v53, %v4758_v36  ;;  %v1485_v3 = vrot.slane %v1484_v35, 1  ;;  %v1489_v16 = vsel %vm1487_vm6, %v1268_v17, %v1292_v13  ;;  %v1721_v33 = vsel %vm1487_vm6, %v1400_v2, %v1402_v56  ;;  %v865_v17 = vpop.f32.mrb[38].mxu1  ;;  %v724_v2 = vpop.f32.mrb[39].mxu0 }
 0x179   : > { %v1267_v1 = vmul.f32 0.04, %v1233_v57  ;;  %v1444_v44 = vmax.f32 %v1442_v55, %v1443_v31  ;;  %v1725_v21 = vsel %vm1724_vm8, %v1722_v60, %v1465_v14  ;;  %v867_v56 = vpop.f32.mrb[39].mxu1  ;;  %v728_v14 = vpop.f32.mrb[40].mxu0 }
 0x17a   : > { %v1270_v19 = vmul.f32 0.04, %v1266_v29  ;;  %v1486_v34 = vmax.f32 %v1484_v35, %v1485_v3  ;;  %v1727_v52 = vpack.c.bf16 %v1725_v21, %v1725_v21  ;;  %v871_v55 = vpop.f32.mrb[40].mxu1 }
 0x17b   : > { %v1488_v4 = vsel %vm1487_vm6, %v1267_v1, %v1281_v41  ;;  %v1723_v36 = vsel %vm1492_vm7, %v1721_v33, %v1444_v44  ;;  %v5044_v6 = vsel %vm1492_vm7, %v1489_v16, %v1444_v44  ;;  %v873_v35 = vpop.f32.mrb[41].mxu1 }
 0x17c   : > { %v1491_v46 = vsel %vm1487_vm6, %v1270_v19, %v1314_v9  ;;  %v5047_v8 = vsel %vm1492_vm7, %v1488_v4, %v1423_v63  ;;  %v1726_v37 = vsel %vm1724_vm8, %v1723_v36, %v1486_v34  ;;  %v730_v63 = vpop.f32.mrb[41].mxu0  ;;  %v875_v15 = vpop.f32.mrb[42].mxu1 }
 0x17d   : > { %v5050_v43 = vsel %vm1492_vm7, %v1491_v46, %v1486_v34  ;;  %v1728_v13 = vpack.c.bf16 %v1726_v37, %v1726_v37  ;;  %v732_v7 = vpop.f32.mrb[42].mxu0  ;;  %v877_v10 = vpop.f32.mrb[43].mxu1 }
 0x17e   : > { %v734_v57 = vpop.f32.mrb[43].mxu0 }
 0x17f   : > { %1889 = vmatprep.mubr.bf16.mxu0 %v1728_v13 }
 0x180   : > { %1890 = vmatmul.mubr.bf16.vlgmr.msra.gmra.mrb[44].mxu0 %v1727_v52 }
 0x253   : > { %v3750_v41 = vpop.f32.mrb[44].mxu0 }
 0x254   : > { %v3751_v53 = vpop.f32.mrb[45].mxu0 }
 0x255   : > { %v3752_v29 = vadd.f32 %v3751_v53, %v3750_v41  ;;  %v3753_v9 = vpop.f32.mrb[46].mxu0 }
 0x256   : > { %v3754_v31 = vpop.f32.mrb[47].mxu0 }
 0x257   : > { %v1897_v3 = vmax.f32 %v3752_v29, 0.0 }
 0x259   : > { %v1898_v60 = vpack.c.bf16 %v1897_v3, %v1897_v3 }
 0x25b   : > { %2028 = vmatmul.mubr.bf16.vlgmr.msra.gmra.mrb[44].mxu1 %v1898_v60 }
 0x32e   : > { %v2029_v1 = vpop.f32.mrb[44].mxu1 }
 0x32f   : > { %v2038_v19 = vrot.slane %v2029_v1, 2  ;;  %v2031_v44 = vpop.f32.mrb[45].mxu1 }
 0x330   : > { %v2039_v34 = vrot.slane %v2031_v44, 2  ;;  %v2033_v16 = vpop.f32.mrb[46].mxu1 }
 0x331   : > { %v2042_v33 = vadd.f32 %v2038_v19, %v2029_v1  ;;  %v2034_v21 = vpop.f32.mrb[47].mxu1 }
 0x332   : > { %v2043_v4 = vadd.f32 %v2039_v34, %v2031_v44 }
 0x333   : > { %v3676_v46 = vmul.f32 -1.442695, %v2042_v33  ;;  %v2046_v1 = vrot.slane %v2042_v33, 1 }
 0x334   : > { %v3677_v36 = vmul.f32 -1.442695, %v2043_v4  ;;  %v2047_v19 = vrot.slane %v2043_v4, 1 }
 0x335   : > { %4039 = vpow2.f32 %v3676_v46  ;;  %v3678_v46 = vmul.f32 -1.442695, %v2046_v1 }
 0x336   : > { %4041 = vpow2.f32 %v3677_v36  ;;  %v3679_v36 = vmul.f32 -1.442695, %v2047_v19 }
 0x33f   : > { %v4040_v37 = vpop.eup %4039 }
 0x340   : > { %v4042_v13 = vpop.eup %4041  ;;  %v2062_v52 = vadd.f32 1.0, %v4040_v37 }
 0x341   : > { %v2063_v22 = vadd.f32 1.0, %v4042_v13 }
 0x342   : > { %4043 = vrcp.f32 %v2062_v52 }
 0x343   : > { %4045 = vrcp.f32 %v2063_v22 }
 0x344   : > { %4047 = vpow2.f32 %v3678_v46 }
 0x345   : > { %4049 = vpow2.f32 %v3679_v36 }
 0x34c   : > { %v4044_v28 = vpop.eup %4043 }
 0x34d   : > { %v4046_v59 = vpop.eup %4045  ;;  %v5053_v24 = vrot.slane %v4044_v28, %v4536_v5 }
 0x34e   : > { %v5056_v54 = vrot.slane %v4046_v59, %v4536_v5 }
 0x34f   : > { %v5060_v17 = vmul.f32 %v5053_v24, %v4778_v40  ;;  %v5064_v2 = vmul.f32 %v5053_v24, %v4770_v42  ;;  %v5080_v35 = vmul.f32 %v5053_v24, %v4822_v62  ;;  %v5092_v10 = vmul.f32 %v5053_v24, %v4868_v47 }
 0x350   : > { %v5068_v56 = vmul.f32 %v5056_v54, %v4782_v26  ;;  %v5072_v14 = vmul.f32 %v5056_v54, %v4774_v25  ;;  %v5084_v7 = vmul.f32 %v5056_v54, %v4826_v20  ;;  %v5096_v41 = vmul.f32 %v5056_v54, %v4872_v23 }
 0x351   : > { %6049 = vst [vmem:[#allocation66_spill] sm:$0xff] %v5080_v35  ;;  %6051 = vst [vmem:[#allocation68_spill] sm:$0xff] %v5092_v10  ;;  %v5104_v9 = vmul.f32 %v5053_v24, %v4804_v49  ;;  %v5108_v31 = vmul.f32 %v5056_v54, %v4818_v38  ;;  %v5120_v16 = vmul.f32 %v5053_v24, %v4918_v0  ;;  %v5166_v1 = vmul.f32 0.0, %v5056_v54 }
 0x352   : > { %v2222_v55 = vmax.f32 %v5060_v17, %v5068_v56  ;;  %v2154_v63 = vadd.f32 %v5072_v14, %v5064_v2  ;;  %6050 = vst [vmem:[#allocation67_spill] sm:$0xff] %v5084_v7  ;;  %v2163_v15 = vadd.f32 %v5084_v7, %v5080_v35  ;;  %v2157_v57 = vadd.f32 %v5068_v56, %v5060_v17 }
 0x353   : > { %6052 = vst [vmem:[#allocation69_spill] sm:$0xff] %v5096_v41  ;;  %v2228_v53 = vmax.f32 %v5080_v35, %v5084_v7  ;;  %v2219_v29 = vmax.f32 %v5064_v2, %v5072_v14  ;;  %6053 = vst [vmem:[#allocation70_spill] sm:$0xff] %v5104_v9  ;;  %v2169_v3 = vadd.f32 %v5096_v41, %v5092_v10  ;;  %v1577_v7 = vstv %s3632_s15 }
 0x354   : > { %2223 = vmax.xlane.f32.xlu1 %v2222_v55  ;;  %2155 = vadd.xlane.f32.xlu0 %v2154_v63  ;;  %6054 = vst [vmem:[#allocation71_spill] sm:$0xff] %v5108_v31  ;;  %v2160_v60 = vadd.f32 %v5108_v31, %v5104_v9  ;;  %v2234_v44 = vmax.f32 %v5092_v10, %v5096_v41  ;;  %6055 = vst [vmem:[#allocation72_spill] sm:$0xff] %v5120_v16  ;;  %v6061_v55 = vld [vmem:[#allocation46_spill] sm:$0xff]  ;;  %v1603_v20 = vstv %s3635_s16 }
 0x355   : > { %v2225_v34 = vmax.f32 %v5104_v9, %v5108_v31  ;;  %v5124_v21 = vmul.f32 %v5056_v54, %v4923_v50  ;;  %v5128_v33 = vmul.f32 %v5053_v24, %v4844_v11  ;;  %v5132_v4 = vmul.f32 %v5056_v54, %v4864_v32  ;;  %6066 = vst [vmem:[#allocation81_spill] sm:$0xff] %v5166_v1 }
 0x356   : > { %v5140_v52 = vmul.f32 %v5053_v24, %v4959_v48  ;;  %v5144_v22 = vmul.f32 %v5056_v54, %v4969_v39  ;;  %v5152_v63 = vmul.f32 %v5053_v24, %v6061_v55  ;;  %v5174_v46 = vmul.f32 %v5053_v24, %v4941_v51 }
 0x357   : > { %6056 = vst [vmem:[#allocation73_spill] sm:$0xff] %v5124_v21  ;;  %6057 = vst [vmem:[#allocation74_spill] sm:$0xff] %v5128_v33  ;;  %v2175_v37 = vadd.f32 %v5124_v21, %v5120_v16  ;;  %v2166_v13 = vadd.f32 %v5132_v4, %v5128_v33  ;;  %v2240_v28 = vmax.f32 %v5120_v16, %v5124_v21 }
 0x358   : > { %2164 = vadd.xlane.f32.xlu1 %v2163_v15  ;;  %2158 = vadd.xlane.f32.xlu0 %v2157_v57  ;;  %6058 = vst [vmem:[#allocation75_spill] sm:$0xff] %v5132_v4  ;;  %6059 = vst [vmem:[#allocation76_spill] sm:$0xff] %v5140_v52  ;;  %v2231_v59 = vmax.f32 %v5128_v33, %v5132_v4  ;;  %v6063_v15 = vld [vmem:[#allocation48_spill] sm:$0xff]  ;;  %v5178_v36 = vmul.f32 %v5056_v54, %v4955_v61  ;;  %v6078_v61 = vld [vmem:[#allocation33_spill] sm:$0xff]  ;;  %v1567_v33 = vstv %s3631_s9 }
 0x359   : > { %6060 = vst [vmem:[#allocation77_spill] sm:$0xff] %v5144_v22  ;;  %6062 = vst [vmem:[#allocation78_spill] sm:$0xff] %v5152_v63  ;;  %v5156_v57 = vmul.f32 %v5056_v54, %v6063_v15  ;;  %v6088_v15 = vld [vmem:[#allocation43_spill] sm:$0xff] }
 0x35a   : > { %6067 = vst [vmem:[#allocation82_spill] sm:$0xff] %v5174_v46  ;;  %6068 = vst [vmem:[#allocation83_spill] sm:$0xff] %v5178_v36 }
 0x35b   : > { %6064 = vst [vmem:[#allocation79_spill] sm:$0xff] %v5156_v57 }
 0x35c   : > { %2229 = vmax.xlane.f32.xlu1 %v2228_v53  ;;  %2220 = vmax.xlane.f32.xlu0 %v2219_v29  ;;  %v2181_v53 = vadd.f32 %v5144_v22, %v5140_v52  ;;  %v2172_v29 = vadd.f32 %v5156_v57, %v5152_v63 }
 0x360   : > { %2170 = vadd.xlane.f32.xlu1 %v2169_v3  ;;  %2161 = vadd.xlane.f32.xlu0 %v2160_v60  ;;  %v4048_v3 = vpop.eup %4047  ;;  %v5163_v60 = vmul.f32 0.0, %v5053_v24 }
 0x361   : > { %v4050_v19 = vpop.eup %4049 }
 0x362   : > { %6065 = vst [vmem:[#allocation80_spill] sm:$0xff] %v5163_v60 }
 0x364   : > { %2235 = vmax.xlane.f32.xlu1 %v2234_v44  ;;  %2226 = vmax.xlane.f32.xlu0 %v2225_v34  ;;  %v2246_v44 = vmax.f32 %v5140_v52, %v5144_v22  ;;  %v2237_v34 = vmax.f32 %v5152_v63, %v5156_v57  ;;  %v6092_v63 = vld [vmem:[#allocation47_spill] sm:$0xff] }
 0x368   : > { %2176 = vadd.xlane.f32.xlu1 %v2175_v37  ;;  %2167 = vadd.xlane.f32.xlu0 %v2166_v13  ;;  %v2064_v37 = vadd.f32 1.0, %v4048_v3  ;;  %v2065_v13 = vadd.f32 1.0, %v4050_v19  ;;  %v5190_v3 = vmul.f32 %v5053_v24, %v4982_v30  ;;  %v5194_v19 = vmul.f32 %v5056_v54, %v4997_v18 }
 0x36a   : > { %4051 = vrcp.f32 %v2064_v37  ;;  %6069 = vst [vmem:[#allocation84_spill] sm:$0xff] %v5190_v3  ;;  %6070 = vst [vmem:[#allocation85_spill] sm:$0xff] %v5194_v19  ;;  %v2249_v37 = vmax.f32 %v5190_v3, %v5194_v19 }
 0x36b   : > { %4053 = vrcp.f32 %v2065_v13 }
 0x36c   : > { %2241 = vmax.xlane.f32.xlu1 %v2240_v28  ;;  %2232 = vmax.xlane.f32.xlu0 %v2231_v59  ;;  %v2187_v28 = vadd.f32 %v5166_v1, %v5163_v60  ;;  %v2178_v59 = vadd.f32 %v5178_v36, %v5174_v46 }
 0x370   : > { %2182 = vadd.xlane.f32.xlu1 %v2181_v53  ;;  %2173 = vadd.xlane.f32.xlu0 %v2172_v29  ;;  %v2252_v53 = vmax.f32 %v5163_v60, %v5166_v1  ;;  %v2243_v29 = vmax.f32 %v5174_v46, %v5178_v36  ;;  %v6084_v46 = vld [vmem:[#allocation39_spill] sm:$0xff] }
 0x374   : > { %2247 = vmax.xlane.f32.xlu1 %v2246_v44  ;;  %2238 = vmax.xlane.f32.xlu0 %v2237_v34  ;;  %v2184_v44 = vadd.f32 %v5194_v19, %v5190_v3  ;;  %v4052_v34 = vpop.eup %4051  ;;  %v6076_v3 = vld [vmem:[#allocation31_spill] sm:$0xff] }
 0x375   : > { %v4054_v13 = vpop.eup %4053  ;;  %v5201_v24 = vrot.slane %v4052_v34, %v4536_v5  ;;  %v6073_v34 = vld [vmem:[#allocation28_spill] sm:$0xff] }
 0x376   : > { %v5204_v54 = vrot.slane %v4054_v13, %v4536_v5  ;;  %v6074_v13 = vld [vmem:[#allocation29_spill] sm:$0xff] }
 0x377   : > { %v5218_v18 = vmul.f32 %v5201_v24, %v6073_v34  ;;  %v5230_v22 = vmul.f32 %v5201_v24, %v6076_v3  ;;  %v5254_v21 = vmul.f32 %v5201_v24, %v6084_v46  ;;  %v5264_v0 = vmul.f32 %v5201_v24, %v6088_v15 }
 0x378   : > { %2188 = vadd.xlane.f32.xlu1 %v2187_v28  ;;  %2179 = vadd.xlane.f32.xlu0 %v2178_v59  ;;  %v6071_v59 = vld [vmem:[#allocation26_spill] sm:$0xff]  ;;  %v5222_v60 = vmul.f32 %v5204_v54, %v6074_v13  ;;  %v5236_v48 = vmul.f32 %v5204_v54, %v6078_v61 }
 0x379   : > { %6077 = vst [vmem:[#allocation28_spill] sm:$0xff] %v5230_v22  ;;  %6085 = vst [vmem:[#allocation88_spill] sm:$0xff] %v5254_v21 }
 0x37a   : > { %6075 = vst [vmem:[#allocation26_spill] sm:$0xff] %v5222_v60  ;;  %v2270_v30 = vadd.f32 %v5222_v60, %v5218_v18  ;;  %v2334_v39 = vmax.f32 %v5218_v18, %v5222_v60  ;;  %6079 = vst [vmem:[#allocation29_spill] sm:$0xff] %v5236_v48  ;;  %v2273_v52 = vadd.f32 %v5236_v48, %v5230_v22 }
 0x37b   : > { %v2337_v36 = vmax.f32 %v5230_v22, %v5236_v48  ;;  %6089 = vst [vmem:[#allocation90_spill] sm:$0xff] %v5264_v0 }
 0x37c   : > { %2253 = vmax.xlane.f32.xlu1 %v2252_v53  ;;  %2244 = vmax.xlane.f32.xlu0 %v2243_v29  ;;  %v5208_v29 = vmul.f32 %v5201_v24, %v6071_v59 }
 0x380   : > { %2194 = vadd.xlane.f32.xlu1 %v2187_v28  ;;  %2185 = vadd.xlane.f32.xlu0 %v2184_v44  ;;  %v6072_v44 = vld [vmem:[#allocation27_spill] sm:$0xff] }
 0x381   : > { %v5212_v1 = vmul.f32 %v5204_v54, %v6072_v44 }
 0x383   : > { %v2331_v19 = vmax.f32 %v5208_v29, %v5212_v1 }
 0x384   : > { %2259 = vmax.xlane.f32.xlu1 %v2252_v53  ;;  %2250 = vmax.xlane.f32.xlu0 %v2249_v37  ;;  %v2267_v37 = vadd.f32 %v5212_v1, %v5208_v29 }
 0x388   : > { %2200 = vadd.xlane.f32.xlu1 %v2187_v28  ;;  %2191 = vadd.xlane.f32.xlu0 %v2187_v28 }
 0x38c   : > { %2265 = vmax.xlane.f32.xlu1 %v2252_v53  ;;  %2256 = vmax.xlane.f32.xlu0 %v2252_v53 }
 0x390   : > { %2197 = vadd.xlane.f32.xlu0 %v2187_v28  ;;  %2268 = vadd.xlane.f32.xlu1 %v2267_v37  ;;  %v6080_v28 = vld [vmem:[#allocation35_spill] sm:$0xff] }
 0x391   : > { %v5240_v37 = vmul.f32 %v5201_v24, %v6080_v28 }
 0x393   : > { %6081 = vst [vmem:[#allocation86_spill] sm:$0xff] %v5240_v37 }
 0x394   : > { %2262 = vmax.xlane.f32.xlu0 %v2252_v53  ;;  %2271 = vadd.xlane.f32.xlu1 %v2270_v30  ;;  %v6082_v53 = vld [vmem:[#allocation37_spill] sm:$0xff] }
 0x395   : > { %v5244_v30 = vmul.f32 %v5204_v54, %v6082_v53  ;;  %v1587_v53 = vstv %s3633_s14 }
 0x397   : > { %6083 = vst [vmem:[#allocation87_spill] sm:$0xff] %v5244_v30  ;;  %v2276_v51 = vadd.f32 %v5244_v30, %v5240_v37  ;;  %v2340_v50 = vmax.f32 %v5240_v37, %v5244_v30  ;;  %v1593_v30 = vstv %s3634_s10  ;;  %s290_s10 = scalar_lea.vmem %s5839_s7, %s3587_s30 }
 0x398   : > { %2332 = vmax.xlane.f32.xlu0 %v2331_v19  ;;  %2335 = vmax.xlane.f32.xlu1 %v2334_v39  ;;  %v6086_v19 = vld [vmem:[#allocation41_spill] sm:$0xff]  ;;  %v1594_v61 = vmul.f32 %v1593_v30, %v5047_v8 }
 0x399   : > { %v5260_v39 = vmul.f32 %v5204_v54, %v6086_v19  ;;  %v5278_v19 = vmul.f32 %v5201_v24, %v6092_v63 }
 0x39b   : > { %6087 = vst [vmem:[#allocation89_spill] sm:$0xff] %v5260_v39  ;;  %v2279_v16 = vadd.f32 %v5260_v39, %v5254_v21  ;;  %v2343_v57 = vmax.f32 %v5254_v21, %v5260_v39  ;;  %6093 = vst [vmem:[#allocation92_spill] sm:$0xff] %v5278_v19 }
 0x39c   : > { %2274 = vadd.xlane.f32.xlu0 %v2273_v52  ;;  %2277 = vadd.xlane.f32.xlu1 %v2276_v51  ;;  %v6090_v52 = vld [vmem:[#allocation45_spill] sm:$0xff] }
 0x39d   : > { %v5268_v51 = vmul.f32 %v5204_v54, %v6090_v52 }
 0x39f   : > { %6091 = vst [vmem:[#allocation91_spill] sm:$0xff] %v5268_v51  ;;  %v2282_v55 = vadd.f32 %v5268_v51, %v5264_v0  ;;  %v2346_v52 = vmax.f32 %v5264_v0, %v5268_v51  ;;  %v6099_v51 = vld [vmem:[#allocation57_spill] sm:$0xff] }
 0x3a0   : > { %2338 = vmax.xlane.f32.xlu0 %v2337_v36  ;;  %2341 = vmax.xlane.f32.xlu1 %v2340_v50  ;;  %v5284_v50 = vmul.f32 %v5204_v54, %v4916_v12  ;;  %v5288_v36 = vmul.f32 %v5201_v24, %v4920_v58  ;;  %v6097_v58 = vld [vmem:[#allocation55_spill] sm:$0xff]  ;;  %v5307_v0 = vmul.f32 %v5204_v54, %v6099_v51 }
 0x3a2   : > { %6094 = vst [vmem:[#allocation93_spill] sm:$0xff] %v5284_v50  ;;  %6095 = vst [vmem:[#allocation94_spill] sm:$0xff] %v5288_v36  ;;  %v2285_v12 = vadd.f32 %v5284_v50, %v5278_v19 }
 0x3a3   : > { %6100 = vst [vmem:[#allocation97_spill] sm:$0xff] %v5307_v0 }
 0x3a4   : > { %2280 = vadd.xlane.f32.xlu0 %v2279_v16  ;;  %2283 = vadd.xlane.f32.xlu1 %v2282_v55  ;;  %v5292_v16 = vmul.f32 %v5204_v54, %v4930_v27  ;;  %v4017_v55 = vld [vmem:[%s5837_s5 + $0x4] ss:$8 sps:$4 sm:$0xff]   ;;  %v5303_v27 = vmul.f32 %v5201_v24, %v6097_v58 }
 0x3a5   : > { %2525 = vmatprep.mubr.bf16.mxu0 %v4017_v55  ;;  %2734 = vmatprep.mubr.bf16.mxu1 %v4017_v55  ;;  %v6101_v55 = vld [vmem:[#allocation59_spill] sm:$0xff] }
 0x3a6   : > { %6096 = vst [vmem:[#allocation95_spill] sm:$0xff] %v5292_v16  ;;  %v2288_v63 = vadd.f32 %v5292_v16, %v5288_v36  ;;  %6098 = vst [vmem:[#allocation96_spill] sm:$0xff] %v5303_v27  ;;  %v5315_v15 = vmul.f32 %v5201_v24, %v6101_v55  ;;  %v2291_v51 = vadd.f32 %v5307_v0, %v5303_v27  ;;  %v5329_v55 = vmul.f32 0.0, %v5204_v54 }
 0x3a8   : > { %2344 = vmax.xlane.f32.xlu0 %v2343_v57  ;;  %2347 = vmax.xlane.f32.xlu1 %v2346_v52  ;;  %v2349_v57 = vmax.f32 %v5278_v19, %v5284_v50  ;;  %v2352_v52 = vmax.f32 %v5288_v36, %v5292_v16  ;;  %6102 = vst [vmem:[#allocation98_spill] sm:$0xff] %v5315_v15  ;;  %v5326_v16 = vmul.f32 0.0, %v5201_v24  ;;  %6106 = vst [vmem:[#allocation101_spill] sm:$0xff] %v5329_v55  ;;  %v6109_v50 = vld [vmem:[#allocation65_spill] sm:$0xff] }
 0x3aa   : > { %6105 = vst [vmem:[#allocation100_spill] sm:$0xff] %v5326_v16  ;;  %v2300_v19 = vadd.f32 %v5329_v55, %v5326_v16 }
 0x3ac   : > { %2286 = vadd.xlane.f32.xlu0 %v2285_v12  ;;  %2289 = vadd.xlane.f32.xlu1 %v2288_v63  ;;  %v6103_v12 = vld [vmem:[#allocation61_spill] sm:$0xff] }
 0x3ad   : > { %v5319_v63 = vmul.f32 %v5204_v54, %v6103_v12  ;;  %v2355_v12 = vmax.f32 %v5303_v27, %v5307_v0 }
 0x3af   : > { %6104 = vst [vmem:[#allocation99_spill] sm:$0xff] %v5319_v63  ;;  %v2294_v58 = vadd.f32 %v5319_v63, %v5315_v15 }
 0x3b0   : > { %2350 = vmax.xlane.f32.xlu0 %v2349_v57  ;;  %2353 = vmax.xlane.f32.xlu1 %v2352_v52  ;;  %v2358_v57 = vmax.f32 %v5315_v15, %v5319_v63  ;;  %v6107_v52 = vld [vmem:[#allocation63_spill] sm:$0xff] }
 0x3b1   : > { %v5337_v36 = vmul.f32 %v5201_v24, %v6107_v52  ;;  %v2364_v24 = vmax.f32 %v5326_v16, %v5329_v55 }
 0x3b3   : > { %6108 = vst [vmem:[#allocation102_spill] sm:$0xff] %v5337_v36 }
 0x3b4   : > { %2292 = vadd.xlane.f32.xlu0 %v2291_v51  ;;  %2295 = vadd.xlane.f32.xlu1 %v2294_v58  ;;  %v5341_v51 = vmul.f32 %v5204_v54, %v6109_v50 }
 0x3b6   : > { %6110 = vst [vmem:[#allocation103_spill] sm:$0xff] %v5341_v51  ;;  %v2297_v58 = vadd.f32 %v5341_v51, %v5337_v36  ;;  %v2361_v63 = vmax.f32 %v5337_v36, %v5341_v51 }
 0x3b8   : > { %2356 = vmax.xlane.f32.xlu0 %v2355_v12  ;;  %2359 = vmax.xlane.f32.xlu1 %v2358_v57 }
 0x3bc   : > { %2298 = vadd.xlane.f32.xlu0 %v2297_v58  ;;  %2301 = vadd.xlane.f32.xlu1 %v2300_v19 }
 0x3c0   : > { %2362 = vmax.xlane.f32.xlu0 %v2361_v63  ;;  %2365 = vmax.xlane.f32.xlu1 %v2364_v24 }
 0x3c4   : > { %2304 = vadd.xlane.f32.xlu0 %v2300_v19  ;;  %2307 = vadd.xlane.f32.xlu1 %v2300_v19 }
 0x3c8   : > { %2368 = vmax.xlane.f32.xlu0 %v2364_v24  ;;  %2371 = vmax.xlane.f32.xlu1 %v2364_v24 }
 0x3cc   : > { %2310 = vadd.xlane.f32.xlu0 %v2300_v19  ;;  %2313 = vadd.xlane.f32.xlu1 %v2300_v19 }
 0x3d0   : > { %2374 = vmax.xlane.f32.xlu0 %v2364_v24  ;;  %2377 = vmax.xlane.f32.xlu1 %v2364_v24 }
 0x3e1   : > { %v2224_v54 = vpop.xlane.xlu1 %2223  ;;  %v2156_v12 = vpop.xlane.xlu0 %2155  ;;  %1516 = vrot.lane.b32.xlu1 %v5044_v6, %s4244_s21 }
 0x3e2   : > { %v2203_v55 = vmul.f32 0.00390625, %v2156_v12 }
 0x3e5   : > { %v2165_v57 = vpop.xlane.xlu1 %2164  ;;  %v2159_v58 = vpop.xlane.xlu0 %2158  ;;  %1518 = vrot.lane.b32.xlu1 %v5029_v45, %s4244_s21 }
 0x3e6   : > { %1514 = vrot.lane.b32.xlu0 %v5047_v8, %s4244_s21  ;;  %v2204_v63 = vmul.f32 0.00390625, %v2159_v58  ;;  %v2206_v58 = vmul.f32 0.00390625, %v2165_v57 }
 0x3e8   : > { %v2395_v24 = vpack.c.bf16 %v2204_v63, %v2203_v55 }
 0x3e9   : > { %v2230_v50 = vpop.xlane.xlu1 %2229  ;;  %v2221_v16 = vpop.xlane.xlu0 %2220  ;;  %1520 = vrot.lane.b32.xlu1 %v5050_v43, %s4244_s21  ;;  %s4248_s21 = smov 101  }
 0x3ea   : > { %v2403_v19 = vpack.c.bf16 %v2224_v54, %v2221_v16  ;;  %1543 = vrot.lane.b32.xlu0 %v5047_v8, %s4245_s22 }
 0x3ec   : > { %3756 = vmatprep.subr.bf16.mxu0 %v2403_v19 }
 0x3ed   : > { %v2171_v52 = vpop.xlane.xlu1 %2170  ;;  %3757 = vmatpush3.bf16.msra.mxu0 %v2395_v24  ;;  %v2162_v51 = vpop.xlane.xlu0 %2161  ;;  %1545 = vrot.lane.b32.xlu1 %v5044_v6, %s4245_s22 }
 0x3ee   : > { %1547 = vrot.lane.b32.xlu0 %v5029_v45, %s4245_s22  ;;  %v2205_v12 = vmul.f32 0.00390625, %v2162_v51  ;;  %v2208_v24 = vmul.f32 0.00390625, %v2171_v52 }
 0x3f0   : > { %v2396_v54 = vpack.c.bf16 %v2206_v58, %v2205_v12 }
 0x3f1   : > { %v2236_v36 = vpop.xlane.xlu1 %2235  ;;  %v2227_v15 = vpop.xlane.xlu0 %2226  ;;  %1549 = vrot.lane.b32.xlu1 %v5050_v43, %s4245_s22 }
 0x3f2   : > { %v2404_v16 = vpack.c.bf16 %v2230_v50, %v2227_v15 }
 0x3f4   : > { %3758 = vmatprep.subr.bf16.mxu0 %v2404_v16 }
 0x3f5   : > { %v2177_v55 = vpop.xlane.xlu1 %2176  ;;  %3759 = vmatpush3.bf16.msra.mxu0 %v2396_v54  ;;  %v2168_v63 = vpop.xlane.xlu0 %2167 }
 0x3f6   : > { %v2207_v19 = vmul.f32 0.00390625, %v2168_v63  ;;  %v2210_v41 = vmul.f32 0.00390625, %v2177_v55 }
 0x3f8   : > { %v2397_v39 = vpack.c.bf16 %v2208_v24, %v2207_v19 }
 0x3f9   : > { %v2242_v0 = vpop.xlane.xlu1 %2241  ;;  %v2233_v27 = vpop.xlane.xlu0 %2232 }
 0x3fa   : > { %v2405_v46 = vpack.c.bf16 %v2236_v36, %v2233_v27 }
 0x3fc   : > { %3760 = vmatprep.subr.bf16.mxu0 %v2405_v46 }
 0x3fd   : > { %v2183_v51 = vpop.xlane.xlu1 %2182  ;;  %3761 = vmatpush3.bf16.msra.mxu0 %v2397_v39  ;;  %v2174_v57 = vpop.xlane.xlu0 %2173 }
 0x3fe   : > { %v2209_v21 = vmul.f32 0.00390625, %v2174_v57  ;;  %v2212_v52 = vmul.f32 0.00390625, %v2183_v51 }
 0x400   : > { %v2398_v50 = vpack.c.bf16 %v2210_v41, %v2209_v21 }
 0x401   : > { %v2248_v23 = vpop.xlane.xlu1 %2247  ;;  %v2239_v32 = vpop.xlane.xlu0 %2238 }
 0x402   : > { %v2406_v15 = vpack.c.bf16 %v2242_v0, %v2239_v32 }
 0x404   : > { %3762 = vmatprep.subr.bf16.mxu0 %v2406_v15 }
 0x405   : > { %v2189_v12 = vpop.xlane.xlu1 %2188  ;;  %3763 = vmatpush3.bf16.msra.mxu0 %v2398_v50  ;;  %v2180_v58 = vpop.xlane.xlu0 %2179 }
 0x406   : > { %v2211_v16 = vmul.f32 0.00390625, %v2180_v58  ;;  %v2214_v55 = vmul.f32 0.00390625, %v2189_v12 }
 0x408   : > { %v2399_v36 = vpack.c.bf16 %v2212_v52, %v2211_v16 }
 0x409   : > { %v2254_v54 = vpop.xlane.xlu1 %2253  ;;  %v2245_v63 = vpop.xlane.xlu0 %2244 }
 0x40a   : > { %v2407_v27 = vpack.c.bf16 %v2248_v23, %v2245_v63 }
 0x40c   : > { %3764 = vmatprep.subr.bf16.mxu0 %v2407_v27 }
 0x40d   : > { %v2195_v46 = vpop.xlane.xlu1 %2194  ;;  %3765 = vmatpush3.bf16.msra.mxu0 %v2399_v36  ;;  %v2186_v39 = vpop.xlane.xlu0 %2185 }
 0x40e   : > { %v2213_v19 = vmul.f32 0.00390625, %v2186_v39  ;;  %v2216_v51 = vmul.f32 0.00390625, %v2195_v46  ;;  %v5366_v46 = vld [vmem:[%s5837_s5] ss:$8 sps:$4 sm:$0xff]  }
 0x410   : > { %v2400_v0 = vpack.c.bf16 %v2214_v55, %v2213_v19 }
 0x411   : > { %v2260_v24 = vpop.xlane.xlu1 %2259  ;;  %v2251_v57 = vpop.xlane.xlu0 %2250 }
 0x412   : > { %v2408_v32 = vpack.c.bf16 %v2254_v54, %v2251_v57 }
 0x414   : > { %3766 = vmatprep.subr.bf16.mxu0 %v2408_v32 }
 0x415   : > { %v2201_v41 = vpop.xlane.xlu1 %2200  ;;  %3767 = vmatpush3.bf16.msra.mxu0 %v2400_v0  ;;  %v2192_v21 = vpop.xlane.xlu0 %2191  ;;  %v5371_v0 = vld [vmem:[%s5837_s5 + $0x14] ss:$8 sps:$4 sm:$0xff]  }
 0x416   : > { %v2215_v15 = vmul.f32 0.00390625, %v2192_v21  ;;  %v2218_v12 = vmul.f32 0.00390625, %v2201_v41 }
 0x418   : > { %v2401_v16 = vpack.c.bf16 %v2216_v51, %v2215_v15 }
 0x419   : > { %v2266_v50 = vpop.xlane.xlu1 %2265  ;;  %v2257_v58 = vpop.xlane.xlu0 %2256 }
 0x41a   : > { %v2409_v23 = vpack.c.bf16 %v2260_v24, %v2257_v58 }
 0x41c   : > { %3768 = vmatprep.subr.bf16.mxu0 %v2409_v23  ;;  %v5378_v23 = vld [vmem:[%s5837_s5 + $0x10] ss:$8 sps:$4 sm:$0xff]  }
 0x41d   : > { %3769 = vmatpush3.bf16.msra.mxu0 %v2401_v16  ;;  %v2198_v52 = vpop.xlane.xlu0 %2197  ;;  %v2269_v63 = vpop.xlane.xlu1 %2268 }
 0x41e   : > { %v2217_v27 = vmul.f32 0.00390625, %v2198_v52  ;;  %v2315_v57 = vmul.f32 0.00390625, %v2269_v63  ;;  %v5383_v63 = vld [vmem:[%s5837_s5 + $0x24] ss:$8 sps:$4 sm:$0xff]  }
 0x420   : > { %v2402_v19 = vpack.c.bf16 %v2218_v12, %v2217_v27 }
 0x421   : > { %v2263_v36 = vpop.xlane.xlu0 %2262  ;;  %v2272_v39 = vpop.xlane.xlu1 %2271 }
 0x422   : > { %v2410_v54 = vpack.c.bf16 %v2266_v50, %v2263_v36  ;;  %v2316_v55 = vmul.f32 0.00390625, %v2272_v39 }
 0x424   : > { %3770 = vmatprep.subr.bf16.mxu0 %v2410_v54  ;;  %v2686_v21 = vpack.c.bf16 %v2316_v55, %v2315_v57  ;;  %v5390_v55 = vld [vmem:[%s5837_s5 + $0x20] ss:$8 sps:$4 sm:$0xff]  }
 0x425   : > { %3771 = vmatpush3.bf16.msra.mxu0 %v2402_v19  ;;  %v2333_v24 = vpop.xlane.xlu0 %2332  ;;  %v2336_v32 = vpop.xlane.xlu1 %2335 }
 0x426   : > { %v2694_v41 = vpack.c.bf16 %v2336_v32, %v2333_v24  ;;  %v5395_v32 = vld [vmem:[%s5837_s5 + $0x34] ss:$8 sps:$4 sm:$0xff]  }
 0x428   : > { %2526 = vmatmul.mubr.bf16.vlgmr.msra.gmra.mrb[48].mxu0 %v5366_v46  ;;  %3820 = vmatprep.subr.bf16.mxu1 %v2694_v41 }
 0x429   : > { %v2275_v15 = vpop.xlane.xlu0 %2274  ;;  %3821 = vmatpush3.bf16.msra.mxu1 %v2686_v21  ;;  %v2278_v51 = vpop.xlane.xlu1 %2277  ;;  %2533 = vmatprep.mubr.bf16.mxu0 %v5371_v0 }
 0x42a   : > { %v2317_v50 = vmul.f32 0.00390625, %v2275_v15  ;;  %v2318_v58 = vmul.f32 0.00390625, %v2278_v51 }
 0x42c   : > { %v2687_v12 = vpack.c.bf16 %v2318_v58, %v2317_v50 }
 0x42d   : > { %v2339_v16 = vpop.xlane.xlu0 %2338  ;;  %v2342_v52 = vpop.xlane.xlu1 %2341 }
 0x42e   : > { %v2695_v27 = vpack.c.bf16 %v2342_v52, %v2339_v16  ;;  %v5402_v16 = vld [vmem:[%s5837_s5 + $0x30] ss:$8 sps:$4 sm:$0xff]  }
 0x430   : > { %3822 = vmatprep.subr.bf16.mxu1 %v2695_v27  ;;  %2534 = vmatmul.mubr.bf16.gmra.mrb[52].mxu0 %v5378_v23 }
 0x431   : > { %v2281_v36 = vpop.xlane.xlu0 %2280  ;;  %3823 = vmatpush3.bf16.msra.mxu1 %v2687_v12  ;;  %v2284_v39 = vpop.xlane.xlu1 %2283  ;;  %2541 = vmatprep.mubr.bf16.mxu0 %v5383_v63  ;;  %v5407_v12 = vld [vmem:[%s5837_s5 + $0x44] ss:$8 sps:$4 sm:$0xff]  }
 0x432   : > { %v2319_v54 = vmul.f32 0.00390625, %v2281_v36  ;;  %v2320_v19 = vmul.f32 0.00390625, %v2284_v39 }
 0x434   : > { %v2688_v21 = vpack.c.bf16 %v2320_v19, %v2319_v54 }
 0x435   : > { %v2345_v57 = vpop.xlane.xlu0 %2344  ;;  %v2348_v24 = vpop.xlane.xlu1 %2347 }
 0x436   : > { %v2696_v41 = vpack.c.bf16 %v2348_v24, %v2345_v57 }
 0x438   : > { %3824 = vmatprep.subr.bf16.mxu1 %v2696_v41  ;;  %2542 = vmatmul.mubr.bf16.gmra.mrb[56].mxu0 %v5390_v55  ;;  %v5414_v41 = vld [vmem:[%s5837_s5 + $0x40] ss:$8 sps:$4 sm:$0xff]  }
 0x439   : > { %v2287_v15 = vpop.xlane.xlu0 %2286  ;;  %3825 = vmatpush3.bf16.msra.mxu1 %v2688_v21  ;;  %v2290_v51 = vpop.xlane.xlu1 %2289  ;;  %2549 = vmatprep.mubr.bf16.mxu0 %v5395_v32 }
 0x43a   : > { %v2321_v50 = vmul.f32 0.00390625, %v2287_v15  ;;  %v2322_v58 = vmul.f32 0.00390625, %v2290_v51  ;;  %v5419_v51 = vld [vmem:[%s5837_s5 + $0x54] ss:$8 sps:$4 sm:$0xff]  }
 0x43c   : > { %v2689_v39 = vpack.c.bf16 %v2322_v58, %v2321_v50 }
 0x43d   : > { %v2351_v52 = vpop.xlane.xlu0 %2350  ;;  %v2354_v27 = vpop.xlane.xlu1 %2353 }
 0x43e   : > { %v2697_v36 = vpack.c.bf16 %v2354_v27, %v2351_v52 }
 0x440   : > { %3826 = vmatprep.subr.bf16.mxu1 %v2697_v36  ;;  %2550 = vmatmul.mubr.bf16.gmra.mrb[60].mxu0 %v5402_v16 }
 0x441   : > { %v2293_v54 = vpop.xlane.xlu0 %2292  ;;  %3827 = vmatpush3.bf16.msra.mxu1 %v2689_v39  ;;  %v2296_v19 = vpop.xlane.xlu1 %2295  ;;  %2557 = vmatprep.mubr.bf16.mxu0 %v5407_v12 }
 0x442   : > { %v2323_v57 = vmul.f32 0.00390625, %v2293_v54  ;;  %v2324_v24 = vmul.f32 0.00390625, %v2296_v19  ;;  %v5426_v54 = vld [vmem:[%s5837_s5 + $0x50] ss:$8 sps:$4 sm:$0xff]  }
 0x444   : > { %v2690_v58 = vpack.c.bf16 %v2324_v24, %v2323_v57  ;;  %v5431_v57 = vld [vmem:[%s5837_s5 + $0x64] ss:$8 sps:$4 sm:$0xff]  }
 0x445   : > { %v2357_v21 = vpop.xlane.xlu0 %2356  ;;  %v2360_v15 = vpop.xlane.xlu1 %2359 }
 0x446   : > { %v2698_v50 = vpack.c.bf16 %v2360_v15, %v2357_v21 }
 0x448   : > { %3828 = vmatprep.subr.bf16.mxu1 %v2698_v50  ;;  %2558 = vmatmul.mubr.bf16.gmra.mrb[64].mxu0 %v5414_v41 }
 0x449   : > { %v2299_v52 = vpop.xlane.xlu0 %2298  ;;  %3829 = vmatpush3.bf16.msra.mxu1 %v2690_v58  ;;  %v2302_v27 = vpop.xlane.xlu1 %2301  ;;  %2565 = vmatprep.mubr.bf16.mxu0 %v5419_v51 }
 0x44a   : > { %v2325_v36 = vmul.f32 0.00390625, %v2299_v52  ;;  %v2326_v39 = vmul.f32 0.00390625, %v2302_v27  ;;  %v5438_v27 = vld [vmem:[%s5837_s5 + $0x60] ss:$8 sps:$4 sm:$0xff]  }
 0x44c   : > { %v2691_v21 = vpack.c.bf16 %v2326_v39, %v2325_v36 }
 0x44d   : > { %v2363_v19 = vpop.xlane.xlu0 %2362  ;;  %v2366_v47 = vpop.xlane.xlu1 %2365 }
 0x44e   : > { %v2699_v24 = vpack.c.bf16 %v2366_v47, %v2363_v19  ;;  %v5443_v47 = vld [vmem:[%s5837_s5 + $0x74] ss:$8 sps:$4 sm:$0xff]  }
 0x450   : > { %3830 = vmatprep.subr.bf16.mxu1 %v2699_v24  ;;  %2566 = vmatmul.mubr.bf16.gmra.mrb[68].mxu0 %v5426_v54 }
 0x451   : > { %v2305_v15 = vpop.xlane.xlu0 %2304  ;;  %3831 = vmatpush3.bf16.msra.mxu1 %v2691_v21  ;;  %v2308_v50 = vpop.xlane.xlu1 %2307  ;;  %2573 = vmatprep.mubr.bf16.mxu0 %v5431_v57 }
 0x452   : > { %v2327_v58 = vmul.f32 0.00390625, %v2305_v15  ;;  %v2328_v52 = vmul.f32 0.00390625, %v2308_v50  ;;  %v5450_v50 = vld [vmem:[%s5837_s5 + $0x70] ss:$8 sps:$4 sm:$0xff]  }
 0x454   : > { %v2692_v39 = vpack.c.bf16 %v2328_v52, %v2327_v58  ;;  %v6111_v58 = vlaneseq }
 0x455   : > { %v2369_v10 = vpop.xlane.xlu0 %2368  ;;  %v2372_v11 = vpop.xlane.xlu1 %2371 }
 0x456   : > { %v2700_v36 = vpack.c.bf16 %v2372_v11, %v2369_v10  ;;  %v5453_v52 = vand.u32 127, %v6111_v58  ;;  %v1568_v58 = vmul.f32 %v1567_v33, %v5047_v8 }
 0x458   : > { %3832 = vmatprep.subr.bf16.mxu1 %v2700_v36  ;;  %2574 = vmatmul.mubr.bf16.gmra.mrb[72].mxu0 %v5438_v27  ;;  %vm1522_vm10 = vcmp.lt.s32.totalorder %v5453_v52, 1  ;;  %vm1502_vm11 = vcmp.eq.s32.totalorder %v5453_v52, 0  ;;  %vm1551_vm13 = vcmp.lt.s32.totalorder %v5453_v52, 127  ;;  %v1501_v38 = vadd.s32 384, %v5453_v52 }
 0x459   : > { %v2311_v19 = vpop.xlane.xlu0 %2310  ;;  %3833 = vmatpush3.bf16.msra.mxu1 %v2692_v39  ;;  %v2314_v24 = vpop.xlane.xlu1 %2313  ;;  %2581 = vmatprep.mubr.bf16.mxu0 %v5443_v47  ;;  %v1500_v39 = vadd.s32 256, %v5453_v52 }
 0x45a   : > { %v2329_v21 = vmul.f32 0.00390625, %v2311_v19  ;;  %v2330_v15 = vmul.f32 0.00390625, %v2314_v24  ;;  %vm1538_vm14 = vcmp.eq.s32.totalorder %v1501_v38, 511 }
 0x45b   : > { %vm1508_vm9 = vcmp.eq.s32.totalorder %v1500_v39, 256 }
 0x45c   : > { %v2693_v36 = vpack.c.bf16 %v2330_v15, %v2329_v21  ;;  %v1499_v21 = vadd.s32 128, %v5453_v52  ;;  %v1570_v15 = vmul.f32 %v1567_v33, %v5029_v45 }
 0x45d   : > { %v2375_v4 = vpop.xlane.xlu0 %2374  ;;  %v2378_v11 = vpop.xlane.xlu1 %2377 }
 0x45e   : > { %v2701_v10 = vpack.c.bf16 %v2378_v11, %v2375_v4  ;;  %v1596_v11 = vmul.f32 %v1593_v30, %v5029_v45  ;;  %vm1532_vm12 = vcmp.eq.s32.totalorder %v1499_v21, 255 }
 0x460   : > { %3834 = vmatprep.subr.bf16.mxu1 %v2701_v10  ;;  %2582 = vmatmul.mubr.bf16.gmra.mrb[76].mxu0 %v5450_v50 }
 0x461   : > { %3835 = vmatpush3.bf16.msra.mxu1 %v2693_v36  ;;  %v1517_v19 = vpop.permute.xlu1 %1516  ;;  %v1515_v24 = vpop.permute.xlu0 %1514  ;;  %v1561_v36 = vstv %s1560_s13 }
 0x462   : > { %v1525_v45 = vsel %vm1522_vm10, %v1515_v24, %v1517_v19 }
 0x463   : > { %v1563_v62 = vmul.f32 %v1561_v36, %v1525_v45  ;;  %v1589_v35 = vmul.f32 %v1587_v53, %v1525_v45 }
 0x464   : > { %2735 = vmatmul.mubr.bf16.vlgmr.msra.gmra.mrb[48].mxu1 %v5366_v46 }
 0x465   : > { %v1519_v4 = vpop.permute.xlu1 %1518  ;;  %2742 = vmatprep.mubr.bf16.mxu1 %v5371_v0  ;;  %v1544_v39 = vpop.permute.xlu0 %1543  ;;  %v1569_v0 = vmul.f32 %v1567_v33, %v5044_v6 }
 0x466   : > { %v1524_v10 = vsel %vm1522_vm10, %v1517_v19, %v1519_v4 }
 0x467   : > { %v1529_v46 = vsel %vm1508_vm9, 0.0, %v1524_v10 }
 0x468   : > { %v1564_v37 = vmul.f32 %v1561_v36, %v1529_v46  ;;  %v1590_v28 = vmul.f32 %v1587_v53, %v1529_v46 }
 0x469   : > { %v1521_v3 = vpop.permute.xlu1 %1520 }
 0x46a   : > { %v1574_v48 = vadd.f32 %v1570_v15, %v1564_v37  ;;  %v1600_v22 = vadd.f32 %v1596_v11, %v1590_v28  ;;  %v1523_v10 = vsel %vm1522_vm10, %v1519_v4, %v1521_v3  ;;  %v1526_v8 = vsel %vm1522_vm10, %v1521_v3, %v1515_v24  ;;  %v1548_v11 = vpop.permute.xlu0 %1547 }
 0x46b   : > { %v1527_v46 = vsel %vm1502_vm11, 0.0, %v1526_v8  ;;  %v1595_v37 = vmul.f32 %v1593_v30, %v5044_v6  ;;  %v1571_v28 = vmul.f32 %v1567_v33, %v5050_v43  ;;  %v1597_v4 = vmul.f32 %v1593_v30, %v5050_v43 }
 0x46c   : > { %v1562_v19 = vmul.f32 %v1561_v36, %v1527_v46  ;;  %v1588_v49 = vmul.f32 %v1587_v53, %v1527_v46  ;;  %2743 = vmatmul.mubr.bf16.gmra.mrb[52].mxu1 %v5378_v23  ;;  %v1565_v15 = vmul.f32 %v1561_v36, %v1523_v10  ;;  %v1573_v33 = vadd.f32 %v1569_v0, %v1563_v62 }
 0x46d   : > { %v1546_v3 = vpop.permute.xlu1 %1545  ;;  %2750 = vmatprep.mubr.bf16.mxu1 %v5383_v63  ;;  %v1599_v43 = vadd.f32 %v1595_v37, %v1589_v35  ;;  %v1591_v44 = vmul.f32 %v1587_v53, %v1523_v10 }
 0x46e   : > { %v1572_v24 = vadd.f32 %v1568_v58, %v1562_v19  ;;  %v1598_v8 = vadd.f32 %v1594_v61, %v1588_v49  ;;  %v1553_v45 = vsel %vm1551_vm13, %v1546_v3, %v1548_v11  ;;  %v1554_v46 = vsel %vm1551_vm13, %v1544_v39, %v1546_v3 }
 0x46f   : > { %v1557_v23 = vsel %vm1532_vm12, 0.0, %v1553_v45  ;;  %v1578_v6 = vmul.f32 %v1577_v7, %v1554_v46  ;;  %v1604_v31 = vmul.f32 %v1603_v20, %v1554_v46  ;;  %v1575_v9 = vadd.f32 %v1571_v28, %v1565_v15 }
 0x470   : > { %v1579_v30 = vmul.f32 %v1577_v7, %v1557_v23  ;;  %v1605_v36 = vmul.f32 %v1603_v20, %v1557_v23 }
 0x471   : > { %v1582_v63 = vadd.f32 %v1578_v6, %v1572_v24  ;;  %v1608_v58 = vadd.f32 %v1604_v31, %v1598_v8  ;;  %v1550_v49 = vpop.permute.xlu1 %1549  ;;  %v1601_v31 = vadd.f32 %v1597_v4, %v1591_v44 }
 0x472   : > { %v1583_v61 = vadd.f32 %v1579_v30, %v1573_v33  ;;  %v1609_v19 = vadd.f32 %v1605_v36, %v1599_v43  ;;  %v1552_v60 = vsel %vm1551_vm13, %v1548_v11, %v1550_v49  ;;  %v1555_v21 = vsel %vm1551_vm13, %v1550_v49, %v1544_v39 }
 0x473   : > { %v3636_v3 = vmul.f32 -1.442695, %v1582_v63  ;;  %v3640_v45 = vmul.f32 -1.442695, %v1608_v58  ;;  %v1559_v62 = vsel %vm1538_vm14, 0.0, %v1555_v21  ;;  %v1580_v35 = vmul.f32 %v1577_v7, %v1552_v60 }
 0x474   : > { %v3637_v0 = vmul.f32 -1.442695, %v1583_v61  ;;  %v3641_v37 = vmul.f32 -1.442695, %v1609_v19  ;;  %v1581_v28 = vmul.f32 %v1577_v7, %v1559_v62  ;;  %v1606_v53 = vmul.f32 %v1603_v20, %v1552_v60  ;;  %2751 = vmatmul.mubr.bf16.gmra.mrb[56].mxu1 %v5390_v55 }
 0x475   : > { %4055 = vpow2.f32 %v3636_v3  ;;  %v1584_v10 = vadd.f32 %v1580_v35, %v1574_v48  ;;  %v1607_v15 = vmul.f32 %v1603_v20, %v1559_v62  ;;  %2758 = vmatprep.mubr.bf16.mxu1 %v5395_v32 }
 0x476   : > { %4057 = vpow2.f32 %v3637_v0  ;;  %v1585_v52 = vadd.f32 %v1581_v28, %v1575_v9  ;;  %v1610_v39 = vadd.f32 %v1606_v53, %v1600_v22  ;;  %v6112_v53 = vld [vmem:[#allocation10_spill] sm:$0xff] }
 0x477   : > { %4059 = vpow2.f32 %v3640_v45  ;;  %v1611_v11 = vadd.f32 %v1607_v15, %v1601_v31  ;;  %v3638_v38 = vmul.f32 -1.442695, %v1584_v10  ;;  %v6113_v10 = vld [vmem:[#allocation12_spill] sm:$0xff] }
 0x478   : > { %4061 = vpow2.f32 %v3641_v37  ;;  %v3639_v24 = vmul.f32 -1.442695, %v1585_v52  ;;  %v3642_v8 = vmul.f32 -1.442695, %v1610_v39  ;;  %v6114_v39 = vld [vmem:[#allocation11_spill] sm:$0xff] }
 0x479   : > { %4063 = vpow2.f32 %v3638_v38  ;;  %v3643_v7 = vmul.f32 -1.442695, %v1611_v11  ;;  %v6115_v11 = vld [vmem:[#allocation13_spill] sm:$0xff] }
 0x47a   : > { %4065 = vpow2.f32 %v3639_v24 }
 0x47b   : > { %4067 = vpow2.f32 %v3642_v8 }
 0x47c   : > { %4069 = vpow2.f32 %v3643_v7  ;;  %2759 = vmatmul.mubr.bf16.gmra.mrb[60].mxu1 %v5402_v16  ;;  %v5533_v7 = vstv %s3680_s17 }
 0x47d   : > { %2766 = vmatprep.mubr.bf16.mxu1 %v5407_v12 }
 0x47f   : > { %v4056_v20 = vpop.eup %4055 }
 0x480   : > { %v4058_v48 = vpop.eup %4057  ;;  %v1624_v22 = vadd.f32 1.0, %v4056_v20 }
 0x481   : > { %v4060_v60 = vpop.eup %4059  ;;  %v1625_v32 = vadd.f32 1.0, %v4058_v48 }
 0x482   : > { %v4062_v9 = vpop.eup %4061  ;;  %v1648_v44 = vadd.f32 1.0, %v4060_v60 }
 0x483   : > { %v4064_v55 = vpop.eup %4063  ;;  %v1649_v4 = vadd.f32 1.0, %v4062_v9 }
 0x484   : > { %v4066_v46 = vpop.eup %4065  ;;  %4071 = vrcp.f32 %v1648_v44  ;;  %2767 = vmatmul.mubr.bf16.gmra.mrb[64].mxu1 %v5414_v41  ;;  %v1626_v12 = vadd.f32 1.0, %v4064_v55 }
 0x485   : > { %v4068_v23 = vpop.eup %4067  ;;  %4073 = vrcp.f32 %v1649_v4  ;;  %2774 = vmatprep.mubr.bf16.mxu1 %v5419_v51  ;;  %v1627_v33 = vadd.f32 1.0, %v4066_v46 }
 0x486   : > { %v4070_v16 = vpop.eup %4069  ;;  %4075 = vrcp.f32 %v1624_v22  ;;  %v1650_v6 = vadd.f32 1.0, %v4068_v23 }
 0x487   : > { %4077 = vrcp.f32 %v1625_v32  ;;  %v1651_v43 = vadd.f32 1.0, %v4070_v16 }
 0x488   : > { %4079 = vrcp.f32 %v1650_v6 }
 0x489   : > { %4081 = vrcp.f32 %v1651_v43 }
 0x48a   : > { %4083 = vrcp.f32 %v1626_v12 }
 0x48b   : > { %4085 = vrcp.f32 %v1627_v33 }
 0x48c   : > { %2775 = vmatmul.mubr.bf16.gmra.mrb[68].mxu1 %v5426_v54 }
 0x48d   : > { %2782 = vmatprep.mubr.bf16.mxu1 %v5431_v57 }
 0x48e   : > { %v5500_v41 = vpop.eup %4071 }
 0x48f   : > { %v5502_v30 = vpop.eup %4073  ;;  %v1664_v51 = vrot.slane %v5500_v41, 1 }
 0x490   : > { %v4076_v36 = vpop.eup %4075  ;;  %v1665_v63 = vrot.slane %v5502_v30, 1 }
 0x491   : > { %v4078_v58 = vpop.eup %4077  ;;  %v5506_v49 = vadd.f32 %v4076_v36, %v1664_v51 }
 0x492   : > { %v5508_v61 = vpop.eup %4079  ;;  %v1673_v19 = vadd.f32 %v4078_v58, %v1665_v63 }
 0x493   : > { %v5510_v21 = vpop.eup %4081  ;;  %v1666_v54 = vrot.slane %v5508_v61, 1 }
 0x494   : > { %v4084_v57 = vpop.eup %4083  ;;  %v1677_v3 = vadd.f32 1.0, %v1673_v19  ;;  %v1667_v45 = vrot.slane %v5510_v21, 1  ;;  %2783 = vmatmul.mubr.bf16.gmra.mrb[72].mxu1 %v5438_v27 }
 0x495   : > { %v4086_v62 = vpop.eup %4085  ;;  %v5515_v35 = vadd.f32 %v4084_v57, %v1666_v54  ;;  %2790 = vmatprep.mubr.bf16.mxu1 %v5443_v47 }
 0x496   : > { %v5519_v0 = vrot.slane %v1677_v3, %v4536_v5  ;;  %v1675_v37 = vadd.f32 %v4086_v62, %v1667_v45 }
 0x498   : > { %v1679_v28 = vadd.f32 1.0, %v1675_v37  ;;  %v1697_v31 = vmul.f32 %v5519_v0, %v6112_v53  ;;  %v1701_v15 = vmul.f32 %v5519_v0, %v6113_v10 }
 0x49a   : > { %v5526_v52 = vrot.slane %v1679_v28, %v4536_v5  ;;  %v3268_v27 = vpack.c.bf16 %v1701_v15, %v1697_v31 }
 0x49c   : > { %3327 = vmatprep.mubr.bf16.mxu0 %v3268_v27  ;;  %2791 = vmatmul.mubr.bf16.gmra.mrb[76].mxu1 %v5450_v50  ;;  %v1699_v47 = vmul.f32 %v5526_v52, %v6114_v39  ;;  %v1703_v38 = vmul.f32 %v5526_v52, %v6115_v11 }
 0x49e   : > { %v3270_v24 = vpack.c.bf16 %v1703_v38, %v1699_v47 }
 0x4a0   : > { %3399 = vmatprep.mubr.bf16.mxu1 %v3270_v24 }
 0x4fb   : > { %v3772_v8 = vpop.f32.mrb[48].mxu0 }
 0x4fc   : > { %v3773_v20 = vpop.f32.mrb[49].mxu0 }
 0x4fd   : > { %v3774_v48 = vadd.f32 %v3773_v20, %v3772_v8  ;;  %v3775_v60 = vpop.f32.mrb[50].mxu0 }
 0x4fe   : > { %v3776_v9 = vpop.f32.mrb[51].mxu0 }
 0x4ff   : > { %v2528_v22 = vadd.f32 %v3774_v48, %v5533_v7  ;;  %v3777_v44 = vadd.f32 %v3776_v9, %v3775_v60 }
 0x501   : > { %v3697_v50 = vmul.f32 -1.442695, %v2528_v22  ;;  %v2531_v55 = vadd.f32 %v3777_v44, %v5533_v7 }
 0x503   : > { %4087 = vpow2.f32 %v3697_v50  ;;  %v3698_v32 = vmul.f32 -1.442695, %v2531_v55  ;;  %v3778_v4 = vpop.f32.mrb[52].mxu0 }
 0x504   : > { %v3779_v46 = vpop.f32.mrb[53].mxu0 }
 0x505   : > { %4089 = vpow2.f32 %v3698_v32  ;;  %v3780_v23 = vadd.f32 %v3779_v46, %v3778_v4  ;;  %v3781_v16 = vpop.f32.mrb[54].mxu0 }
 0x506   : > { %v3782_v12 = vpop.f32.mrb[55].mxu0 }
 0x507   : > { %v3783_v6 = vadd.f32 %v3782_v12, %v3781_v16  ;;  %v2536_v12 = vadd.f32 %v3780_v23, %v5533_v7 }
 0x50b   : > { %v3784_v33 = vpop.f32.mrb[56].mxu0 }
 0x50c   : > { %v3785_v43 = vpop.f32.mrb[57].mxu0 }
 0x50d   : > { %v4088_v51 = vpop.eup %4087  ;;  %v3786_v36 = vadd.f32 %v3785_v43, %v3784_v33  ;;  %v3787_v63 = vpop.f32.mrb[58].mxu0 }
 0x50e   : > { %v2638_v58 = vadd.f32 1.0, %v4088_v51  ;;  %v3788_v19 = vpop.f32.mrb[59].mxu0 }
 0x50f   : > { %v4090_v54 = vpop.eup %4089  ;;  %v3789_v57 = vadd.f32 %v3788_v19, %v3787_v63 }
 0x510   : > { %4091 = vrcp.f32 %v2638_v58  ;;  %v2639_v3 = vadd.f32 1.0, %v4090_v54 }
 0x512   : > { %4093 = vrcp.f32 %v2639_v3  ;;  %v3699_v3 = vmul.f32 -1.442695, %v2536_v12 }
 0x513   : > { %v3790_v45 = vpop.f32.mrb[60].mxu0 }
 0x514   : > { %v3791_v62 = vpop.f32.mrb[61].mxu0  ;;  %4095 = vpow2.f32 %v3699_v3 }
 0x515   : > { %v3792_v37 = vadd.f32 %v3791_v62, %v3790_v45  ;;  %v3793_v28 = vpop.f32.mrb[62].mxu0  ;;  %v2539_v45 = vadd.f32 %v3783_v6, %v5533_v7  ;;  %v2547_v6 = vadd.f32 %v3789_v57, %v5533_v7 }
 0x516   : > { %v3794_v53 = vpop.f32.mrb[63].mxu0 }
 0x517   : > { %v5537_v31 = vadd.f32 %v3794_v53, %v3793_v28  ;;  %v3700_v23 = vmul.f32 -1.442695, %v2539_v45 }
 0x519   : > { %v2555_v3 = vadd.f32 %v5537_v31, %v5533_v7 }
 0x51a   : > { %v4092_v10 = vpop.eup %4091 }
 0x51b   : > { %2901 = vperm.xlu0 %3914, %v4092_v10   ;;  %v3796_v15 = vpop.f32.mrb[64].mxu0 }
 0x51c   : > { %v4094_v27 = vpop.eup %4093  ;;  %v3797_v39 = vpop.f32.mrb[65].mxu0 }
 0x51d   : > { %2906 = vperm.xlu1 %3915, %v4094_v27   ;;  %v5539_v47 = vadd.f32 %v3797_v39, %v3796_v15  ;;  %v3799_v11 = vpop.f32.mrb[66].mxu0  ;;  %v2544_v27 = vadd.f32 %v3786_v36, %v5533_v7  ;;  %v2552_v36 = vadd.f32 %v3792_v37, %v5533_v7 }
 0x51e   : > { %v3800_v38 = vpop.f32.mrb[67].mxu0 }
 0x51f   : > { %v5541_v24 = vadd.f32 %v3800_v38, %v3799_v11 }
 0x523   : > { %v3802_v8 = vpop.f32.mrb[68].mxu0 }
 0x524   : > { %v3803_v20 = vpop.f32.mrb[69].mxu0 }
 0x525   : > { %v5543_v48 = vadd.f32 %v3803_v20, %v3802_v8  ;;  %v3805_v60 = vpop.f32.mrb[70].mxu0 }
 0x526   : > { %v3806_v9 = vpop.f32.mrb[71].mxu0 }
 0x527   : > { %v5545_v22 = vadd.f32 %v3806_v9, %v3805_v60  ;;  %v3701_v60 = vmul.f32 -1.442695, %v2544_v27 }
 0x52b   : > { %v3808_v44 = vpop.f32.mrb[72].mxu0 }
 0x52c   : > { %v3809_v50 = vpop.f32.mrb[73].mxu0 }
 0x52d   : > { %v5547_v55 = vadd.f32 %v3809_v50, %v3808_v44  ;;  %v3811_v32 = vpop.f32.mrb[74].mxu0 }
 0x52e   : > { %v3812_v4 = vpop.f32.mrb[75].mxu0 }
 0x52f   : > { %v5549_v46 = vadd.f32 %v3812_v4, %v3811_v32 }
 0x533   : > { %v3814_v16 = vpop.f32.mrb[76].mxu0 }
 0x534   : > { %v3815_v33 = vpop.f32.mrb[77].mxu0 }
 0x535   : > { %v5552_v43 = vadd.f32 %v3815_v33, %v3814_v16  ;;  %v3817_v51 = vpop.f32.mrb[78].mxu0  ;;  %v3702_v16 = vmul.f32 -1.442695, %v2547_v6 }
 0x536   : > { %v3818_v63 = vpop.f32.mrb[79].mxu0 }
 0x537   : > { %v3836_v58 = vpop.f32.mrb[48].mxu1  ;;  %v5554_v19 = vadd.f32 %v3818_v63, %v3817_v51  ;;  %v4096_v51 = vpop.eup %4095 }
 0x538   : > { %v3837_v54 = vpop.f32.mrb[49].mxu1 }
 0x539   : > { %v3838_v62 = vadd.f32 %v3837_v54, %v3836_v58  ;;  %v3839_v28 = vpop.f32.mrb[50].mxu1  ;;  %v3703_v54 = vmul.f32 -1.442695, %v2552_v36 }
 0x53a   : > { %v3840_v53 = vpop.f32.mrb[51].mxu1 }
 0x53b   : > { %v2737_v10 = vadd.f32 %v3838_v62, %v5533_v7  ;;  %v3841_v15 = vadd.f32 %v3840_v53, %v3839_v28  ;;  %v2640_v62 = vadd.f32 1.0, %v4096_v51 }
 0x53d   : > { %v3713_v39 = vmul.f32 -1.442695, %v2737_v10  ;;  %v2740_v11 = vadd.f32 %v3841_v15, %v5533_v7 }
 0x53f   : > { %4097 = vpow2.f32 %v3713_v39  ;;  %v3714_v38 = vmul.f32 -1.442695, %v2740_v11  ;;  %v3842_v8 = vpop.f32.mrb[52].mxu1  ;;  %v2560_v11 = vadd.f32 %v5539_v47, %v5533_v7 }
 0x540   : > { %4099 = vpow2.f32 %v3700_v23  ;;  %v3843_v20 = vpop.f32.mrb[53].mxu1 }
 0x541   : > { %4101 = vpow2.f32 %v3714_v38  ;;  %v3844_v9 = vadd.f32 %v3843_v20, %v3842_v8  ;;  %v3845_v44 = vpop.f32.mrb[54].mxu1  ;;  %v3704_v8 = vmul.f32 -1.442695, %v2555_v3  ;;  %v2568_v3 = vadd.f32 %v5543_v48, %v5533_v7 }
 0x542   : > { %v3846_v50 = vpop.f32.mrb[55].mxu1  ;;  %4103 = vpow2.f32 %v3701_v60 }
 0x543   : > { %v2745_v32 = vadd.f32 %v3844_v9, %v5533_v7  ;;  %v3847_v4 = vadd.f32 %v3846_v50, %v3845_v44  ;;  %v3705_v50 = vmul.f32 -1.442695, %v2560_v11 }
 0x545   : > { %v3715_v12 = vmul.f32 -1.442695, %v2745_v32  ;;  %v2748_v33 = vadd.f32 %v3847_v4, %v5533_v7  ;;  %v2563_v4 = vadd.f32 %v5541_v24, %v5533_v7 }
 0x547   : > { %4105 = vpow2.f32 %v3715_v12  ;;  %v3716_v63 = vmul.f32 -1.442695, %v2748_v33  ;;  %v3848_v58 = vpop.f32.mrb[56].mxu1  ;;  %v3706_v24 = vmul.f32 -1.442695, %v2563_v4 }
 0x548   : > { %4107 = vpow2.f32 %v3702_v16  ;;  %v3849_v57 = vpop.f32.mrb[57].mxu1 }
 0x549   : > { %v4098_v45 = vpop.eup %4097  ;;  %4109 = vpow2.f32 %v3716_v63  ;;  %v3850_v28 = vadd.f32 %v3849_v57, %v3848_v58  ;;  %v3851_v37 = vpop.f32.mrb[58].mxu1 }
 0x54a   : > { %v4100_v53 = vpop.eup %4099  ;;  %v2847_v10 = vadd.f32 1.0, %v4098_v45  ;;  %v3852_v15 = vpop.f32.mrb[59].mxu1  ;;  %4111 = vpow2.f32 %v3703_v54 }
 0x54b   : > { %v4102_v23 = vpop.eup %4101  ;;  %v2753_v27 = vadd.f32 %v3850_v28, %v5533_v7  ;;  %v3853_v39 = vadd.f32 %v3852_v15, %v3851_v37  ;;  %v2641_v6 = vadd.f32 1.0, %v4100_v53 }
 0x54c   : > { %4113 = vrcp.f32 %v2847_v10  ;;  %v2848_v38 = vadd.f32 1.0, %v4102_v23  ;;  %v4104_v60 = vpop.eup %4103 }
 0x54d   : > { %4115 = vrcp.f32 %v2640_v62  ;;  %v3717_v31 = vmul.f32 -1.442695, %v2753_v27  ;;  %v2756_v20 = vadd.f32 %v3853_v39, %v5533_v7  ;;  %v2642_v36 = vadd.f32 1.0, %v4104_v60 }
 0x54e   : > { %4117 = vrcp.f32 %v2848_v38  ;;  %v3707_v39 = vmul.f32 -1.442695, %v2568_v3  ;;  %v2571_v38 = vadd.f32 %v5545_v22, %v5533_v7 }
 0x54f   : > { %4119 = vpow2.f32 %v3717_v31  ;;  %v3718_v9 = vmul.f32 -1.442695, %v2756_v20  ;;  %v3854_v44 = vpop.f32.mrb[60].mxu1 }
 0x550   : > { %4121 = vpow2.f32 %v3704_v8  ;;  %v3855_v32 = vpop.f32.mrb[61].mxu1 }
 0x551   : > { %v4106_v47 = vpop.eup %4105  ;;  %4123 = vpow2.f32 %v3718_v9  ;;  %v3856_v16 = vadd.f32 %v3855_v32, %v3854_v44  ;;  %v3857_v12 = vpop.f32.mrb[62].mxu1 }
 0x552   : > { %v4108_v33 = vpop.eup %4107  ;;  %4125 = vrcp.f32 %v2641_v6  ;;  %v2849_v51 = vadd.f32 1.0, %v4106_v47  ;;  %v3858_v63 = vpop.f32.mrb[63].mxu1  ;;  %v2576_v47 = vadd.f32 %v5547_v55, %v5533_v7 }
 0x553   : > { %v4110_v58 = vpop.eup %4109  ;;  %v2761_v54 = vadd.f32 %v3856_v16, %v5533_v7  ;;  %4127 = vpow2.f32 %v3705_v50  ;;  %v3859_v57 = vadd.f32 %v3858_v63, %v3857_v12  ;;  %v2643_v10 = vadd.f32 1.0, %v4108_v33 }
 0x554   : > { %4129 = vrcp.f32 %v2849_v51  ;;  %v2850_v45 = vadd.f32 1.0, %v4110_v58  ;;  %v4112_v62 = vpop.eup %4111  ;;  %v3708_v16 = vmul.f32 -1.442695, %v2571_v38  ;;  %v2584_v38 = vadd.f32 %v5552_v43, %v5533_v7 }
 0x555   : > { %4131 = vrcp.f32 %v2642_v36  ;;  %v3719_v28 = vmul.f32 -1.442695, %v2761_v54  ;;  %v2764_v37 = vadd.f32 %v3859_v57, %v5533_v7  ;;  %v2644_v31 = vadd.f32 1.0, %v4112_v62 }
 0x556   : > { %v4114_v53 = vpop.eup %4113  ;;  %4133 = vrcp.f32 %v2850_v45  ;;  %v3709_v45 = vmul.f32 -1.442695, %v2576_v47  ;;  %v2579_v62 = vadd.f32 %v5549_v46, %v5533_v7  ;;  %v3711_v47 = vmul.f32 -1.442695, %v2584_v38 }
 0x557   : > { %v4116_v15 = vpop.eup %4115  ;;  %4135 = vpow2.f32 %v3719_v28  ;;  %v3720_v23 = vmul.f32 -1.442695, %v2764_v37  ;;  %v3860_v27 = vpop.f32.mrb[64].mxu1  ;;  %3085 = vperm.xlu1 %3915, %v4114_v53  }
 0x558   : > { %v4118_v11 = vpop.eup %4117  ;;  %4137 = vpow2.f32 %v3706_v24  ;;  %v3861_v48 = vpop.f32.mrb[65].mxu1 }
 0x559   : > { %v4120_v8 = vpop.eup %4119  ;;  %4139 = vpow2.f32 %v3720_v23  ;;  %v3862_v20 = vadd.f32 %v3861_v48, %v3860_v27  ;;  %v3863_v60 = vpop.f32.mrb[66].mxu1  ;;  %3090 = vperm.xlu0 %3914, %v4118_v11  }
 0x55a   : > { %v4122_v6 = vpop.eup %4121  ;;  %4141 = vrcp.f32 %v2643_v10  ;;  %v2851_v9 = vadd.f32 1.0, %v4120_v8  ;;  %v3864_v44 = vpop.f32.mrb[67].mxu1 }
 0x55b   : > { %v4124_v50 = vpop.eup %4123  ;;  %v2769_v32 = vadd.f32 %v3862_v20, %v5533_v7  ;;  %4143 = vpow2.f32 %v3707_v39  ;;  %v3865_v4 = vadd.f32 %v3864_v44, %v3863_v60  ;;  %2911 = vperm.xlu1 %3915, %v4116_v15   ;;  %v2645_v58 = vadd.f32 1.0, %v4122_v6 }
 0x55c   : > { %v4126_v22 = vpop.eup %4125  ;;  %4145 = vrcp.f32 %v2851_v9  ;;  %v2852_v36 = vadd.f32 1.0, %v4124_v50 }
 0x55d   : > { %v4128_v12 = vpop.eup %4127  ;;  %4147 = vrcp.f32 %v2644_v31  ;;  %v3721_v33 = vmul.f32 -1.442695, %v2769_v32  ;;  %v2772_v51 = vadd.f32 %v3865_v4, %v5533_v7  ;;  %2916 = vperm.xlu0 %3914, %v4126_v22   ;;  %v3710_v31 = vmul.f32 -1.442695, %v2579_v62 }
 0x55e   : > { %v4130_v63 = vpop.eup %4129  ;;  %4149 = vrcp.f32 %v2852_v36  ;;  %v2646_v37 = vadd.f32 1.0, %v4128_v12  ;;  %v2587_v36 = vadd.f32 %v5554_v19, %v5533_v7 }
 0x55f   : > { %v4132_v54 = vpop.eup %4131  ;;  %4151 = vpow2.f32 %v3721_v33  ;;  %v3722_v57 = vmul.f32 -1.442695, %v2772_v51  ;;  %v3866_v3 = vpop.f32.mrb[68].mxu1  ;;  %3095 = vperm.xlu1 %3915, %v4130_v63  }
 0x560   : > { %v4134_v55 = vpop.eup %4133  ;;  %4153 = vpow2.f32 %v3708_v16  ;;  %v3867_v24 = vpop.f32.mrb[69].mxu1  ;;  %v3712_v19 = vmul.f32 -1.442695, %v2587_v36 }
 0x561   : > { %v4136_v28 = vpop.eup %4135  ;;  %4155 = vpow2.f32 %v3722_v57  ;;  %v3868_v53 = vadd.f32 %v3867_v24, %v3866_v3  ;;  %v3869_v10 = vpop.f32.mrb[70].mxu1  ;;  %3100 = vperm.xlu0 %3914, %v4134_v55  }
 0x562   : > { %v4138_v15 = vpop.eup %4137  ;;  %4157 = vrcp.f32 %v2645_v58  ;;  %v2853_v23 = vadd.f32 1.0, %v4136_v28  ;;  %v3870_v27 = vpop.f32.mrb[71].mxu1 }
 0x563   : > { %v4140_v39 = vpop.eup %4139  ;;  %v2777_v11 = vadd.f32 %v3868_v53, %v5533_v7  ;;  %4159 = vpow2.f32 %v3709_v45  ;;  %v3871_v48 = vadd.f32 %v3870_v27, %v3869_v10  ;;  %2921 = vperm.xlu1 %3915, %v4132_v54   ;;  %v2647_v44 = vadd.f32 1.0, %v4138_v15 }
 0x564   : > { %v4142_v46 = vpop.eup %4141  ;;  %4161 = vrcp.f32 %v2853_v23  ;;  %v2854_v8 = vadd.f32 1.0, %v4140_v39 }
 0x565   : > { %v4144_v20 = vpop.eup %4143  ;;  %4163 = vrcp.f32 %v2646_v37  ;;  %v3723_v60 = vmul.f32 -1.442695, %v2777_v11  ;;  %v2780_v6 = vadd.f32 %v3871_v48, %v5533_v7  ;;  %2926 = vperm.xlu0 %3914, %v4142_v46  }
 0x566   : > { %v4146_v9 = vpop.eup %4145  ;;  %4165 = vrcp.f32 %v2854_v8  ;;  %v2648_v12 = vadd.f32 1.0, %v4144_v20 }
 0x567   : > { %v4148_v50 = vpop.eup %4147  ;;  %4167 = vpow2.f32 %v3723_v60  ;;  %v3724_v32 = vmul.f32 -1.442695, %v2780_v6  ;;  %v3872_v4 = vpop.f32.mrb[72].mxu1  ;;  %3105 = vperm.xlu1 %3915, %v4146_v9  }
 0x568   : > { %v4150_v43 = vpop.eup %4149  ;;  %4169 = vpow2.f32 %v3710_v31  ;;  %v3873_v22 = vpop.f32.mrb[73].mxu1 }
 0x569   : > { %v4152_v16 = vpop.eup %4151  ;;  %4171 = vpow2.f32 %v3724_v32  ;;  %v3874_v33 = vadd.f32 %v3873_v22, %v3872_v4  ;;  %v3875_v51 = vpop.f32.mrb[74].mxu1  ;;  %3110 = vperm.xlu0 %3914, %v4150_v43  }
 0x56a   : > { %v4154_v63 = vpop.eup %4153  ;;  %4173 = vrcp.f32 %v2647_v44  ;;  %v2855_v58 = vadd.f32 1.0, %v4152_v16  ;;  %v3876_v54 = vpop.f32.mrb[75].mxu1 }
 0x56b   : > { %v4156_v57 = vpop.eup %4155  ;;  %v2785_v3 = vadd.f32 %v3874_v33, %v5533_v7  ;;  %4175 = vpow2.f32 %v3711_v47  ;;  %v3877_v45 = vadd.f32 %v3876_v54, %v3875_v51  ;;  %2931 = vperm.xlu1 %3915, %v4148_v50   ;;  %v2649_v10 = vadd.f32 1.0, %v4154_v63 }
 0x56c   : > { %v4158_v55 = vpop.eup %4157  ;;  %4177 = vrcp.f32 %v2855_v58  ;;  %v2856_v24 = vadd.f32 1.0, %v4156_v57 }
 0x56d   : > { %v4160_v62 = vpop.eup %4159  ;;  %4179 = vrcp.f32 %v2648_v12  ;;  %v3725_v28 = vmul.f32 -1.442695, %v2785_v3  ;;  %v2788_v37 = vadd.f32 %v3877_v45, %v5533_v7  ;;  %2936 = vperm.xlu0 %3914, %v4158_v55  }
 0x56e   : > { %v4162_v53 = vpop.eup %4161  ;;  %4181 = vrcp.f32 %v2856_v24  ;;  %v2650_v38 = vadd.f32 1.0, %v4160_v62 }
 0x56f   : > { %v4164_v15 = vpop.eup %4163  ;;  %4183 = vpow2.f32 %v3725_v28  ;;  %v3726_v23 = vmul.f32 -1.442695, %v2788_v37  ;;  %v3878_v27 = vpop.f32.mrb[76].mxu1  ;;  %3115 = vperm.xlu1 %3915, %v4162_v53  }
 0x570   : > { %v4166_v39 = vpop.eup %4165  ;;  %4185 = vpow2.f32 %v3712_v19  ;;  %v3879_v11 = vpop.f32.mrb[77].mxu1 }
 0x571   : > { %v4168_v48 = vpop.eup %4167  ;;  %4187 = vpow2.f32 %v3726_v23  ;;  %v3880_v46 = vadd.f32 %v3879_v11, %v3878_v27  ;;  %v3881_v8 = vpop.f32.mrb[78].mxu1  ;;  %3120 = vperm.xlu0 %3914, %v4166_v39  }
 0x572   : > { %v4170_v31 = vpop.eup %4169  ;;  %4189 = vrcp.f32 %v2649_v10  ;;  %v2857_v20 = vadd.f32 1.0, %v4168_v48  ;;  %v3882_v60 = vpop.f32.mrb[79].mxu1 }
 0x573   : > { %v4172_v6 = vpop.eup %4171  ;;  %v2793_v9 = vadd.f32 %v3880_v46, %v5533_v7  ;;  %v3883_v44 = vadd.f32 %v3882_v60, %v3881_v8  ;;  %2941 = vperm.xlu1 %3915, %v4164_v15   ;;  %v2651_v36 = vadd.f32 1.0, %v4170_v31  ;;  %v2896_v46 = vadd.f32 1.0, %v5502_v30  ;;  %v6116_v8 = vld [vmem:[#allocation5_spill] sm:$0xff] }
 0x574   : > { %v4174_v50 = vpop.eup %4173  ;;  %4191 = vrcp.f32 %v2857_v20  ;;  %v2858_v32 = vadd.f32 1.0, %v4172_v6 }
 0x575   : > { %v4176_v4 = vpop.eup %4175  ;;  %4193 = vrcp.f32 %v2650_v38  ;;  %v3727_v47 = vmul.f32 -1.442695, %v2793_v9  ;;  %v2796_v43 = vadd.f32 %v3883_v44, %v5533_v7  ;;  %2946 = vperm.xlu0 %3914, %v4174_v50   ;;  %v2895_v38 = vadd.f32 1.0, %v5500_v41 }
 0x576   : > { %v4178_v22 = vpop.eup %4177  ;;  %4195 = vrcp.f32 %v2858_v32  ;;  %v2652_v63 = vadd.f32 1.0, %v4176_v4  ;;  %v5600_v20 = vrot.slane %v2896_v46, %v6116_v8 }
 0x577   : > { %v4180_v16 = vpop.eup %4179  ;;  %4197 = vpow2.f32 %v3727_v47  ;;  %v3728_v12 = vmul.f32 -1.442695, %v2796_v43  ;;  %3125 = vperm.xlu1 %3915, %v4178_v22   ;;  %v5597_v31 = vrot.slane %v2895_v38, %v6116_v8 }
 0x578   : > { %v4182_v33 = vpop.eup %4181  ;;  %v3020_v44 = vmul.f32 %v5600_v20, %v4774_v25  ;;  %v3022_v47 = vmul.f32 %v5600_v20, %v4782_v26 }
 0x579   : > { %v4184_v51 = vpop.eup %4183  ;;  %4199 = vpow2.f32 %v3728_v12  ;;  %3130 = vperm.xlu0 %3914, %v4182_v33   ;;  %v3019_v50 = vmul.f32 %v5597_v31, %v4770_v42  ;;  %v3021_v4 = vmul.f32 %v5597_v31, %v4778_v40  ;;  %v2897_v42 = vadd.f32 1.0, %v5508_v61 }
 0x57a   : > { %v4186_v58 = vpop.eup %4185  ;;  %4201 = vrcp.f32 %v2651_v36  ;;  %v2859_v54 = vadd.f32 1.0, %v4184_v51 }
 0x57b   : > { %v4188_v57 = vpop.eup %4187  ;;  %2951 = vperm.xlu1 %3915, %v4180_v16   ;;  %v2653_v55 = vadd.f32 1.0, %v4186_v58  ;;  %v6117_v58 = vld [vmem:[#allocation26_spill] sm:$0xff] }
 0x57c   : > { %v4190_v3 = vpop.eup %4189  ;;  %4203 = vrcp.f32 %v2859_v54  ;;  %v2860_v7 = vadd.f32 1.0, %v4188_v57  ;;  %v6118_v57 = vld [vmem:[#allocation27_spill] sm:$0xff] }
 0x57d   : > { %4205 = vrcp.f32 %v2652_v63  ;;  %2956 = vperm.xlu0 %3914, %v4190_v3  }
 0x57e   : > { %v4192_v45 = vpop.eup %4191  ;;  %4207 = vrcp.f32 %v2860_v7 }
 0x57f   : > { %v4194_v24 = vpop.eup %4193  ;;  %3135 = vperm.xlu1 %3915, %v4192_v45   ;;  %4209 = vrcp.f32 %v2653_v55  ;;  %v6119_v55 = vld [vmem:[#allocation70_spill] sm:$0xff] }
 0x580   : > { %v4196_v19 = vpop.eup %4195 }
 0x581   : > { %v4198_v62 = vpop.eup %4197  ;;  %3140 = vperm.xlu0 %3914, %v4196_v19   ;;  %v6120_v19 = vld [vmem:[#allocation71_spill] sm:$0xff] }
 0x582   : > { %v2861_v28 = vadd.f32 1.0, %v4198_v62 }
 0x583   : > { %v4200_v37 = vpop.eup %4199  ;;  %2961 = vperm.xlu1 %3915, %v4194_v24  }
 0x584   : > { %v4202_v53 = vpop.eup %4201  ;;  %4211 = vrcp.f32 %v2861_v28  ;;  %v2862_v10 = vadd.f32 1.0, %v4200_v37  ;;  %v6121_v37 = vld [vmem:[#allocation30_spill] sm:$0xff] }
 0x585   : > { %2966 = vperm.xlu0 %3914, %v4202_v53  }
 0x586   : > { %v4204_v15 = vpop.eup %4203  ;;  %4213 = vrcp.f32 %v2862_v10  ;;  %v6123_v10 = vld [vmem:[#allocation34_spill] sm:$0xff] }
 0x587   : > { %v4206_v23 = vpop.eup %4205  ;;  %3145 = vperm.xlu1 %3915, %v4204_v15   ;;  %v3025_v15 = vmul.f32 %v5597_v31, %v6123_v10 }
 0x588   : > { %v4208_v27 = vpop.eup %4207 }
 0x589   : > { %3150 = vperm.xlu0 %3914, %v4208_v27   ;;  %v4210_v39 = vpop.eup %4209 }
 0x58b   : > { %2971 = vperm.xlu1 %3915, %v4206_v23   ;;  %v6124_v23 = vld [vmem:[#allocation32_spill] sm:$0xff] }
 0x58c   : > { %v3024_v27 = vmul.f32 %v5600_v20, %v6124_v23 }
 0x58d   : > { %2976 = vperm.xlu0 %3914, %v4210_v39   ;;  %v6125_v39 = vld [vmem:[#allocation36_spill] sm:$0xff] }
 0x58e   : > { %v4212_v11 = vpop.eup %4211 }
 0x58f   : > { %3155 = vperm.xlu1 %3915, %v4212_v11   ;;  %v3026_v11 = vmul.f32 %v5600_v20, %v6125_v39 }
 0x590   : > { %v4214_v48 = vpop.eup %4213 }
 0x591   : > { %3160 = vperm.xlu0 %3914, %v4214_v48   ;;  %v6126_v48 = vld [vmem:[#allocation67_spill] sm:$0xff] }
 0x59a   : > { %v2902_v60 = vpop.permute.xlu0 %2901 }
 0x59b   : > { %v2979_v6 = vmul.f32 %v2902_v60, %v5064_v2  ;;  %v2980_v9 = vmul.f32 %v2902_v60, %v5072_v14 }
 0x59c   : > { %v2907_v41 = vpop.permute.xlu1 %2906 }
 0x59d   : > { %v2981_v30 = vmul.f32 %v2907_v41, %v5060_v17  ;;  %v2982_v32 = vmul.f32 %v2907_v41, %v5068_v56  ;;  %v3051_v2 = vadd.f32 %v3019_v50, %v2979_v6  ;;  %v3052_v43 = vadd.f32 %v3020_v44, %v2980_v9  ;;  %v6127_v9 = vld [vmem:[#allocation28_spill] sm:$0xff] }
 0x59e   : > { %v2898_v17 = vadd.f32 1.0, %v5510_v21  ;;  %v5617_v56 = vrot.slane %v2897_v42, %v6116_v8  ;;  %v6132_v42 = vld [vmem:[#allocation33_spill] sm:$0xff] }
 0x59f   : > { %v3053_v14 = vadd.f32 %v3021_v4, %v2981_v30  ;;  %v3054_v22 = vadd.f32 %v3022_v47, %v2982_v32  ;;  %v6128_v30 = vld [vmem:[#allocation29_spill] sm:$0xff] }
 0x5a0   : > { %v5620_v40 = vrot.slane %v2898_v17, %v6116_v8  ;;  %v3203_v33 = vmul.f32 %v5617_v56, %v6071_v59  ;;  %v3205_v61 = vmul.f32 %v5617_v56, %v6073_v34 }
 0x5a1   : > { %v3279_v36 = vpack.c.bf16 %v3053_v14, %v3051_v2  ;;  %v3280_v25 = vpack.c.bf16 %v3054_v22, %v3052_v43  ;;  %v6129_v2 = vld [vmem:[#allocation31_spill] sm:$0xff] }
 0x5a2   : > { %v3206_v21 = vmul.f32 %v5620_v40, %v6074_v13  ;;  %v3204_v3 = vmul.f32 %v5620_v40, %v6118_v57  ;;  %v3023_v13 = vmul.f32 %v5597_v31, %v6121_v37  ;;  %v3207_v43 = vmul.f32 %v5617_v56, %v6129_v2  ;;  %v6130_v14 = vld [vmem:[#allocation35_spill] sm:$0xff] }
 0x5a3   : > { %3295 = vmatprep.subr.bf16.mxu0 %v3280_v25  ;;  %v3209_v22 = vmul.f32 %v5617_v56, %v6130_v14  ;;  %v3208_v17 = vmul.f32 %v5620_v40, %v6132_v42 }
 0x5a4   : > { %3296 = vmatpush1.bf16.xpose.msra.mxu0 %v3279_v36  ;;  %v6131_v36 = vld [vmem:[#allocation86_spill] sm:$0xff] }
 0x5d6   : > { %v3086_v16 = vpop.permute.xlu1 %3085 }
 0x5d7   : > { %v3163_v26 = vmul.f32 %v3086_v16, %v5208_v29  ;;  %v3164_v12 = vmul.f32 %v3086_v16, %v5212_v1  ;;  %v6133_v16 = vld [vmem:[#allocation37_spill] sm:$0xff] }
 0x5d8   : > { %v3091_v51 = vpop.permute.xlu0 %3090 }
 0x5d9   : > { %v3165_v63 = vmul.f32 %v3091_v51, %v5218_v18  ;;  %v3166_v54 = vmul.f32 %v3091_v51, %v6117_v58  ;;  %v3235_v7 = vadd.f32 %v3203_v33, %v3163_v26  ;;  %v3236_v24 = vadd.f32 %v3204_v3, %v3164_v12  ;;  %v6122_v18 = vld [vmem:[#allocation66_spill] sm:$0xff]  ;;  %v6134_v12 = vld [vmem:[#allocation87_spill] sm:$0xff] }
 0x5da   : > { %v2912_v29 = vpop.permute.xlu1 %2911  ;;  %v3210_v26 = vmul.f32 %v5620_v40, %v6133_v16  ;;  %v6135_v58 = vld [vmem:[#allocation74_spill] sm:$0xff] }
 0x5db   : > { %v3237_v1 = vadd.f32 %v3205_v61, %v3165_v63  ;;  %v3238_v45 = vadd.f32 %v3206_v21, %v3166_v54  ;;  %v2983_v59 = vmul.f32 %v2912_v29, %v6119_v55  ;;  %v2984_v62 = vmul.f32 %v2912_v29, %v6120_v19  ;;  %v6136_v29 = vld [vmem:[#allocation75_spill] sm:$0xff]  ;;  %v6137_v55 = vld [vmem:[#allocation38_spill] sm:$0xff] }
 0x5dc   : > { %v2917_v34 = vpop.permute.xlu0 %2916 }
 0x5dd   : > { %v3351_v28 = vpack.c.bf16 %v3237_v1, %v3235_v7  ;;  %v2985_v53 = vmul.f32 %v2917_v34, %v6122_v18  ;;  %v2986_v38 = vmul.f32 %v2917_v34, %v6126_v48  ;;  %v3352_v8 = vpack.c.bf16 %v3238_v45, %v3236_v24  ;;  %v6138_v24 = vld [vmem:[#allocation68_spill] sm:$0xff] }
 0x5de   : > { %v3096_v46 = vpop.permute.xlu1 %3095  ;;  %v3055_v60 = vadd.f32 %v3023_v13, %v2983_v59  ;;  %v3056_v50 = vadd.f32 %v3024_v27, %v2984_v62  ;;  %v3027_v59 = vmul.f32 %v5597_v31, %v6137_v55  ;;  %v6139_v62 = vld [vmem:[#allocation42_spill] sm:$0xff]  ;;  %v6141_v13 = vld [vmem:[#allocation44_spill] sm:$0xff] }
 0x5df   : > { %v3057_v6 = vadd.f32 %v3025_v15, %v2985_v53  ;;  %v3167_v44 = vmul.f32 %v3096_v46, %v6127_v9  ;;  %v3058_v41 = vadd.f32 %v3026_v11, %v2986_v38  ;;  %v3168_v32 = vmul.f32 %v3096_v46, %v6128_v30  ;;  %3367 = vmatprep.subr.bf16.mxu1 %v3352_v8  ;;  %v6142_v53 = vld [vmem:[#allocation69_spill] sm:$0xff]  ;;  %v6143_v11 = vld [vmem:[#allocation88_spill] sm:$0xff] }
 0x5e0   : > { %v3101_v4 = vpop.permute.xlu0 %3100  ;;  %3368 = vmatpush1.bf16.xpose.msra.mxu1 %v3351_v28  ;;  %v3029_v34 = vmul.f32 %v5597_v31, %v6139_v62  ;;  %v6140_v28 = vld [vmem:[#allocation40_spill] sm:$0xff]  ;;  %v3030_v18 = vmul.f32 %v5600_v20, %v6141_v13  ;;  %v6144_v8 = vld [vmem:[#allocation89_spill] sm:$0xff] }
 0x5e1   : > { %v3281_v47 = vpack.c.bf16 %v3057_v6, %v3055_v60  ;;  %v3169_v25 = vmul.f32 %v3101_v4, %v6131_v36  ;;  %v3170_v33 = vmul.f32 %v3101_v4, %v6134_v12  ;;  %v3282_v61 = vpack.c.bf16 %v3058_v41, %v3056_v50  ;;  %v6146_v41 = vld [vmem:[#allocation43_spill] sm:$0xff] }
 0x5e2   : > { %v2922_v51 = vpop.permute.xlu1 %2921  ;;  %v3239_v21 = vadd.f32 %v3207_v43, %v3167_v44  ;;  %v3240_v57 = vadd.f32 %v3208_v17, %v3168_v32  ;;  %v3028_v37 = vmul.f32 %v5600_v20, %v6140_v28  ;;  %v6145_v44 = vld [vmem:[#allocation39_spill] sm:$0xff]  ;;  %v3213_v30 = vmul.f32 %v5617_v56, %v6146_v41  ;;  %v6147_v32 = vld [vmem:[#allocation90_spill] sm:$0xff]  ;;  %v6149_v43 = vld [vmem:[#allocation45_spill] sm:$0xff] }
 0x5e3   : > { %v3241_v63 = vadd.f32 %v3209_v22, %v3169_v25  ;;  %v2987_v54 = vmul.f32 %v2922_v51, %v6135_v58  ;;  %v3242_v3 = vadd.f32 %v3210_v26, %v3170_v33  ;;  %v2988_v7 = vmul.f32 %v2922_v51, %v6136_v29  ;;  %3297 = vmatprep.subr.bf16.mxu0 %v3282_v61  ;;  %v6150_v22 = vld [vmem:[#allocation91_spill] sm:$0xff]  ;;  %v6151_v26 = vld [vmem:[#allocation78_spill] sm:$0xff] }
 0x5e4   : > { %v2927_v1 = vpop.permute.xlu0 %2926  ;;  %3298 = vmatpush1.bf16.xpose.msra.mxu0 %v3281_v47  ;;  %v3211_v50 = vmul.f32 %v5617_v56, %v6145_v44  ;;  %v6148_v47 = vld [vmem:[#allocation41_spill] sm:$0xff]  ;;  %v3214_v14 = vmul.f32 %v5620_v40, %v6149_v43  ;;  %v6152_v61 = vld [vmem:[#allocation79_spill] sm:$0xff] }
 0x5e5   : > { %v3353_v45 = vpack.c.bf16 %v3241_v63, %v3239_v21  ;;  %v2989_v19 = vmul.f32 %v2927_v1, %v6138_v24  ;;  %v2990_v10 = vmul.f32 %v2927_v1, %v6142_v53  ;;  %v3354_v23 = vpack.c.bf16 %v3242_v3, %v3240_v57  ;;  %v6154_v3 = vld [vmem:[#allocation72_spill] sm:$0xff] }
 0x5e6   : > { %v3106_v15 = vpop.permute.xlu1 %3105  ;;  %v3059_v27 = vadd.f32 %v3027_v59, %v2987_v54  ;;  %v3060_v38 = vadd.f32 %v3028_v37, %v2988_v7  ;;  %v3212_v2 = vmul.f32 %v5620_v40, %v6148_v47  ;;  %v6153_v54 = vld [vmem:[#allocation46_spill] sm:$0xff]  ;;  %v6157_v59 = vld [vmem:[#allocation52_spill] sm:$0xff] }
 0x5e7   : > { %v3061_v39 = vadd.f32 %v3029_v34, %v2989_v19  ;;  %v3171_v48 = vmul.f32 %v3106_v15, %v6143_v11  ;;  %v3062_v46 = vadd.f32 %v3030_v18, %v2990_v10  ;;  %v3172_v60 = vmul.f32 %v3106_v15, %v6144_v8  ;;  %3369 = vmatprep.subr.bf16.mxu1 %v3354_v23  ;;  %v6155_v7 = vld [vmem:[#allocation50_spill] sm:$0xff]  ;;  %v6158_v19 = vld [vmem:[#allocation73_spill] sm:$0xff]  ;;  %v6159_v18 = vld [vmem:[#allocation92_spill] sm:$0xff] }
 0x5e8   : > { %v3111_v6 = vpop.permute.xlu0 %3110  ;;  %3370 = vmatpush1.bf16.xpose.msra.mxu1 %v3353_v45  ;;  %v3031_v57 = vmul.f32 %v5597_v31, %v6153_v54  ;;  %v3033_v1 = vmul.f32 %v5597_v31, %v6155_v7  ;;  %v6156_v45 = vld [vmem:[#allocation48_spill] sm:$0xff]  ;;  %v3034_v24 = vmul.f32 %v5600_v20, %v6157_v59  ;;  %v6160_v23 = vld [vmem:[#allocation93_spill] sm:$0xff] }
 0x5e9   : > { %v3283_v9 = vpack.c.bf16 %v3061_v39, %v3059_v27  ;;  %v3173_v4 = vmul.f32 %v3111_v6, %v6147_v32  ;;  %v3174_v36 = vmul.f32 %v3111_v6, %v6150_v22  ;;  %v3284_v42 = vpack.c.bf16 %v3062_v46, %v3060_v38  ;;  %v6162_v46 = vld [vmem:[#allocation51_spill] sm:$0xff] }
 0x5ea   : > { %v2932_v25 = vpop.permute.xlu1 %2931  ;;  %v3243_v17 = vadd.f32 %v3211_v50, %v3171_v48  ;;  %v3244_v33 = vadd.f32 %v3212_v2, %v3172_v60  ;;  %v3032_v55 = vmul.f32 %v5600_v20, %v6156_v45  ;;  %v6161_v48 = vld [vmem:[#allocation47_spill] sm:$0xff]  ;;  %v3217_v8 = vmul.f32 %v5617_v56, %v6162_v46  ;;  %v6163_v60 = vld [vmem:[#allocation94_spill] sm:$0xff]  ;;  %v6165_v50 = vld [vmem:[#allocation53_spill] sm:$0xff] }
 0x5eb   : > { %v3245_v16 = vadd.f32 %v3213_v30, %v3173_v4  ;;  %v2991_v12 = vmul.f32 %v2932_v25, %v6151_v26  ;;  %v3246_v51 = vadd.f32 %v3214_v14, %v3174_v36  ;;  %v2992_v21 = vmul.f32 %v2932_v25, %v6152_v61  ;;  %3299 = vmatprep.subr.bf16.mxu0 %v3284_v42  ;;  %v6166_v30 = vld [vmem:[#allocation95_spill] sm:$0xff]  ;;  %v6167_v14 = vld [vmem:[#allocation82_spill] sm:$0xff] }
 0x5ec   : > { %v2937_v63 = vpop.permute.xlu0 %2936  ;;  %3300 = vmatpush1.bf16.xpose.msra.mxu0 %v3283_v9  ;;  %v3215_v38 = vmul.f32 %v5617_v56, %v6161_v48  ;;  %v6164_v9 = vld [vmem:[#allocation49_spill] sm:$0xff]  ;;  %v3218_v41 = vmul.f32 %v5620_v40, %v6165_v50  ;;  %v6168_v42 = vld [vmem:[#allocation83_spill] sm:$0xff] }
 0x5ed   : > { %v3355_v58 = vpack.c.bf16 %v3245_v16, %v3243_v17  ;;  %v2993_v29 = vmul.f32 %v2937_v63, %v6154_v3  ;;  %v2994_v62 = vmul.f32 %v2937_v63, %v6158_v19  ;;  %v3356_v28 = vpack.c.bf16 %v3246_v51, %v3244_v33  ;;  %v6170_v51 = vld [vmem:[#allocation76_spill] sm:$0xff] }
 0x5ee   : > { %v3116_v34 = vpop.permute.xlu1 %3115  ;;  %v3063_v37 = vadd.f32 %v3031_v57, %v2991_v12  ;;  %v3064_v10 = vadd.f32 %v3032_v55, %v2992_v21  ;;  %v3216_v44 = vmul.f32 %v5620_v40, %v6164_v9  ;;  %v6169_v12 = vld [vmem:[#allocation54_spill] sm:$0xff]  ;;  %v6173_v57 = vld [vmem:[#allocation60_spill] sm:$0xff] }
 0x5ef   : > { %v3065_v13 = vadd.f32 %v3033_v1, %v2993_v29  ;;  %v3175_v53 = vmul.f32 %v3116_v34, %v6159_v18  ;;  %v3066_v15 = vadd.f32 %v3034_v24, %v2994_v62  ;;  %v3176_v27 = vmul.f32 %v3116_v34, %v6160_v23  ;;  %3371 = vmatprep.subr.bf16.mxu1 %v3356_v28  ;;  %v6171_v21 = vld [vmem:[#allocation58_spill] sm:$0xff]  ;;  %v6174_v29 = vld [vmem:[#allocation77_spill] sm:$0xff]  ;;  %v6175_v24 = vld [vmem:[#allocation96_spill] sm:$0xff] }
 0x5f0   : > { %v3121_v39 = vpop.permute.xlu0 %3120  ;;  %3372 = vmatpush1.bf16.xpose.msra.mxu1 %v3355_v58  ;;  %v3035_v33 = vmul.f32 %v5597_v31, %v6169_v12  ;;  %v3037_v63 = vmul.f32 %v5597_v31, %v6171_v21  ;;  %v6172_v58 = vld [vmem:[#allocation56_spill] sm:$0xff]  ;;  %v3038_v3 = vmul.f32 %v5600_v20, %v6173_v57  ;;  %v6176_v28 = vld [vmem:[#allocation97_spill] sm:$0xff]  ;;  %v5741_v12 = vmul.f32 0.0, %v5600_v20 }
 0x5f1   : > { %v3285_v11 = vpack.c.bf16 %v3065_v13, %v3063_v37  ;;  %v3177_v6 = vmul.f32 %v3121_v39, %v6163_v60  ;;  %v3178_v32 = vmul.f32 %v3121_v39, %v6166_v30  ;;  %v3286_v47 = vpack.c.bf16 %v3066_v15, %v3064_v10  ;;  %v6178_v15 = vld [vmem:[#allocation59_spill] sm:$0xff] }
 0x5f2   : > { %v2942_v4 = vpop.permute.xlu1 %2941  ;;  %v3247_v2 = vadd.f32 %v3215_v38, %v3175_v53  ;;  %v3248_v36 = vadd.f32 %v3216_v44, %v3176_v27  ;;  %v3036_v54 = vmul.f32 %v5600_v20, %v6172_v58  ;;  %v6177_v53 = vld [vmem:[#allocation55_spill] sm:$0xff]  ;;  %v3221_v23 = vmul.f32 %v5617_v56, %v6178_v15  ;;  %v6179_v27 = vld [vmem:[#allocation98_spill] sm:$0xff]  ;;  %v6181_v38 = vld [vmem:[#allocation61_spill] sm:$0xff] }
 0x5f3   : > { %v3249_v43 = vadd.f32 %v3217_v8, %v3177_v6  ;;  %v2995_v22 = vmul.f32 %v2942_v4, %v6167_v14  ;;  %v3250_v25 = vadd.f32 %v3218_v41, %v3178_v32  ;;  %v2996_v17 = vmul.f32 %v2942_v4, %v6168_v42  ;;  %3301 = vmatprep.subr.bf16.mxu0 %v3286_v47  ;;  %v6182_v8 = vld [vmem:[#allocation99_spill] sm:$0xff]  ;;  %v6183_v41 = vld [vmem:[#allocation84_spill] sm:$0xff]  ;;  %v6184_v47 = vld [vmem:[#allocation85_spill] sm:$0xff] }
 0x5f4   : > { %v2947_v16 = vpop.permute.xlu0 %2946  ;;  %3302 = vmatpush1.bf16.xpose.msra.mxu0 %v3285_v11  ;;  %v3219_v10 = vmul.f32 %v5617_v56, %v6177_v53  ;;  %v6180_v11 = vld [vmem:[#allocation57_spill] sm:$0xff]  ;;  %v3222_v46 = vmul.f32 %v5620_v40, %v6181_v38 }
 0x5f5   : > { %v3357_v26 = vpack.c.bf16 %v3249_v43, %v3247_v2  ;;  %v2997_v61 = vmul.f32 %v2947_v16, %v6170_v51  ;;  %v2998_v7 = vmul.f32 %v2947_v16, %v6174_v29  ;;  %v3358_v45 = vpack.c.bf16 %v3250_v25, %v3248_v36  ;;  %v6186_v25 = vld [vmem:[#allocation80_spill] sm:$0xff]  ;;  %v6190_v29 = vld [vmem:[#allocation103_spill] sm:$0xff] }
 0x5f6   : > { %v3126_v1 = vpop.permute.xlu1 %3125  ;;  %v3067_v55 = vadd.f32 %v3035_v33, %v2995_v22  ;;  %v3068_v62 = vadd.f32 %v3036_v54, %v2996_v17  ;;  %v3220_v48 = vmul.f32 %v5620_v40, %v6180_v11  ;;  %v6185_v22 = vld [vmem:[#allocation62_spill] sm:$0xff]  ;;  %v5736_v17 = vmul.f32 0.0, %v5597_v31  ;;  %v6187_v16 = vld [vmem:[#allocation64_spill] sm:$0xff]  ;;  %v6188_v33 = vld [vmem:[#allocation81_spill] sm:$0xff] }
 0x5f7   : > { %v3069_v59 = vadd.f32 %v3037_v63, %v2997_v61  ;;  %v3179_v19 = vmul.f32 %v3126_v1, %v6175_v24  ;;  %v3070_v34 = vadd.f32 %v3038_v3, %v2998_v7  ;;  %v3180_v37 = vmul.f32 %v3126_v1, %v6176_v28  ;;  %3373 = vmatprep.subr.bf16.mxu1 %v3358_v45  ;;  %v6189_v54 = vld [vmem:[#allocation102_spill] sm:$0xff]  ;;  %v6192_v24 = vld [vmem:[#allocation100_spill] sm:$0xff] }
 0x5f8   : > { %v3131_v13 = vpop.permute.xlu0 %3130  ;;  %3374 = vmatpush1.bf16.xpose.msra.mxu1 %v3357_v26  ;;  %v3039_v36 = vmul.f32 %v5597_v31, %v6185_v22  ;;  %v3040_v26 = vmul.f32 %v5600_v20, %v6187_v16  ;;  %v5757_v28 = vmul.f32 0.0, %v5620_v40 }
 0x5f9   : > { %v3287_v18 = vpack.c.bf16 %v3069_v59, %v3067_v55  ;;  %v3181_v39 = vmul.f32 %v3131_v13, %v6179_v27  ;;  %v3182_v60 = vmul.f32 %v3131_v13, %v6182_v8  ;;  %v3288_v9 = vpack.c.bf16 %v3070_v34, %v3068_v62  ;;  %v6191_v55 = vld [vmem:[#allocation63_spill] sm:$0xff]  ;;  %v6193_v62 = vld [vmem:[#allocation65_spill] sm:$0xff] }
 0x5fa   : > { %v2952_v6 = vpop.permute.xlu1 %2951  ;;  %v3251_v44 = vadd.f32 %v3219_v10, %v3179_v19  ;;  %v3252_v32 = vadd.f32 %v3220_v48, %v3180_v37  ;;  %v3223_v20 = vmul.f32 %v5617_v56, %v6191_v55  ;;  %v5751_v59 = vmul.f32 0.0, %v5617_v56  ;;  %v6194_v37 = vld [vmem:[#allocation101_spill] sm:$0xff] }
 0x5fb   : > { %v3253_v50 = vadd.f32 %v3221_v23, %v3181_v39  ;;  %v2999_v30 = vmul.f32 %v2952_v6, %v6183_v41  ;;  %v3254_v4 = vadd.f32 %v3222_v46, %v3182_v60  ;;  %v3000_v2 = vmul.f32 %v2952_v6, %v6184_v47  ;;  %3303 = vmatprep.subr.bf16.mxu0 %v3288_v9 }
 0x5fc   : > { %v2957_v43 = vpop.permute.xlu0 %2956  ;;  %3304 = vmatpush1.bf16.xpose.msra.mxu0 %v3287_v18  ;;  %v3224_v34 = vmul.f32 %v5620_v40, %v6193_v62 }
 0x5fd   : > { %v3359_v14 = vpack.c.bf16 %v3253_v50, %v3251_v44  ;;  %v3001_v42 = vmul.f32 %v2957_v43, %v6186_v25  ;;  %v3002_v51 = vmul.f32 %v2957_v43, %v6188_v33  ;;  %v3360_v21 = vpack.c.bf16 %v3254_v4, %v3252_v32 }
 0x5fe   : > { %v3136_v61 = vpop.permute.xlu1 %3135  ;;  %v3071_v63 = vadd.f32 %v3039_v36, %v2999_v30  ;;  %v3072_v3 = vadd.f32 %v3040_v26, %v3000_v2 }
 0x5ff   : > { %v3073_v58 = vadd.f32 %v5736_v17, %v3001_v42  ;;  %v3183_v57 = vmul.f32 %v3136_v61, %v6189_v54  ;;  %v3074_v31 = vadd.f32 %v5741_v12, %v3002_v51  ;;  %v3184_v7 = vmul.f32 %v3136_v61, %v6190_v29  ;;  %3375 = vmatprep.subr.bf16.mxu1 %v3360_v21 }
 0x600   : > { %v3141_v1 = vpop.permute.xlu0 %3140  ;;  %3376 = vmatpush1.bf16.xpose.msra.mxu1 %v3359_v14 }
 0x601   : > { %v3289_v45 = vpack.c.bf16 %v3073_v58, %v3071_v63  ;;  %v3185_v19 = vmul.f32 %v3141_v1, %v6192_v24  ;;  %v3186_v13 = vmul.f32 %v3141_v1, %v6194_v37  ;;  %v3290_v53 = vpack.c.bf16 %v3074_v31, %v3072_v3 }
 0x602   : > { %v2962_v18 = vpop.permute.xlu1 %2961  ;;  %v3255_v10 = vadd.f32 %v3223_v20, %v3183_v57  ;;  %v3256_v27 = vadd.f32 %v3224_v34, %v3184_v7  ;;  %v1676_v63 = vadd.f32 1.0, %v5506_v49  ;;  %v1678_v20 = vadd.f32 1.0, %v5515_v35  ;;  %v6196_v35 = vld [vmem:[#allocation7_spill] sm:$0xff] }
 0x603   : > { %v3257_v15 = vadd.f32 %v5751_v59, %v3185_v19  ;;  %v3003_v23 = vmul.f32 %v2962_v18, %v6186_v25  ;;  %v3258_v56 = vadd.f32 %v5757_v28, %v3186_v13  ;;  %v3004_v39 = vmul.f32 %v2962_v18, %v6188_v33  ;;  %3305 = vmatprep.subr.bf16.mxu0 %v3290_v53 }
 0x604   : > { %v2967_v11 = vpop.permute.xlu0 %2966  ;;  %3306 = vmatpush1.bf16.xpose.msra.mxu0 %v3289_v45 }
 0x605   : > { %v3361_v48 = vpack.c.bf16 %v3257_v15, %v3255_v10  ;;  %v3005_v40 = vmul.f32 %v2967_v11, %v6186_v25  ;;  %v3006_v38 = vmul.f32 %v2967_v11, %v6188_v33  ;;  %v3362_v8 = vpack.c.bf16 %v3258_v56, %v3256_v27  ;;  %v6195_v10 = vld [vmem:[#allocation9_spill] sm:$0xff]  ;;  %v6198_v56 = vld [vmem:[#allocation20_spill] sm:$0xff] }
 0x606   : > { %v3146_v46 = vpop.permute.xlu1 %3145  ;;  %v3075_v60 = vadd.f32 %v5736_v17, %v3003_v23  ;;  %v3076_v44 = vadd.f32 %v5741_v12, %v3004_v39 }
 0x607   : > { %v3077_v6 = vadd.f32 %v5736_v17, %v3005_v40  ;;  %v3187_v9 = vmul.f32 %v3146_v46, %v6192_v24  ;;  %v3078_v50 = vadd.f32 %v5741_v12, %v3006_v38  ;;  %v3188_v41 = vmul.f32 %v3146_v46, %v6194_v37  ;;  %3377 = vmatprep.subr.bf16.mxu1 %v3362_v8  ;;  %v6201_v46 = vld [vmem:[#allocation17_spill] sm:$0xff] }
 0x608   : > { %v3151_v30 = vpop.permute.xlu0 %3150  ;;  %3378 = vmatpush1.bf16.xpose.msra.mxu1 %v3361_v48  ;;  %v6200_v48 = vld [vmem:[#allocation8_spill] sm:$0xff]  ;;  %v1707_v8 = vmul.f32 %v5526_v52, %v6201_v46 }
 0x609   : > { %v3291_v32 = vpack.c.bf16 %v3077_v6, %v3075_v60  ;;  %v3189_v4 = vmul.f32 %v3151_v30, %v6192_v24  ;;  %v3190_v47 = vmul.f32 %v3151_v30, %v6194_v37  ;;  %v3292_v43 = vpack.c.bf16 %v3078_v50, %v3076_v44  ;;  %v6202_v60 = vld [vmem:[#allocation21_spill] sm:$0xff]  ;;  %v6203_v44 = vld [vmem:[#allocation14_spill] sm:$0xff] }
 0x60a   : > { %v2972_v2 = vpop.permute.xlu1 %2971  ;;  %v3259_v14 = vadd.f32 %v5751_v59, %v3187_v9  ;;  %v3260_v42 = vadd.f32 %v5757_v28, %v3188_v41  ;;  %v1711_v6 = vmul.f32 %v5526_v52, %v6202_v60  ;;  %v6204_v41 = vld [vmem:[#allocation18_spill] sm:$0xff] }
 0x60b   : > { %v3261_v22 = vadd.f32 %v5751_v59, %v3189_v4  ;;  %v3007_v36 = vmul.f32 %v2972_v2, %v6186_v25  ;;  %v3262_v16 = vadd.f32 %v5757_v28, %v3190_v47  ;;  %v3008_v26 = vmul.f32 %v2972_v2, %v6188_v33  ;;  %3307 = vmatprep.subr.bf16.mxu0 %v3292_v43  ;;  %v6205_v4 = vld [vmem:[#allocation24_spill] sm:$0xff] }
 0x60c   : > { %v2977_v51 = vpop.permute.xlu0 %2976  ;;  %3308 = vmatpush1.bf16.xpose.msra.mxu0 %v3291_v32  ;;  %v3274_v32 = vpack.c.bf16 %v1711_v6, %v1707_v8  ;;  %v1713_v47 = vmul.f32 %v5519_v0, %v6205_v4  ;;  %v1717_v2 = vmul.f32 0.0, %v5519_v0 }
 0x60d   : > { %v3363_v61 = vpack.c.bf16 %v3261_v22, %v3259_v14  ;;  %v3009_v21 = vmul.f32 %v2977_v51, %v6186_v25  ;;  %v3010_v58 = vmul.f32 %v2977_v51, %v6188_v33  ;;  %v3364_v57 = vpack.c.bf16 %v3262_v16, %v3260_v42  ;;  %v6206_v14 = vld [vmem:[#allocation15_spill] sm:$0xff] }
 0x60e   : > { %v3156_v54 = vpop.permute.xlu1 %3155  ;;  %v3079_v3 = vadd.f32 %v5736_v17, %v3007_v36  ;;  %v3080_v7 = vadd.f32 %v5741_v12, %v3008_v26  ;;  %v1683_v33 = vrot.slane %v1676_v63, %v4536_v5  ;;  %v6207_v36 = vld [vmem:[#allocation19_spill] sm:$0xff]  ;;  %v3276_v16 = vpack.c.bf16 %v1717_v2, %v1713_v47  ;;  %v6208_v26 = vld [vmem:[#allocation25_spill] sm:$0xff]  ;;  %v6209_v63 = vld [vmem:[#allocation22_spill] sm:$0xff] }
 0x60f   : > { %v3081_v31 = vadd.f32 %v5736_v17, %v3009_v21  ;;  %v3191_v29 = vmul.f32 %v3156_v54, %v6192_v24  ;;  %v3082_v1 = vadd.f32 %v5741_v12, %v3010_v58  ;;  %v3192_v45 = vmul.f32 %v3156_v54, %v6194_v37  ;;  %3379 = vmatprep.subr.bf16.mxu1 %v3364_v57 }
 0x610   : > { %v3161_v25 = vpop.permute.xlu0 %3160  ;;  %3380 = vmatpush1.bf16.xpose.msra.mxu1 %v3363_v61  ;;  %v1696_v15 = vmul.f32 %v1683_v33, %v6195_v10  ;;  %v1700_v23 = vmul.f32 %v1683_v33, %v6196_v35  ;;  %v1704_v50 = vmul.f32 %v1683_v33, %v6203_v44  ;;  %v1708_v30 = vmul.f32 %v1683_v33, %v6204_v41 }
 0x611   : > { %v3293_v55 = vpack.c.bf16 %v3081_v31, %v3079_v3  ;;  %v3193_v49 = vmul.f32 %v3161_v25, %v6192_v24  ;;  %v3194_v17 = vmul.f32 %v3161_v25, %v6194_v37  ;;  %v3294_v19 = vpack.c.bf16 %v3082_v1, %v3080_v7  ;;  %v6197_v37 = vld [vmem:[#allocation16_spill] sm:$0xff]  ;;  %v6210_v3 = vld [vmem:[#allocation23_spill] sm:$0xff] }
 0x612   : > { %v3263_v62 = vadd.f32 %v5751_v59, %v3191_v29  ;;  %v3264_v12 = vadd.f32 %v5757_v28, %v3192_v45  ;;  %v1691_v24 = vrot.slane %v1678_v20, %v4536_v5  ;;  %v1705_v27 = vmul.f32 %v5519_v0, %v6197_v37 }
 0x613   : > { %v3265_v34 = vadd.f32 %v5751_v59, %v3193_v49  ;;  %v3266_v13 = vadd.f32 %v5757_v28, %v3194_v17  ;;  %3309 = vmatprep.subr.bf16.mxu0 %v3294_v19  ;;  %v1709_v59 = vmul.f32 %v5519_v0, %v6198_v56  ;;  %v3267_v39 = vpack.c.bf16 %v1700_v23, %v1696_v15  ;;  %v6199_v28 = vld [vmem:[#allocation6_spill] sm:$0xff] }
 0x614   : > { %3310 = vmatpush1.bf16.xpose.msra.mxu0 %v3293_v55  ;;  %v1698_v11 = vmul.f32 %v1691_v24, %v6199_v28  ;;  %v1702_v40 = vmul.f32 %v1691_v24, %v6200_v48  ;;  %v3271_v43 = vpack.c.bf16 %v1708_v30, %v1704_v50  ;;  %v1706_v22 = vmul.f32 %v1691_v24, %v6206_v14 }
 0x615   : > { %v3365_v18 = vpack.c.bf16 %v3265_v34, %v3263_v62  ;;  %v3366_v53 = vpack.c.bf16 %v3266_v13, %v3264_v12  ;;  %v3272_v38 = vpack.c.bf16 %v1709_v59, %v1705_v27  ;;  %v1710_v42 = vmul.f32 %v1691_v24, %v6207_v36 }
 0x616   : > { %v3269_v9 = vpack.c.bf16 %v1702_v40, %v1698_v11  ;;  %v1715_v51 = vmul.f32 %v5526_v52, %v6208_v26  ;;  %v1719_v61 = vmul.f32 0.0, %v5526_v52  ;;  %v1712_v58 = vmul.f32 %v1683_v33, %v6209_v63 }
 0x617   : > { %3381 = vmatprep.subr.bf16.mxu1 %v3366_v53  ;;  %v3273_v21 = vpack.c.bf16 %v1710_v42, %v1706_v22  ;;  %v1716_v54 = vmul.f32 0.0, %v1683_v33  ;;  %v1714_v31 = vmul.f32 %v1691_v24, %v6210_v3  ;;  %v1718_v29 = vmul.f32 0.0, %v1691_v24 }
 0x618   : > { %3382 = vmatpush1.bf16.xpose.msra.mxu1 %v3365_v18  ;;  %v3278_v0 = vpack.c.bf16 %v1719_v61, %v1715_v51 }
 0x619   : > { %v3275_v57 = vpack.c.bf16 %v1716_v54, %v1712_v58  ;;  %v3277_v7 = vpack.c.bf16 %v1718_v29, %v1714_v31 }
 0x61b   : > { %3328 = vmatmul.mubr.bf16.vlgmr.msra.gmra.mrb[80].mxu0 %v3267_v39 }
 0x61c   : > { %3335 = vmatprep.mubr.bf16.mxu0 %v3272_v38 }
 0x61f   : > { %3400 = vmatmul.mubr.bf16.vlgmr.msra.gmra.mrb[80].mxu1 %v3269_v9 }
 0x620   : > { %3407 = vmatprep.mubr.bf16.mxu1 %v3274_v32 }
 0x623   : > { %3336 = vmatmul.mubr.bf16.gmra.mrb[84].mxu0 %v3271_v43 }
 0x624   : > { %3343 = vmatprep.mubr.bf16.mxu0 %v3276_v16 }
 0x627   : > { %3408 = vmatmul.mubr.bf16.gmra.mrb[84].mxu1 %v3273_v21 }
 0x628   : > { %3415 = vmatprep.mubr.bf16.mxu1 %v3278_v0 }
 0x62b   : > { %3344 = vmatmul.mubr.bf16.gmra.mrb[88].mxu0 %v3275_v57 }
 0x62f   : > { %3416 = vmatmul.mubr.bf16.gmra.mrb[88].mxu1 %v3277_v7 }
 0x6ee   : > { %v3329_v1 = vpop.f32.mrb[80].mxu0 }
 0x6ef   : > { %v3331_v45 = vpop.f32.mrb[81].mxu0 }
 0x6f0   : > { %v3332_v25 = vpop.f32.mrb[82].mxu0 }
 0x6f1   : > { %3423 = vrot.lane.b32.xlu1 %v3332_v25, %s4246_s18  ;;  %v3334_v52 = vpop.f32.mrb[83].mxu0 }
 0x6f2   : > { %v3401_v55 = vpop.f32.mrb[80].mxu1 }
 0x6f3   : > { %v3403_v49 = vpop.f32.mrb[81].mxu1 }
 0x6f4   : > { %v3404_v20 = vpop.f32.mrb[82].mxu1 }
 0x6f5   : > { %3460 = vrot.lane.b32.xlu0 %v3404_v20, %s4246_s18  ;;  %v3406_v33 = vpop.f32.mrb[83].mxu1 }
 0x6f6   : > { %v3337_v17 = vpop.f32.mrb[84].mxu0 }
 0x6f7   : > { %3426 = vrot.lane.b32.xlu1 %v3337_v17, %s4247_s19  ;;  %v3339_v19 = vpop.f32.mrb[85].mxu0 }
 0x6f8   : > { %v3340_v62 = vpop.f32.mrb[86].mxu0  ;;  %v3507_v19 = vstv %s3731_s29 }
 0x6f9   : > { %v3342_v34 = vpop.f32.mrb[87].mxu0 }
 0x6fa   : > { %v3409_v12 = vpop.f32.mrb[84].mxu1 }
 0x6fb   : > { %3463 = vrot.lane.b32.xlu0 %v3409_v12, %s4247_s19  ;;  %v3411_v13 = vpop.f32.mrb[85].mxu1  ;;  %3429 = vrot.lane.b32.xlu1 %v3340_v62, %s4248_s21 }
 0x6fc   : > { %v3412_v18 = vpop.f32.mrb[86].mxu1 }
 0x6fd   : > { %v3414_v24 = vpop.f32.mrb[87].mxu1 }
 0x6fe   : > { %v3345_v53 = vpop.f32.mrb[88].mxu0 }
 0x6ff   : > { %3466 = vrot.lane.b32.xlu0 %v3412_v18, %s4248_s21  ;;  %3432 = vrot.lane.b32.xlu1 %v3345_v53, %s4249_s23  ;;  %v3347_v10 = vpop.f32.mrb[89].mxu0 }
 0x700   : > { %v3348_v15 = vpop.f32.mrb[90].mxu0 }
 0x701   : > { %v3349_v35 = vpop.f32.mrb[91].mxu0 }
 0x702   : > { %v3417_v23 = vpop.f32.mrb[88].mxu1 }
 0x703   : > { %3469 = vrot.lane.b32.xlu0 %v3417_v23, %s4249_s23  ;;  %v3419_v37 = vpop.f32.mrb[89].mxu1 }
 0x704   : > { %v3420_v27 = vpop.f32.mrb[90].mxu1 }
 0x705   : > { %v3421_v56 = vpop.f32.mrb[91].mxu1 }
 0x763   : > { %v3424_v59 = vpop.permute.xlu1 %3423 }
 0x764   : > { %v3425_v11 = vadd.f32 %v3424_v59, %v3329_v1 }
 0x767   : > { %v3461_v39 = vpop.permute.xlu0 %3460 }
 0x768   : > { %v3462_v46 = vadd.f32 %v3461_v39, %v3401_v55  ;;  %v3503_v55 = vstv %s3730_s20 }
 0x769   : > { %v3427_v28 = vpop.permute.xlu1 %3426 }
 0x76a   : > { %v3428_v38 = vadd.f32 %v3427_v28, %v3425_v11 }
 0x76d   : > { %v3464_v48 = vpop.permute.xlu0 %3463  ;;  %v3430_v40 = vpop.permute.xlu1 %3429 }
 0x76e   : > { %v3431_v8 = vadd.f32 %v3430_v40, %v3428_v38  ;;  %v3465_v9 = vadd.f32 %v3464_v48, %v3462_v46 }
 0x771   : > { %v3467_v60 = vpop.permute.xlu0 %3466  ;;  %v3433_v6 = vpop.permute.xlu1 %3432 }
 0x772   : > { %v3434_v44 = vadd.f32 %v3433_v6, %v3431_v8  ;;  %v3468_v50 = vadd.f32 %v3467_v60, %v3465_v9 }
 0x774   : > { %3435 = vrot.lane.b32.xlu1 %v3434_v44, %s4245_s22 }
 0x775   : > { %v3470_v41 = vpop.permute.xlu0 %3469 }
 0x776   : > { %v3471_v30 = vadd.f32 %v3470_v41, %v3468_v50 }
 0x778   : > { %3472 = vrot.lane.b32.xlu0 %v3471_v30, %s4245_s22  ;;  %3441 = vrot.lane.b32.xlu1 %v3434_v44, %s4250_s26  ;;  %s3729_s22 = sld [smem:[#allocation2 + $0x6]] }
 0x77c   : > { %3478 = vrot.lane.b32.xlu0 %v3471_v30, %s4250_s26  ;;  %3447 = vrot.lane.b32.xlu1 %v3434_v44, %s4251_s27 }
 0x77e   : > { %v3499_v52 = vstv %s3729_s22 }
 0x780   : > { %3484 = vrot.lane.b32.xlu0 %v3471_v30, %s4251_s27  ;;  %3453 = vrot.lane.b32.xlu1 %v3434_v44, %s4252_s28 }
 0x784   : > { %3490 = vrot.lane.b32.xlu0 %v3471_v30, %s4252_s28 }
 0x7e6   : > { %v3436_v32 = vpop.permute.xlu1 %3435 }
 0x7e7   : > { %v3438_v2 = vrot.slane %v3436_v32, 1 }
 0x7e9   : > { %v3440_v42 = vadd.f32 %v3438_v2, %v3434_v44 }
 0x7ea   : > { %v3473_v4 = vpop.permute.xlu0 %3472  ;;  %v3442_v47 = vpop.permute.xlu1 %3441 }
 0x7eb   : > { %v3475_v22 = vrot.slane %v3473_v4, 1  ;;  %v3444_v36 = vrot.slane %v3442_v47, 2 }
 0x7ed   : > { %v3477_v21 = vadd.f32 %v3475_v22, %v3471_v30  ;;  %v3446_v63 = vadd.f32 %v3444_v36, %v3440_v42 }
 0x7ee   : > { %v3479_v43 = vpop.permute.xlu0 %3478  ;;  %v3448_v14 = vpop.permute.xlu1 %3447 }
 0x7ef   : > { %v3481_v16 = vrot.slane %v3479_v43, 2  ;;  %v3450_v26 = vrot.slane %v3448_v14, 3 }
 0x7f1   : > { %v3483_v0 = vadd.f32 %v3481_v16, %v3477_v21  ;;  %v3452_v57 = vadd.f32 %v3450_v26, %v3446_v63 }
 0x7f2   : > { %v3485_v51 = vpop.permute.xlu0 %3484  ;;  %v3454_v61 = vpop.permute.xlu1 %3453 }
 0x7f3   : > { %v3487_v58 = vrot.slane %v3485_v51, 3  ;;  %v3456_v54 = vrot.slane %v3454_v61, 4 }
 0x7f5   : > { %v3489_v31 = vadd.f32 %v3487_v58, %v3483_v0  ;;  %v3458_v29 = vadd.f32 %v3456_v54, %v3452_v57 }
 0x7f6   : > { %v3491_v3 = vpop.permute.xlu0 %3490 }
 0x7f7   : > { %v3493_v7 = vrot.slane %v3491_v3, 4  ;;  %v3459_v45 = vmul.f32 0.001, %v3458_v29 }
 0x7f9   : > { %v3495_v1 = vadd.f32 %v3493_v7, %v3489_v31 }
 0x7fb   : > { %v3496_v25 = vmul.f32 0.001, %v3495_v1 }
 0x7fd   : > { %v3498_v49 = vadd.f32 %v3496_v25, %v3459_v45  ;;  %v3502_v20 = vmul.f32 %v3496_v25, %v3459_v45 }
 0x7ff   : > { %v3500_v33 = vmul.f32 %v3499_v52, %v3498_v49  ;;  %v3504_v17 = vmul.f32 %v3503_v55, %v3502_v20 }
 0x801   : > { %v3505_v62 = vadd.f32 %v3504_v17, %v3500_v33 }
 0x803   : > { %v3508_v34 = vadd.f32 %v3507_v19, %v3505_v62 }
 0x805   : > { %v3512_v12 = vrot.slane %v3508_v34, %v4536_v5 }
 0x807   : > { %3513 = vst [vmem:[%s290_s10] sm:$0xff] %v3512_v12 }
 0x808 PF: > { %s18_s24 = sadd.s32 1, %s4240_s24  }
 0x809   : > { %p15_p1 = scmp.ge.s32.totalorder %s18_s24, 4  }
 0x80b   :  { %17 = sbr.rel (!%p15_p1) target bundleno = 1 (0x1), region = 83 }
 0x812   :  { %3533 = vsyncpa [#allocation3], 1 }
 0x813   :  { %3535 = vsyncpa [#allocation3 + $0x1], 1 }

</bundles_post_ra>
